<compile_context>
chip_gen: v7x
topology: tpu7x:2x2x1
jax: 0.10.0
libtpu: 0.0.40
codegen_flags: <defaults>
</compile_context>

<pallas_src>
import numpy as np
import jax
import jax.numpy as jnp
from jax import lax
from jax.experimental import pallas as pl
from jax.experimental.pallas import tpu as pltpu


# ------------------------- static LeNet-5 geometry ------------------------- #
H0, W0, C0 = 32, 32, 3         # input (H, W, C) inside the pipeline
K = 5                          # conv kernel size
C1, H1 = 6, 28                 # conv1: 6 channels, 28x28
P1H, P1W = 14, 14              # pool1 output
C2, H2 = 16, 10                # conv2: 16 channels, 10x10
P2H, P2W = 5, 5                # pool2 output
F1, F2, F3 = 120, 84, 10       # fc widths
NPAD = 128                     # lane-dense logits width
L1 = P1W * C1                  # 84  conv1 width-pooled lane width
L2 = P2W * C2                  # 80  conv2 width-pooled lane width


# ------------------------------ fused kernel ------------------------------- #

def _make_kernel(TB):
    """Build the fused LeNet-5 kernel for a per-grid-step batch of TB images."""
    f32 = jnp.float32

    def kernel(x_ref,                      # [H0, TB, W0*C0]  TB images, h-major
               w1e_ref, w1o_ref, b1_ref,   # conv1 banded weights / bias
               w2e_ref, w2o_ref, b2_ref,   # conv2 banded weights / bias
               wf1_ref, bf1_ref,           # fc1 (per pooled row slabs)
               wf2_ref, bf2_ref,           # fc2
               wf3_ref, bf3_ref,           # fc3 (padded to 128 lanes)
               o_ref):                     # [TB, NPAD]
        # ---- conv1; width pool folded into even/odd weight columns -------- #
        acc_e = jnp.zeros((H1 * TB, L1), f32)
        acc_o = jnp.zeros((H1 * TB, L1), f32)
        for kh in range(K):
            # rows (oh+kh)*TB + t for oh=0..27  ->  contiguous window
            xs = x_ref[kh:kh + H1, :, :].reshape(H1 * TB, W0 * C0)   # [28*TB, 96]
            acc_e = acc_e + jnp.dot(xs, w1e_ref[kh], preferred_element_type=f32)
            acc_o = acc_o + jnp.dot(xs, w1o_ref[kh], preferred_element_type=f32)
        y1 = jnp.maximum(acc_e, acc_o) + b1_ref[...]                 # [28*TB, 84]

        # ---- pool1 (height): even/odd rows are aligned TB-row halves ------ #
        y1p = y1.reshape(P1H, 2 * TB, L1)
        p1 = jnp.maximum(y1p[:, :TB, :], y1p[:, TB:, :]).reshape(P1H * TB, L1)

        # ---- conv2; width pool folded into even/odd weight columns -------- #
        acc2_e = jnp.zeros((H2 * TB, L2), f32)
        acc2_o = jnp.zeros((H2 * TB, L2), f32)
        for kh in range(K):
            ps = p1[kh * TB:(kh + H2) * TB, :]                       # [10*TB, 84]
            acc2_e = acc2_e + jnp.dot(ps, w2e_ref[kh], preferred_element_type=f32)
            acc2_o = acc2_o + jnp.dot(ps, w2o_ref[kh], preferred_element_type=f32)
        y2 = jnp.maximum(acc2_e, acc2_o) + b2_ref[...]               # [10*TB, 80]

        # ---- pool2 (height) ------------------------------------------------ #
        y2p = y2.reshape(P2H, 2 * TB, L2)
        p2 = jnp.maximum(y2p[:, :TB, :], y2p[:, TB:, :])             # [5, TB, 80]

        # ---- fc1 + ReLU (torch C,H,W flatten folded into per-row slabs) --- #
        acc1 = jnp.zeros((TB, F1), f32)
        for h in range(P2H):
            acc1 = acc1 + jnp.dot(p2[h], wf1_ref[h], preferred_element_type=f32)
        a1 = jnp.maximum(acc1 + bf1_ref[...], 0.0)                   # [TB, 120]

        # ---- fc2 + ReLU, fc3 (lane-dense padded logits) -------------------- #
        a2 = jnp.maximum(jnp.dot(a1, wf2_ref[...], preferred_element_type=f32)
                         + bf2_ref[...], 0.0)                        # [TB, 84]
        logits = (jnp.dot(a2, wf3_ref[...], preferred_element_type=f32)
                  + bf3_ref[...])                                    # [TB, 128]
        o_ref[...] = logits.astype(o_ref.dtype)                      # dense store

    return kernel


# --------------------------- one-time weight packing ------------------------ #

def _pack_conv_banded(w_oihw, bias, in_w, pool_w):
    """Banded conv weights for row-sliced matmuls over rows of width in_w*I.

    W_*[kh, (ow+kw)*I + c, pw*O + o] = w[o, c, kh, kw] with ow = 2*pw (+1 odd),
    so  X_row(oh+kh) @ W_*[kh]  accumulates the conv output at even/odd widths,
    already grouped for the 2x2 pool.  bias is tiled to [1, pool_w*O].
    """
    w = np.asarray(w_oihw, np.float32)
    O, I, KH, KW = w.shape
    We = np.zeros((KH, in_w * I, pool_w * O), np.float32)
    Wo = np.zeros((KH, in_w * I, pool_w * O), np.float32)
    for kh in range(KH):
        for kw in range(KW):
            blk = w[:, :, kh, kw].T                                  # [I, O]
            for pw in range(pool_w):
                for delta, dst in ((0, We), (1, Wo)):
                    ow = 2 * pw + delta
                    r0 = (ow + kw) * I
                    dst[kh, r0:r0 + I, pw * O:(pw + 1) * O] = blk
    bt = np.tile(np.asarray(bias, np.float32)[None, :], (1, pool_w))
    return jnp.asarray(We), jnp.asarray(Wo), jnp.asarray(bt)


def pack_params(params):
    """Pre-transpose / pre-reshape all weights once (out of the forward path)."""
    w1e, w1o, b1t = _pack_conv_banded(params["w1"], params["b1"],
                                      in_w=W0, pool_w=P1W)
    w2e, w2o, b2t = _pack_conv_banded(params["w2"], params["b2"],
                                      in_w=P1W, pool_w=P2W)

    # fc1: torch flattens [B,16,5,5] as c*25 + h*5 + w; our activation rows are
    # h with lanes w*16 + c, so reorder the weight accordingly per row h.
    wf1 = np.asarray(params["wf1"], np.float32)                      # [120, 400]
    wf1 = wf1.reshape(F1, C2, P2H, P2W).transpose(2, 3, 1, 0).reshape(P2H, P2W * C2, F1)
    bf1 = np.asarray(params["bf1"], np.float32)[None, :]

    wf2 = np.asarray(params["wf2"], np.float32).T                    # [120, 84]
    bf2 = np.asarray(params["bf2"], np.float32)[None, :]

    wf3 = np.zeros((F2, NPAD), np.float32)                           # pad to 128 lanes
    wf3[:, :F3] = np.asarray(params["wf3"], np.float32).T
    bf3 = np.zeros((1, NPAD), np.float32)
    bf3[0, :F3] = np.asarray(params["bf3"], np.float32)

    return {
        "w1e": w1e, "w1o": w1o, "b1t": b1t,
        "w2e": w2e, "w2o": w2o, "b2t": b2t,
        "wf1": jnp.asarray(wf1), "bf1": jnp.asarray(bf1),
        "wf2": jnp.asarray(wf2), "bf2": jnp.asarray(bf2),
        "wf3": jnp.asarray(wf3), "bf3": jnp.asarray(bf3),
    }


# ------------------------------- forward pass ------------------------------- #

def _choose_tb(batch):
    """Per-step image count: multiple of 8 (dense 8x128 stores), capped at 32."""
    return int(min(32, max(8, 8 * ((batch + 7) // 8))))


@jax.jit
def lenet5_pallas(packed, x_nchw):
    """Forward pass of Lenet5; x_nchw: [B, 3, 32, 32] -> logits [B, 10]."""
    B = x_nchw.shape[0]
    TB = _choose_tb(B)
    G = -(-B // TB)                   # grid steps
    Bp = G * TB                       # padded batch

    # NCHW -> [H, B, W*C]  (lane axis = w*C + c, image axis second).
    # TODO(synk): accept NHWC upstream to avoid this extra XLA relayout pass
    # at large serving batch sizes.
    x_arr = jnp.transpose(x_nchw, (2, 0, 3, 1)).reshape(H0, B, W0 * C0)
    if Bp != B:
        x_arr = jnp.pad(x_arr, ((0, 0), (0, Bp - B), (0, 0)))

    def rep_spec(a):  # whole-array block, resident across the batch grid
        nd = a.ndim
        return pl.BlockSpec(a.shape, lambda g, _nd=nd: (0,) * _nd)

    args = (x_arr,
            packed["w1e"], packed["w1o"], packed["b1t"],
            packed["w2e"], packed["w2o"], packed["b2t"],
            packed["wf1"], packed["bf1"],
            packed["wf2"], packed["bf2"],
            packed["wf3"], packed["bf3"])

    in_specs = [pl.BlockSpec((H0, TB, W0 * C0), lambda g: (0, g, 0))]
    in_specs += [rep_spec(a) for a in args[1:]]

    out = pl.pallas_call(
        _make_kernel(TB),
        out_shape=jax.ShapeDtypeStruct((Bp, NPAD), jnp.float32),
        grid=(G,),
        in_specs=in_specs,
        out_specs=pl.BlockSpec((TB, NPAD), lambda g: (g, 0)),
        compiler_params=pltpu.CompilerParams(
            dimension_semantics=("parallel",)),
    )(*args)
    return out[:B, :F3]


# --------------------------- params / reference ----------------------------- #

def init_params(key):
    """Deterministic synthetic params with the PyTorch module's shapes."""
    ks = jax.random.split(key, 10)

    def u(k, shape, fan_in):
        bound = 1.0 / jnp.sqrt(jnp.float32(fan_in))
        return jax.random.uniform(k, shape, jnp.float32, -bound, bound)

    return {
        "w1": u(ks[0], (6, 3, 5, 5), 3 * 5 * 5),
        "b1": u(ks[1], (6,), 3 * 5 * 5),
        "w2": u(ks[2], (16, 6, 5, 5), 6 * 5 * 5),
        "b2": u(ks[3], (16,), 6 * 5 * 5),
        "wf1": u(ks[4], (120, 16 * 5 * 5), 16 * 5 * 5),
        "bf1": u(ks[5], (120,), 16 * 5 * 5),
        "wf2": u(ks[6], (84, 120), 120),
        "bf2": u(ks[7], (84,), 120),
        "wf3": u(ks[8], (10, 84), 84),
        "bf3": u(ks[9], (10,), 84),
    }


def lenet5_reference(params, x):
    """Pure-JAX (XLA) reference mirroring the PyTorch forward exactly."""
    dn = ("NCHW", "OIHW", "NCHW")
    y = lax.conv_general_dilated(x, params["w1"], (1, 1), "VALID", dimension_numbers=dn)
    y = y + params["b1"][None, :, None, None]
    y = lax.reduce_window(y, -jnp.inf, lax.max, (1, 1, 2, 2), (1, 1, 2, 2), "VALID")
    y = lax.conv_general_dilated(y, params["w2"], (1, 1), "VALID", dimension_numbers=dn)
    y = y + params["b2"][None, :, None, None]
    y = lax.reduce_window(y, -jnp.inf, lax.max, (1, 1, 2, 2), (1, 1, 2, 2), "VALID")
    y = y.reshape(y.shape[0], -1)
    y = jnp.maximum(y @ params["wf1"].T + params["bf1"], 0.0)
    y = jnp.maximum(y @ params["wf2"].T + params["bf2"], 0.0)
    return y @ params["wf3"].T + params["bf3"]


if __name__ == "__main__":
    key = jax.random.PRNGKey(0)
    k_x, k_p = jax.random.split(key)

    x = jax.random.normal(k_x, (2, 3, 32, 32), jnp.float32)   # [b, 3, 32, 32]
    params = init_params(k_p)
    packed = pack_params(params)                               # one-time packing

    logits = jax.block_until_ready(lenet5_pallas(packed, x))
    assert logits.shape == (2, 10), logits.shape

    ref = jax.block_until_ready(lenet5_reference(params, x))
    max_err = float(jnp.max(jnp.abs(logits - ref)))
    assert max_err < 1e-3, f"max abs error vs reference: {max_err}"

    print("KERNEL_OK")
</pallas_src>

<mosaic_0001>
module attributes {stable_mosaic.version = 11 : i64} {
  func.func @kernel(%arg0: i32, %arg1: memref<32x8x96xf32, #tpu.memory_space<vmem>>, %arg2: memref<5x96x84xf32, #tpu.memory_space<vmem>>, %arg3: memref<5x96x84xf32, #tpu.memory_space<vmem>>, %arg4: memref<1x84xf32, #tpu.memory_space<vmem>>, %arg5: memref<5x84x80xf32, #tpu.memory_space<vmem>>, %arg6: memref<5x84x80xf32, #tpu.memory_space<vmem>>, %arg7: memref<1x80xf32, #tpu.memory_space<vmem>>, %arg8: memref<5x80x120xf32, #tpu.memory_space<vmem>>, %arg9: memref<1x120xf32, #tpu.memory_space<vmem>>, %arg10: memref<120x84xf32, #tpu.memory_space<vmem>>, %arg11: memref<1x84xf32, #tpu.memory_space<vmem>>, %arg12: memref<84x128xf32, #tpu.memory_space<vmem>>, %arg13: memref<1x128xf32, #tpu.memory_space<vmem>>, %arg14: memref<8x128xf32, #tpu.memory_space<vmem>>) attributes {dimension_semantics = [#tpu.dimension_semantics<parallel>], iteration_bounds = array<i64: 1>, scalar_prefetch = 0 : i64, scratch_operands = 0 : i64, tpu.core_type = #tpu.core_type<tc>, window_params = [{transform_indices = @transform_0, window_bounds = array<i64: 32, 8, 96>}, {pipeline_mode = #tpu.pipeline_mode<synchronous>, transform_indices = @transform_1, window_bounds = array<i64: 5, 96, 84>}, {pipeline_mode = #tpu.pipeline_mode<synchronous>, transform_indices = @transform_2, window_bounds = array<i64: 5, 96, 84>}, {pipeline_mode = #tpu.pipeline_mode<synchronous>, transform_indices = @transform_3, window_bounds = array<i64: 1, 84>}, {pipeline_mode = #tpu.pipeline_mode<synchronous>, transform_indices = @transform_4, window_bounds = array<i64: 5, 84, 80>}, {pipeline_mode = #tpu.pipeline_mode<synchronous>, transform_indices = @transform_5, window_bounds = array<i64: 5, 84, 80>}, {pipeline_mode = #tpu.pipeline_mode<synchronous>, transform_indices = @transform_6, window_bounds = array<i64: 1, 80>}, {pipeline_mode = #tpu.pipeline_mode<synchronous>, transform_indices = @transform_7, window_bounds = array<i64: 5, 80, 120>}, {pipeline_mode = #tpu.pipeline_mode<synchronous>, transform_indices = @transform_8, window_bounds = array<i64: 1, 120>}, {pipeline_mode = #tpu.pipeline_mode<synchronous>, transform_indices = @transform_9, window_bounds = array<i64: 120, 84>}, {pipeline_mode = #tpu.pipeline_mode<synchronous>, transform_indices = @transform_10, window_bounds = array<i64: 1, 84>}, {pipeline_mode = #tpu.pipeline_mode<synchronous>, transform_indices = @transform_11, window_bounds = array<i64: 84, 128>}, {pipeline_mode = #tpu.pipeline_mode<synchronous>, transform_indices = @transform_12, window_bounds = array<i64: 1, 128>}, {transform_indices = @transform_13, window_bounds = array<i64: 8, 128>}]} {
    %cst = arith.constant 0.000000e+00 : f32
    %0 = vector.broadcast %cst : f32 to vector<224x84xf32>
    %cst_0 = arith.constant 0.000000e+00 : f32
    %1 = vector.broadcast %cst_0 : f32 to vector<224x84xf32>
    %c0 = arith.constant 0 : index
    %c0_1 = arith.constant 0 : index
    %c0_2 = arith.constant 0 : index
    %2 = vector.load %arg1[%c0, %c0_1, %c0_2] : memref<32x8x96xf32, #tpu.memory_space<vmem>>, vector<28x8x96xf32>
    %3 = vector.shape_cast %2 : vector<28x8x96xf32> to vector<224x96xf32>
    %c0_3 = arith.constant 0 : index
    %c0_4 = arith.constant 0 : index
    %c0_5 = arith.constant 0 : index
    %4 = vector.load %arg2[%c0_3, %c0_4, %c0_5] : memref<5x96x84xf32, #tpu.memory_space<vmem>>, vector<1x96x84xf32>
    %5 = vector.shape_cast %4 : vector<1x96x84xf32> to vector<96x84xf32>
    %cst_6 = arith.constant dense<0.000000e+00> : vector<224x84xf32>
    %6 = tpu.matmul %3, %5, %cst_6 {dimension_numbers = #tpu.dot_dimension_numbers<[1], [0], [0], [1], [0, 0, 1, 1], [], []>} : vector<224x96xf32>, vector<96x84xf32>, vector<224x84xf32> -> vector<224x84xf32>
    %7 = arith.addf %0, %6 : vector<224x84xf32>
    %c0_7 = arith.constant 0 : index
    %c0_8 = arith.constant 0 : index
    %c0_9 = arith.constant 0 : index
    %8 = vector.load %arg3[%c0_7, %c0_8, %c0_9] : memref<5x96x84xf32, #tpu.memory_space<vmem>>, vector<1x96x84xf32>
    %9 = vector.shape_cast %8 : vector<1x96x84xf32> to vector<96x84xf32>
    %cst_10 = arith.constant dense<0.000000e+00> : vector<224x84xf32>
    %10 = tpu.matmul %3, %9, %cst_10 {dimension_numbers = #tpu.dot_dimension_numbers<[1], [0], [0], [1], [0, 0, 1, 1], [], []>} : vector<224x96xf32>, vector<96x84xf32>, vector<224x84xf32> -> vector<224x84xf32>
    %11 = arith.addf %1, %10 : vector<224x84xf32>
    %c1 = arith.constant 1 : index
    %c0_11 = arith.constant 0 : index
    %c0_12 = arith.constant 0 : index
    %12 = vector.load %arg1[%c1, %c0_11, %c0_12] : memref<32x8x96xf32, #tpu.memory_space<vmem>>, vector<28x8x96xf32>
    %13 = vector.shape_cast %12 : vector<28x8x96xf32> to vector<224x96xf32>
    %c1_13 = arith.constant 1 : index
    %c0_14 = arith.constant 0 : index
    %c0_15 = arith.constant 0 : index
    %14 = vector.load %arg2[%c1_13, %c0_14, %c0_15] : memref<5x96x84xf32, #tpu.memory_space<vmem>>, vector<1x96x84xf32>
    %15 = vector.shape_cast %14 : vector<1x96x84xf32> to vector<96x84xf32>
    %cst_16 = arith.constant dense<0.000000e+00> : vector<224x84xf32>
    %16 = tpu.matmul %13, %15, %cst_16 {dimension_numbers = #tpu.dot_dimension_numbers<[1], [0], [0], [1], [0, 0, 1, 1], [], []>} : vector<224x96xf32>, vector<96x84xf32>, vector<224x84xf32> -> vector<224x84xf32>
    %17 = arith.addf %7, %16 : vector<224x84xf32>
    %c1_17 = arith.constant 1 : index
    %c0_18 = arith.constant 0 : index
    %c0_19 = arith.constant 0 : index
    %18 = vector.load %arg3[%c1_17, %c0_18, %c0_19] : memref<5x96x84xf32, #tpu.memory_space<vmem>>, vector<1x96x84xf32>
    %19 = vector.shape_cast %18 : vector<1x96x84xf32> to vector<96x84xf32>
    %cst_20 = arith.constant dense<0.000000e+00> : vector<224x84xf32>
    %20 = tpu.matmul %13, %19, %cst_20 {dimension_numbers = #tpu.dot_dimension_numbers<[1], [0], [0], [1], [0, 0, 1, 1], [], []>} : vector<224x96xf32>, vector<96x84xf32>, vector<224x84xf32> -> vector<224x84xf32>
    %21 = arith.addf %11, %20 : vector<224x84xf32>
    %c2 = arith.constant 2 : index
    %c0_21 = arith.constant 0 : index
    %c0_22 = arith.constant 0 : index
    %22 = vector.load %arg1[%c2, %c0_21, %c0_22] : memref<32x8x96xf32, #tpu.memory_space<vmem>>, vector<28x8x96xf32>
    %23 = vector.shape_cast %22 : vector<28x8x96xf32> to vector<224x96xf32>
    %c2_23 = arith.constant 2 : index
    %c0_24 = arith.constant 0 : index
    %c0_25 = arith.constant 0 : index
    %24 = vector.load %arg2[%c2_23, %c0_24, %c0_25] : memref<5x96x84xf32, #tpu.memory_space<vmem>>, vector<1x96x84xf32>
    %25 = vector.shape_cast %24 : vector<1x96x84xf32> to vector<96x84xf32>
    %cst_26 = arith.constant dense<0.000000e+00> : vector<224x84xf32>
    %26 = tpu.matmul %23, %25, %cst_26 {dimension_numbers = #tpu.dot_dimension_numbers<[1], [0], [0], [1], [0, 0, 1, 1], [], []>} : vector<224x96xf32>, vector<96x84xf32>, vector<224x84xf32> -> vector<224x84xf32>
    %27 = arith.addf %17, %26 : vector<224x84xf32>
    %c2_27 = arith.constant 2 : index
    %c0_28 = arith.constant 0 : index
    %c0_29 = arith.constant 0 : index
    %28 = vector.load %arg3[%c2_27, %c0_28, %c0_29] : memref<5x96x84xf32, #tpu.memory_space<vmem>>, vector<1x96x84xf32>
    %29 = vector.shape_cast %28 : vector<1x96x84xf32> to vector<96x84xf32>
    %cst_30 = arith.constant dense<0.000000e+00> : vector<224x84xf32>
    %30 = tpu.matmul %23, %29, %cst_30 {dimension_numbers = #tpu.dot_dimension_numbers<[1], [0], [0], [1], [0, 0, 1, 1], [], []>} : vector<224x96xf32>, vector<96x84xf32>, vector<224x84xf32> -> vector<224x84xf32>
    %31 = arith.addf %21, %30 : vector<224x84xf32>
    %c3 = arith.constant 3 : index
    %c0_31 = arith.constant 0 : index
    %c0_32 = arith.constant 0 : index
    %32 = vector.load %arg1[%c3, %c0_31, %c0_32] : memref<32x8x96xf32, #tpu.memory_space<vmem>>, vector<28x8x96xf32>
    %33 = vector.shape_cast %32 : vector<28x8x96xf32> to vector<224x96xf32>
    %c3_33 = arith.constant 3 : index
    %c0_34 = arith.constant 0 : index
    %c0_35 = arith.constant 0 : index
    %34 = vector.load %arg2[%c3_33, %c0_34, %c0_35] : memref<5x96x84xf32, #tpu.memory_space<vmem>>, vector<1x96x84xf32>
    %35 = vector.shape_cast %34 : vector<1x96x84xf32> to vector<96x84xf32>
    %cst_36 = arith.constant dense<0.000000e+00> : vector<224x84xf32>
    %36 = tpu.matmul %33, %35, %cst_36 {dimension_numbers = #tpu.dot_dimension_numbers<[1], [0], [0], [1], [0, 0, 1, 1], [], []>} : vector<224x96xf32>, vector<96x84xf32>, vector<224x84xf32> -> vector<224x84xf32>
    %37 = arith.addf %27, %36 : vector<224x84xf32>
    %c3_37 = arith.constant 3 : index
    %c0_38 = arith.constant 0 : index
    %c0_39 = arith.constant 0 : index
    %38 = vector.load %arg3[%c3_37, %c0_38, %c0_39] : memref<5x96x84xf32, #tpu.memory_space<vmem>>, vector<1x96x84xf32>
    %39 = vector.shape_cast %38 : vector<1x96x84xf32> to vector<96x84xf32>
    %cst_40 = arith.constant dense<0.000000e+00> : vector<224x84xf32>
    %40 = tpu.matmul %33, %39, %cst_40 {dimension_numbers = #tpu.dot_dimension_numbers<[1], [0], [0], [1], [0, 0, 1, 1], [], []>} : vector<224x96xf32>, vector<96x84xf32>, vector<224x84xf32> -> vector<224x84xf32>
    %41 = arith.addf %31, %40 : vector<224x84xf32>
    %c4 = arith.constant 4 : index
    %c0_41 = arith.constant 0 : index
    %c0_42 = arith.constant 0 : index
    %42 = vector.load %arg1[%c4, %c0_41, %c0_42] : memref<32x8x96xf32, #tpu.memory_space<vmem>>, vector<28x8x96xf32>
    %43 = vector.shape_cast %42 : vector<28x8x96xf32> to vector<224x96xf32>
    %c4_43 = arith.constant 4 : index
    %c0_44 = arith.constant 0 : index
    %c0_45 = arith.constant 0 : index
    %44 = vector.load %arg2[%c4_43, %c0_44, %c0_45] : memref<5x96x84xf32, #tpu.memory_space<vmem>>, vector<1x96x84xf32>
    %45 = vector.shape_cast %44 : vector<1x96x84xf32> to vector<96x84xf32>
    %cst_46 = arith.constant dense<0.000000e+00> : vector<224x84xf32>
    %46 = tpu.matmul %43, %45, %cst_46 {dimension_numbers = #tpu.dot_dimension_numbers<[1], [0], [0], [1], [0, 0, 1, 1], [], []>} : vector<224x96xf32>, vector<96x84xf32>, vector<224x84xf32> -> vector<224x84xf32>
    %47 = arith.addf %37, %46 : vector<224x84xf32>
    %c4_47 = arith.constant 4 : index
    %c0_48 = arith.constant 0 : index
    %c0_49 = arith.constant 0 : index
    %48 = vector.load %arg3[%c4_47, %c0_48, %c0_49] : memref<5x96x84xf32, #tpu.memory_space<vmem>>, vector<1x96x84xf32>
    %49 = vector.shape_cast %48 : vector<1x96x84xf32> to vector<96x84xf32>
    %cst_50 = arith.constant dense<0.000000e+00> : vector<224x84xf32>
    %50 = tpu.matmul %43, %49, %cst_50 {dimension_numbers = #tpu.dot_dimension_numbers<[1], [0], [0], [1], [0, 0, 1, 1], [], []>} : vector<224x96xf32>, vector<96x84xf32>, vector<224x84xf32> -> vector<224x84xf32>
    %51 = arith.addf %41, %50 : vector<224x84xf32>
    %52 = arith.maximumf %47, %51 : vector<224x84xf32>
    %c0_51 = arith.constant 0 : index
    %c0_52 = arith.constant 0 : index
    %53 = vector.load %arg4[%c0_51, %c0_52] : memref<1x84xf32, #tpu.memory_space<vmem>>, vector<1x84xf32>
    %54 = vector.broadcast %53 : vector<1x84xf32> to vector<224x84xf32>
    %55 = arith.addf %52, %54 : vector<224x84xf32>
    %56 = vector.shape_cast %55 : vector<224x84xf32> to vector<14x16x84xf32>
    %57 = vector.extract_strided_slice %56 {offsets = [0, 0, 0], sizes = [14, 8, 84], strides = [1, 1, 1]} : vector<14x16x84xf32> to vector<14x8x84xf32>
    %58 = vector.extract_strided_slice %56 {offsets = [0, 8, 0], sizes = [14, 8, 84], strides = [1, 1, 1]} : vector<14x16x84xf32> to vector<14x8x84xf32>
    %59 = arith.maximumf %57, %58 : vector<14x8x84xf32>
    %60 = vector.shape_cast %59 : vector<14x8x84xf32> to vector<112x84xf32>
    %cst_53 = arith.constant 0.000000e+00 : f32
    %61 = vector.broadcast %cst_53 : f32 to vector<80x80xf32>
    %cst_54 = arith.constant 0.000000e+00 : f32
    %62 = vector.broadcast %cst_54 : f32 to vector<80x80xf32>
    %63 = vector.extract_strided_slice %60 {offsets = [0, 0], sizes = [80, 84], strides = [1, 1]} : vector<112x84xf32> to vector<80x84xf32>
    %c0_55 = arith.constant 0 : index
    %c0_56 = arith.constant 0 : index
    %c0_57 = arith.constant 0 : index
    %64 = vector.load %arg5[%c0_55, %c0_56, %c0_57] : memref<5x84x80xf32, #tpu.memory_space<vmem>>, vector<1x84x80xf32>
    %65 = vector.shape_cast %64 : vector<1x84x80xf32> to vector<84x80xf32>
    %cst_58 = arith.constant dense<0.000000e+00> : vector<80x80xf32>
    %66 = tpu.matmul %63, %65, %cst_58 {dimension_numbers = #tpu.dot_dimension_numbers<[1], [0], [0], [1], [0, 0, 1, 1], [], []>} : vector<80x84xf32>, vector<84x80xf32>, vector<80x80xf32> -> vector<80x80xf32>
    %67 = arith.addf %61, %66 : vector<80x80xf32>
    %c0_59 = arith.constant 0 : index
    %c0_60 = arith.constant 0 : index
    %c0_61 = arith.constant 0 : index
    %68 = vector.load %arg6[%c0_59, %c0_60, %c0_61] : memref<5x84x80xf32, #tpu.memory_space<vmem>>, vector<1x84x80xf32>
    %69 = vector.shape_cast %68 : vector<1x84x80xf32> to vector<84x80xf32>
    %cst_62 = arith.constant dense<0.000000e+00> : vector<80x80xf32>
    %70 = tpu.matmul %63, %69, %cst_62 {dimension_numbers = #tpu.dot_dimension_numbers<[1], [0], [0], [1], [0, 0, 1, 1], [], []>} : vector<80x84xf32>, vector<84x80xf32>, vector<80x80xf32> -> vector<80x80xf32>
    %71 = arith.addf %62, %70 : vector<80x80xf32>
    %72 = vector.extract_strided_slice %60 {offsets = [8, 0], sizes = [80, 84], strides = [1, 1]} : vector<112x84xf32> to vector<80x84xf32>
    %c1_63 = arith.constant 1 : index
    %c0_64 = arith.constant 0 : index
    %c0_65 = arith.constant 0 : index
    %73 = vector.load %arg5[%c1_63, %c0_64, %c0_65] : memref<5x84x80xf32, #tpu.memory_space<vmem>>, vector<1x84x80xf32>
    %74 = vector.shape_cast %73 : vector<1x84x80xf32> to vector<84x80xf32>
    %cst_66 = arith.constant dense<0.000000e+00> : vector<80x80xf32>
    %75 = tpu.matmul %72, %74, %cst_66 {dimension_numbers = #tpu.dot_dimension_numbers<[1], [0], [0], [1], [0, 0, 1, 1], [], []>} : vector<80x84xf32>, vector<84x80xf32>, vector<80x80xf32> -> vector<80x80xf32>
    %76 = arith.addf %67, %75 : vector<80x80xf32>
    %c1_67 = arith.constant 1 : index
    %c0_68 = arith.constant 0 : index
    %c0_69 = arith.constant 0 : index
    %77 = vector.load %arg6[%c1_67, %c0_68, %c0_69] : memref<5x84x80xf32, #tpu.memory_space<vmem>>, vector<1x84x80xf32>
    %78 = vector.shape_cast %77 : vector<1x84x80xf32> to vector<84x80xf32>
    %cst_70 = arith.constant dense<0.000000e+00> : vector<80x80xf32>
    %79 = tpu.matmul %72, %78, %cst_70 {dimension_numbers = #tpu.dot_dimension_numbers<[1], [0], [0], [1], [0, 0, 1, 1], [], []>} : vector<80x84xf32>, vector<84x80xf32>, vector<80x80xf32> -> vector<80x80xf32>
    %80 = arith.addf %71, %79 : vector<80x80xf32>
    %81 = vector.extract_strided_slice %60 {offsets = [16, 0], sizes = [80, 84], strides = [1, 1]} : vector<112x84xf32> to vector<80x84xf32>
    %c2_71 = arith.constant 2 : index
    %c0_72 = arith.constant 0 : index
    %c0_73 = arith.constant 0 : index
    %82 = vector.load %arg5[%c2_71, %c0_72, %c0_73] : memref<5x84x80xf32, #tpu.memory_space<vmem>>, vector<1x84x80xf32>
    %83 = vector.shape_cast %82 : vector<1x84x80xf32> to vector<84x80xf32>
    %cst_74 = arith.constant dense<0.000000e+00> : vector<80x80xf32>
    %84 = tpu.matmul %81, %83, %cst_74 {dimension_numbers = #tpu.dot_dimension_numbers<[1], [0], [0], [1], [0, 0, 1, 1], [], []>} : vector<80x84xf32>, vector<84x80xf32>, vector<80x80xf32> -> vector<80x80xf32>
    %85 = arith.addf %76, %84 : vector<80x80xf32>
    %c2_75 = arith.constant 2 : index
    %c0_76 = arith.constant 0 : index
    %c0_77 = arith.constant 0 : index
    %86 = vector.load %arg6[%c2_75, %c0_76, %c0_77] : memref<5x84x80xf32, #tpu.memory_space<vmem>>, vector<1x84x80xf32>
    %87 = vector.shape_cast %86 : vector<1x84x80xf32> to vector<84x80xf32>
    %cst_78 = arith.constant dense<0.000000e+00> : vector<80x80xf32>
    %88 = tpu.matmul %81, %87, %cst_78 {dimension_numbers = #tpu.dot_dimension_numbers<[1], [0], [0], [1], [0, 0, 1, 1], [], []>} : vector<80x84xf32>, vector<84x80xf32>, vector<80x80xf32> -> vector<80x80xf32>
    %89 = arith.addf %80, %88 : vector<80x80xf32>
    %90 = vector.extract_strided_slice %60 {offsets = [24, 0], sizes = [80, 84], strides = [1, 1]} : vector<112x84xf32> to vector<80x84xf32>
    %c3_79 = arith.constant 3 : index
    %c0_80 = arith.constant 0 : index
    %c0_81 = arith.constant 0 : index
    %91 = vector.load %arg5[%c3_79, %c0_80, %c0_81] : memref<5x84x80xf32, #tpu.memory_space<vmem>>, vector<1x84x80xf32>
    %92 = vector.shape_cast %91 : vector<1x84x80xf32> to vector<84x80xf32>
    %cst_82 = arith.constant dense<0.000000e+00> : vector<80x80xf32>
    %93 = tpu.matmul %90, %92, %cst_82 {dimension_numbers = #tpu.dot_dimension_numbers<[1], [0], [0], [1], [0, 0, 1, 1], [], []>} : vector<80x84xf32>, vector<84x80xf32>, vector<80x80xf32> -> vector<80x80xf32>
    %94 = arith.addf %85, %93 : vector<80x80xf32>
    %c3_83 = arith.constant 3 : index
    %c0_84 = arith.constant 0 : index
    %c0_85 = arith.constant 0 : index
    %95 = vector.load %arg6[%c3_83, %c0_84, %c0_85] : memref<5x84x80xf32, #tpu.memory_space<vmem>>, vector<1x84x80xf32>
    %96 = vector.shape_cast %95 : vector<1x84x80xf32> to vector<84x80xf32>
    %cst_86 = arith.constant dense<0.000000e+00> : vector<80x80xf32>
    %97 = tpu.matmul %90, %96, %cst_86 {dimension_numbers = #tpu.dot_dimension_numbers<[1], [0], [0], [1], [0, 0, 1, 1], [], []>} : vector<80x84xf32>, vector<84x80xf32>, vector<80x80xf32> -> vector<80x80xf32>
    %98 = arith.addf %89, %97 : vector<80x80xf32>
    %99 = vector.extract_strided_slice %60 {offsets = [32, 0], sizes = [80, 84], strides = [1, 1]} : vector<112x84xf32> to vector<80x84xf32>
    %c4_87 = arith.constant 4 : index
    %c0_88 = arith.constant 0 : index
    %c0_89 = arith.constant 0 : index
    %100 = vector.load %arg5[%c4_87, %c0_88, %c0_89] : memref<5x84x80xf32, #tpu.memory_space<vmem>>, vector<1x84x80xf32>
    %101 = vector.shape_cast %100 : vector<1x84x80xf32> to vector<84x80xf32>
    %cst_90 = arith.constant dense<0.000000e+00> : vector<80x80xf32>
    %102 = tpu.matmul %99, %101, %cst_90 {dimension_numbers = #tpu.dot_dimension_numbers<[1], [0], [0], [1], [0, 0, 1, 1], [], []>} : vector<80x84xf32>, vector<84x80xf32>, vector<80x80xf32> -> vector<80x80xf32>
    %103 = arith.addf %94, %102 : vector<80x80xf32>
    %c4_91 = arith.constant 4 : index
    %c0_92 = arith.constant 0 : index
    %c0_93 = arith.constant 0 : index
    %104 = vector.load %arg6[%c4_91, %c0_92, %c0_93] : memref<5x84x80xf32, #tpu.memory_space<vmem>>, vector<1x84x80xf32>
    %105 = vector.shape_cast %104 : vector<1x84x80xf32> to vector<84x80xf32>
    %cst_94 = arith.constant dense<0.000000e+00> : vector<80x80xf32>
    %106 = tpu.matmul %99, %105, %cst_94 {dimension_numbers = #tpu.dot_dimension_numbers<[1], [0], [0], [1], [0, 0, 1, 1], [], []>} : vector<80x84xf32>, vector<84x80xf32>, vector<80x80xf32> -> vector<80x80xf32>
    %107 = arith.addf %98, %106 : vector<80x80xf32>
    %108 = arith.maximumf %103, %107 : vector<80x80xf32>
    %c0_95 = arith.constant 0 : index
    %c0_96 = arith.constant 0 : index
    %109 = vector.load %arg7[%c0_95, %c0_96] : memref<1x80xf32, #tpu.memory_space<vmem>>, vector<1x80xf32>
    %110 = vector.broadcast %109 : vector<1x80xf32> to vector<80x80xf32>
    %111 = arith.addf %108, %110 : vector<80x80xf32>
    %112 = vector.shape_cast %111 : vector<80x80xf32> to vector<5x16x80xf32>
    %113 = vector.extract_strided_slice %112 {offsets = [0, 0, 0], sizes = [5, 8, 80], strides = [1, 1, 1]} : vector<5x16x80xf32> to vector<5x8x80xf32>
    %114 = vector.extract_strided_slice %112 {offsets = [0, 8, 0], sizes = [5, 8, 80], strides = [1, 1, 1]} : vector<5x16x80xf32> to vector<5x8x80xf32>
    %115 = arith.maximumf %113, %114 : vector<5x8x80xf32>
    %cst_97 = arith.constant 0.000000e+00 : f32
    %116 = vector.broadcast %cst_97 : f32 to vector<8x120xf32>
    %117 = vector.extract_strided_slice %115 {offsets = [0, 0, 0], sizes = [1, 8, 80], strides = [1, 1, 1]} : vector<5x8x80xf32> to vector<1x8x80xf32>
    %118 = vector.shape_cast %117 : vector<1x8x80xf32> to vector<8x80xf32>
    %c0_98 = arith.constant 0 : index
    %c0_99 = arith.constant 0 : index
    %c0_100 = arith.constant 0 : index
    %119 = vector.load %arg8[%c0_98, %c0_99, %c0_100] : memref<5x80x120xf32, #tpu.memory_space<vmem>>, vector<1x80x120xf32>
    %120 = vector.shape_cast %119 : vector<1x80x120xf32> to vector<80x120xf32>
    %cst_101 = arith.constant dense<0.000000e+00> : vector<8x120xf32>
    %121 = tpu.matmul %118, %120, %cst_101 {dimension_numbers = #tpu.dot_dimension_numbers<[1], [0], [0], [1], [0, 0, 1, 1], [], []>} : vector<8x80xf32>, vector<80x120xf32>, vector<8x120xf32> -> vector<8x120xf32>
    %122 = arith.addf %116, %121 : vector<8x120xf32>
    %123 = vector.extract_strided_slice %115 {offsets = [1, 0, 0], sizes = [1, 8, 80], strides = [1, 1, 1]} : vector<5x8x80xf32> to vector<1x8x80xf32>
    %124 = vector.shape_cast %123 : vector<1x8x80xf32> to vector<8x80xf32>
    %c1_102 = arith.constant 1 : index
    %c0_103 = arith.constant 0 : index
    %c0_104 = arith.constant 0 : index
    %125 = vector.load %arg8[%c1_102, %c0_103, %c0_104] : memref<5x80x120xf32, #tpu.memory_space<vmem>>, vector<1x80x120xf32>
    %126 = vector.shape_cast %125 : vector<1x80x120xf32> to vector<80x120xf32>
    %cst_105 = arith.constant dense<0.000000e+00> : vector<8x120xf32>
    %127 = tpu.matmul %124, %126, %cst_105 {dimension_numbers = #tpu.dot_dimension_numbers<[1], [0], [0], [1], [0, 0, 1, 1], [], []>} : vector<8x80xf32>, vector<80x120xf32>, vector<8x120xf32> -> vector<8x120xf32>
    %128 = arith.addf %122, %127 : vector<8x120xf32>
    %129 = vector.extract_strided_slice %115 {offsets = [2, 0, 0], sizes = [1, 8, 80], strides = [1, 1, 1]} : vector<5x8x80xf32> to vector<1x8x80xf32>
    %130 = vector.shape_cast %129 : vector<1x8x80xf32> to vector<8x80xf32>
    %c2_106 = arith.constant 2 : index
    %c0_107 = arith.constant 0 : index
    %c0_108 = arith.constant 0 : index
    %131 = vector.load %arg8[%c2_106, %c0_107, %c0_108] : memref<5x80x120xf32, #tpu.memory_space<vmem>>, vector<1x80x120xf32>
    %132 = vector.shape_cast %131 : vector<1x80x120xf32> to vector<80x120xf32>
    %cst_109 = arith.constant dense<0.000000e+00> : vector<8x120xf32>
    %133 = tpu.matmul %130, %132, %cst_109 {dimension_numbers = #tpu.dot_dimension_numbers<[1], [0], [0], [1], [0, 0, 1, 1], [], []>} : vector<8x80xf32>, vector<80x120xf32>, vector<8x120xf32> -> vector<8x120xf32>
    %134 = arith.addf %128, %133 : vector<8x120xf32>
    %135 = vector.extract_strided_slice %115 {offsets = [3, 0, 0], sizes = [1, 8, 80], strides = [1, 1, 1]} : vector<5x8x80xf32> to vector<1x8x80xf32>
    %136 = vector.shape_cast %135 : vector<1x8x80xf32> to vector<8x80xf32>
    %c3_110 = arith.constant 3 : index
    %c0_111 = arith.constant 0 : index
    %c0_112 = arith.constant 0 : index
    %137 = vector.load %arg8[%c3_110, %c0_111, %c0_112] : memref<5x80x120xf32, #tpu.memory_space<vmem>>, vector<1x80x120xf32>
    %138 = vector.shape_cast %137 : vector<1x80x120xf32> to vector<80x120xf32>
    %cst_113 = arith.constant dense<0.000000e+00> : vector<8x120xf32>
    %139 = tpu.matmul %136, %138, %cst_113 {dimension_numbers = #tpu.dot_dimension_numbers<[1], [0], [0], [1], [0, 0, 1, 1], [], []>} : vector<8x80xf32>, vector<80x120xf32>, vector<8x120xf32> -> vector<8x120xf32>
    %140 = arith.addf %134, %139 : vector<8x120xf32>
    %141 = vector.extract_strided_slice %115 {offsets = [4, 0, 0], sizes = [1, 8, 80], strides = [1, 1, 1]} : vector<5x8x80xf32> to vector<1x8x80xf32>
    %142 = vector.shape_cast %141 : vector<1x8x80xf32> to vector<8x80xf32>
    %c4_114 = arith.constant 4 : index
    %c0_115 = arith.constant 0 : index
    %c0_116 = arith.constant 0 : index
    %143 = vector.load %arg8[%c4_114, %c0_115, %c0_116] : memref<5x80x120xf32, #tpu.memory_space<vmem>>, vector<1x80x120xf32>
    %144 = vector.shape_cast %143 : vector<1x80x120xf32> to vector<80x120xf32>
    %cst_117 = arith.constant dense<0.000000e+00> : vector<8x120xf32>
    %145 = tpu.matmul %142, %144, %cst_117 {dimension_numbers = #tpu.dot_dimension_numbers<[1], [0], [0], [1], [0, 0, 1, 1], [], []>} : vector<8x80xf32>, vector<80x120xf32>, vector<8x120xf32> -> vector<8x120xf32>
    %146 = arith.addf %140, %145 : vector<8x120xf32>
    %c0_118 = arith.constant 0 : index
    %c0_119 = arith.constant 0 : index
    %147 = vector.load %arg9[%c0_118, %c0_119] : memref<1x120xf32, #tpu.memory_space<vmem>>, vector<1x120xf32>
    %148 = vector.broadcast %147 : vector<1x120xf32> to vector<8x120xf32>
    %149 = arith.addf %146, %148 : vector<8x120xf32>
    %cst_120 = arith.constant 0.000000e+00 : f32
    %150 = vector.broadcast %cst_120 : f32 to vector<8x120xf32>
    %151 = arith.maximumf %149, %150 : vector<8x120xf32>
    %c0_121 = arith.constant 0 : index
    %c0_122 = arith.constant 0 : index
    %152 = vector.load %arg10[%c0_121, %c0_122] : memref<120x84xf32, #tpu.memory_space<vmem>>, vector<120x84xf32>
    %cst_123 = arith.constant dense<0.000000e+00> : vector<8x84xf32>
    %153 = tpu.matmul %151, %152, %cst_123 {dimension_numbers = #tpu.dot_dimension_numbers<[1], [0], [0], [1], [0, 0, 1, 1], [], []>} : vector<8x120xf32>, vector<120x84xf32>, vector<8x84xf32> -> vector<8x84xf32>
    %c0_124 = arith.constant 0 : index
    %c0_125 = arith.constant 0 : index
    %154 = vector.load %arg11[%c0_124, %c0_125] : memref<1x84xf32, #tpu.memory_space<vmem>>, vector<1x84xf32>
    %155 = vector.broadcast %154 : vector<1x84xf32> to vector<8x84xf32>
    %156 = arith.addf %153, %155 : vector<8x84xf32>
    %cst_126 = arith.constant 0.000000e+00 : f32
    %157 = vector.broadcast %cst_126 : f32 to vector<8x84xf32>
    %158 = arith.maximumf %156, %157 : vector<8x84xf32>
    %c0_127 = arith.constant 0 : index
    %c0_128 = arith.constant 0 : index
    %159 = vector.load %arg12[%c0_127, %c0_128] : memref<84x128xf32, #tpu.memory_space<vmem>>, vector<84x128xf32>
    %cst_129 = arith.constant dense<0.000000e+00> : vector<8x128xf32>
    %160 = tpu.matmul %158, %159, %cst_129 {dimension_numbers = #tpu.dot_dimension_numbers<[1], [0], [0], [1], [0, 0, 1, 1], [], []>} : vector<8x84xf32>, vector<84x128xf32>, vector<8x128xf32> -> vector<8x128xf32>
    %c0_130 = arith.constant 0 : index
    %c0_131 = arith.constant 0 : index
    %161 = vector.load %arg13[%c0_130, %c0_131] : memref<1x128xf32, #tpu.memory_space<vmem>>, vector<1x128xf32>
    %162 = vector.broadcast %161 : vector<1x128xf32> to vector<8x128xf32>
    %163 = arith.addf %160, %162 : vector<8x128xf32>
    %c0_132 = arith.constant 0 : index
    %c0_133 = arith.constant 0 : index
    %164 = vector.load %arg14[%c0_132, %c0_133] : memref<8x128xf32, #tpu.memory_space<vmem>>, vector<8x128xf32>
    tpu.vector_store %arg14[%c0_132, %c0_133], %163 {strides = array<i32>} : memref<8x128xf32, #tpu.memory_space<vmem>>, vector<8x128xf32>,
    return
  }
  func.func @transform_0(%arg0: i32) -> (i32, i32, i32) {
    %c0_i32 = arith.constant 0 : i32
    %c0_i32_0 = arith.constant 0 : i32
    %c0_i32_1 = arith.constant 0 : i32
    return %c0_i32, %arg0, %c0_i32_0 : i32, i32, i32
  }
  func.func @transform_1(%arg0: i32) -> (i32, i32, i32) {
    %c0_i32 = arith.constant 0 : i32
    %c0_i32_0 = arith.constant 0 : i32
    %c0_i32_1 = arith.constant 0 : i32
    %c0_i32_2 = arith.constant 0 : i32
    return %c0_i32, %c0_i32_0, %c0_i32_1 : i32, i32, i32
  }
  func.func @transform_2(%arg0: i32) -> (i32, i32, i32) {
    %c0_i32 = arith.constant 0 : i32
    %c0_i32_0 = arith.constant 0 : i32
    %c0_i32_1 = arith.constant 0 : i32
    %c0_i32_2 = arith.constant 0 : i32
    return %c0_i32, %c0_i32_0, %c0_i32_1 : i32, i32, i32
  }
  func.func @transform_3(%arg0: i32) -> (i32, i32) {
    %c0_i32 = arith.constant 0 : i32
    %c0_i32_0 = arith.constant 0 : i32
    %c0_i32_1 = arith.constant 0 : i32
    return %c0_i32, %c0_i32_0 : i32, i32
  }
  func.func @transform_4(%arg0: i32) -> (i32, i32, i32) {
    %c0_i32 = arith.constant 0 : i32
    %c0_i32_0 = arith.constant 0 : i32
    %c0_i32_1 = arith.constant 0 : i32
    %c0_i32_2 = arith.constant 0 : i32
    return %c0_i32, %c0_i32_0, %c0_i32_1 : i32, i32, i32
  }
  func.func @transform_5(%arg0: i32) -> (i32, i32, i32) {
    %c0_i32 = arith.constant 0 : i32
    %c0_i32_0 = arith.constant 0 : i32
    %c0_i32_1 = arith.constant 0 : i32
    %c0_i32_2 = arith.constant 0 : i32
    return %c0_i32, %c0_i32_0, %c0_i32_1 : i32, i32, i32
  }
  func.func @transform_6(%arg0: i32) -> (i32, i32) {
    %c0_i32 = arith.constant 0 : i32
    %c0_i32_0 = arith.constant 0 : i32
    %c0_i32_1 = arith.constant 0 : i32
    return %c0_i32, %c0_i32_0 : i32, i32
  }
  func.func @transform_7(%arg0: i32) -> (i32, i32, i32) {
    %c0_i32 = arith.constant 0 : i32
    %c0_i32_0 = arith.constant 0 : i32
    %c0_i32_1 = arith.constant 0 : i32
    %c0_i32_2 = arith.constant 0 : i32
    return %c0_i32, %c0_i32_0, %c0_i32_1 : i32, i32, i32
  }
  func.func @transform_8(%arg0: i32) -> (i32, i32) {
    %c0_i32 = arith.constant 0 : i32
    %c0_i32_0 = arith.constant 0 : i32
    %c0_i32_1 = arith.constant 0 : i32
    return %c0_i32, %c0_i32_0 : i32, i32
  }
  func.func @transform_9(%arg0: i32) -> (i32, i32) {
    %c0_i32 = arith.constant 0 : i32
    %c0_i32_0 = arith.constant 0 : i32
    %c0_i32_1 = arith.constant 0 : i32
    return %c0_i32, %c0_i32_0 : i32, i32
  }
  func.func @transform_10(%arg0: i32) -> (i32, i32) {
    %c0_i32 = arith.constant 0 : i32
    %c0_i32_0 = arith.constant 0 : i32
    %c0_i32_1 = arith.constant 0 : i32
    return %c0_i32, %c0_i32_0 : i32, i32
  }
  func.func @transform_11(%arg0: i32) -> (i32, i32) {
    %c0_i32 = arith.constant 0 : i32
    %c0_i32_0 = arith.constant 0 : i32
    %c0_i32_1 = arith.constant 0 : i32
    return %c0_i32, %c0_i32_0 : i32, i32
  }
  func.func @transform_12(%arg0: i32) -> (i32, i32) {
    %c0_i32 = arith.constant 0 : i32
    %c0_i32_0 = arith.constant 0 : i32
    %c0_i32_1 = arith.constant 0 : i32
    return %c0_i32, %c0_i32_0 : i32, i32
  }
  func.func @transform_13(%arg0: i32) -> (i32, i32) {
    %c0_i32 = arith.constant 0 : i32
    %c0_i32_0 = arith.constant 0 : i32
    return %arg0, %c0_i32 : i32, i32
  }
}

</mosaic_0001>

<bundles_post_ra>
// kernel: lenet5_pallas.1
= control target key start
LH: loop header
LB: loop body
LE: loop exit
PB: predicated region body
PF: predicated region fallthrough
CT: control target
= control target key end

     0   :  { %vm138_vm0 = vcmask 785408   ;;  %vm3097_vm1 = vcmask 1043456   ;;  %vm3066_vm2 = vcmask 687104   ;;  %vm8588_vm3 = vmmov 0   ;;  %s10703_s1 = inlined_call_operand.vmem [shape: f32[5,96,84], index: 1, kind: input, shape index: {}]   ;;  %s10704_s2 = inlined_call_operand.vmem [shape: f32[5,96,84], index: 2, kind: input, shape index: {}]   ;;  %s10705_s0 = inlined_call_operand.vmem [shape: f32[32,8,96], index: 0, kind: input, shape index: {}]   ;;  %s10706_s4 = inlined_call_operand.vmem [shape: f32[5,84,80], index: 4, kind: input, shape index: {}]   ;;  %s10707_s5 = inlined_call_operand.vmem [shape: f32[5,84,80], index: 5, kind: input, shape index: {}]   ;;  %s10708_s3 = inlined_call_operand.vmem [shape: f32[1,84], index: 3, kind: input, shape index: {}]   ;;  %s10709_s7 = inlined_call_operand.vmem [shape: f32[5,80,120], index: 7, kind: input, shape index: {}]   ;;  %s10710_s6 = inlined_call_operand.vmem [shape: f32[1,80], index: 6, kind: input, shape index: {}]   ;;  %s10711_s9 = inlined_call_operand.vmem [shape: f32[120,84], index: 9, kind: input, shape index: {}]   ;;  %s10712_s11 = inlined_call_operand.vmem [shape: f32[84,128], index: 11, kind: input, shape index: {}]   ;;  %s10713_s8 = inlined_call_operand.vmem [shape: f32[1,120], index: 8, kind: input, shape index: {}]   ;;  %s10714_s10 = inlined_call_operand.vmem [shape: f32[1,84], index: 10, kind: input, shape index: {}]   ;;  %s10715_s12 = inlined_call_operand.vmem [shape: f32[1,128], index: 12, kind: input, shape index: {}]   ;;  %s10716_s13 = inlined_call_operand.vmem [shape: f32[8,128], index: 13, kind: output, shape index: {}]  }
   0x1   :  { %v5122_v0 = vld [vmem:[%s10703_s1 + $0x60] sm:$0xff]  ;;  %v5123_v1 = vld [vmem:[%s10703_s1 + $0x68] sm:$0xff]  ;;  %v5124_v5 = vld [vmem:[%s10703_s1 + $0x70] sm:$0xff]  ;;  %vm4487_vm4 = vcmask 654336   ;;  %vm4920_vm5 = vcmask 982016  }
   0x2   :  { %v5190_v2 = vld [vmem:[%s10704_s2 + $0x60] sm:$0xff]  ;;  %v7729_v3 = vpack.c.bf16 %v5123_v1, %v5122_v0  ;;  %v5191_v4 = vld [vmem:[%s10704_s2 + $0x68] sm:$0xff]  ;;  %v5125_v6 = vld [vmem:[%s10703_s1 + $0x78] sm:$0xff] }
   0x3   :  { %v7777_v7 = vpack.c.bf16 %v5191_v4, %v5190_v2  ;;  %v7733_v8 = vpack.c.bf16 %v5125_v6, %v5124_v5  ;;  %v5192_v9 = vld [vmem:[%s10704_s2 + $0x70] sm:$0xff]  ;;  %v5193_v10 = vld [vmem:[%s10704_s2 + $0x78] sm:$0xff]  ;;  %v5126_v11 = vld [vmem:[%s10703_s1 + $0x80] sm:$0xff] }
   0x4   :  { %7730 = vmatprep.subr.bf16.mxu0 %v7729_v3  ;;  %v7781_v12 = vpack.c.bf16 %v5193_v10, %v5192_v9  ;;  %v5127_v13 = vld [vmem:[%s10703_s1 + $0x88] sm:$0xff]  ;;  %v5194_v14 = vld [vmem:[%s10704_s2 + $0x80] sm:$0xff]  ;;  %v5128_v18 = vld [vmem:[%s10703_s1 + $0x90] sm:$0xff] }
   0x5   :  { %v5195_v15 = vld [vmem:[%s10704_s2 + $0x88] sm:$0xff]  ;;  %7778 = vmatprep.subr.bf16.mxu1 %v7777_v7  ;;  %7732 = vmatpush3.bf16.msra.mxu0 %v7729_v3  ;;  %v7737_v16 = vpack.c.bf16 %v5127_v13, %v5126_v11  ;;  %v5129_v19 = vld [vmem:[%s10703_s1 + $0x98] sm:$0xff]  ;;  %v5196_v20 = vld [vmem:[%s10704_s2 + $0x90] sm:$0xff] }
   0x6   :  { %7780 = vmatpush3.bf16.msra.mxu1 %v7777_v7  ;;  %7734 = vmatprep.subr.bf16.mxu0 %v7733_v8  ;;  %v7785_v17 = vpack.c.bf16 %v5195_v15, %v5194_v14  ;;  %v5197_v21 = vld [vmem:[%s10704_s2 + $0x98] sm:$0xff]  ;;  %v8711_v22 = vld [vmem:[%s10705_s0 + $0x8] sm:$0xff]  ;;  %v7741_v23 = vpack.c.bf16 %v5129_v19, %v5128_v18  ;;  %v5130_v25 = vld [vmem:[%s10703_s1 + $0xa0] sm:$0xff] }
   0x7   :  { %7782 = vmatprep.subr.bf16.mxu1 %v7781_v12  ;;  %v7789_v24 = vpack.c.bf16 %v5197_v21, %v5196_v20  ;;  %v5131_v26 = vld [vmem:[%s10703_s1 + $0xa8] sm:$0xff]  ;;  %6550 = vmatprep.mubr.msk.f32.mxu0 %vm138_vm0, %v8711_v22  ;;  %v5198_v27 = vld [vmem:[%s10704_s2 + $0xa0] sm:$0xff]  ;;  %v5132_v31 = vld [vmem:[%s10703_s1 + $0xb0] sm:$0xff] }
   0x8   :  { %v5199_v28 = vld [vmem:[%s10704_s2 + $0xa8] sm:$0xff]  ;;  %6682 = vmatprep.mubr.msk.f32.mxu1 %vm138_vm0, %v8711_v22  ;;  %v7745_v29 = vpack.c.bf16 %v5131_v26, %v5130_v25  ;;  %v5133_v32 = vld [vmem:[%s10703_s1 + $0xb8] sm:$0xff]  ;;  %v5200_v33 = vld [vmem:[%s10704_s2 + $0xb0] sm:$0xff] }
   0x9   :  { %7736 = vmatpush3.bf16.msra.mxu0 %v7733_v8  ;;  %v7793_v30 = vpack.c.bf16 %v5199_v28, %v5198_v27  ;;  %v5201_v34 = vld [vmem:[%s10704_s2 + $0xb8] sm:$0xff]  ;;  %v7749_v35 = vpack.c.bf16 %v5133_v32, %v5132_v31  ;;  %v72_v37 = vld [vmem:[%s10703_s1] sm:$0xff]  ;;  %v73_v38 = vld [vmem:[%s10703_s1 + $0x8] sm:$0xff] }
   0xa   :  { %7784 = vmatpush3.bf16.msra.mxu1 %v7781_v12  ;;  %7738 = vmatprep.subr.bf16.mxu0 %v7737_v16  ;;  %v7797_v36 = vpack.c.bf16 %v5201_v34, %v5200_v33  ;;  %v84_v39 = vld [vmem:[%s10704_s2] sm:$0xff]  ;;  %v85_v40 = vld [vmem:[%s10704_s2 + $0x8] sm:$0xff]  ;;  %v7753_v41 = vpack.c.bf16 %v73_v38, %v72_v37  ;;  %v74_v43 = vld [vmem:[%s10703_s1 + $0x10] sm:$0xff] }
   0xb   :  { %7786 = vmatprep.subr.bf16.mxu1 %v7785_v17  ;;  %v7801_v42 = vpack.c.bf16 %v85_v40, %v84_v39  ;;  %v75_v44 = vld [vmem:[%s10703_s1 + $0x18] sm:$0xff]  ;;  %v8762_v45 = vld [vmem:[%s10705_s0 + $0x10] sm:$0xff]  ;;  %v76_v51 = vld [vmem:[%s10703_s1 + $0x20] sm:$0xff] }
   0xc   :  { %v86_v46 = vld [vmem:[%s10704_s2 + $0x10] sm:$0xff]  ;;  %v87_v47 = vld [vmem:[%s10704_s2 + $0x18] sm:$0xff]  ;;  %v7757_v49 = vpack.c.bf16 %v75_v44, %v74_v43  ;;  %v77_v52 = vld [vmem:[%s10703_s1 + $0x28] sm:$0xff] }
   0xd   :  { %7740 = vmatpush3.bf16.msra.mxu0 %v7737_v16  ;;  %v8773_v48 = vld [vmem:[%s10705_s0 + $0x18] sm:$0xff]  ;;  %v7805_v50 = vpack.c.bf16 %v87_v47, %v86_v46  ;;  %v8788_v53 = vld [vmem:[%s10705_s0 + $0x20] sm:$0xff]  ;;  %v89_v55 = vld [vmem:[%s10704_s2 + $0x28] sm:$0xff]  ;;  %v7761_v57 = vpack.c.bf16 %v77_v52, %v76_v51 }
   0xe   :  { %7788 = vmatpush3.bf16.msra.mxu1 %v7785_v17  ;;  %7742 = vmatprep.subr.bf16.mxu0 %v7741_v23  ;;  %v88_v54 = vld [vmem:[%s10704_s2 + $0x20] sm:$0xff]  ;;  %v8801_v56 = vld [vmem:[%s10705_s0 + $0x28] sm:$0xff]  ;;  %v78_v59 = vld [vmem:[%s10703_s1 + $0x30] sm:$0xff] }
   0xf   :  { %7790 = vmatprep.subr.bf16.mxu1 %v7789_v24  ;;  %v7809_v58 = vpack.c.bf16 %v89_v55, %v88_v54  ;;  %v79_v60 = vld [vmem:[%s10703_s1 + $0x38] sm:$0xff]  ;;  %v8820_v61 = vld [vmem:[%s10705_s0 + $0x30] sm:$0xff]  ;;  %v80_v3 = vld [vmem:[%s10703_s1 + $0x40] sm:$0xff] }
  0x10   :  { %v90_v62 = vld [vmem:[%s10704_s2 + $0x30] sm:$0xff]  ;;  %v91_v63 = vld [vmem:[%s10704_s2 + $0x38] sm:$0xff]  ;;  %v7765_v1 = vpack.c.bf16 %v79_v60, %v78_v59  ;;  %v81_v4 = vld [vmem:[%s10703_s1 + $0x48] sm:$0xff] }
  0x11   :  { %7744 = vmatpush3.bf16.msra.mxu0 %v7741_v23  ;;  %v8833_v0 = vld [vmem:[%s10705_s0 + $0x38] sm:$0xff]  ;;  %v7813_v2 = vpack.c.bf16 %v91_v63, %v90_v62  ;;  %v8850_v5 = vld [vmem:[%s10705_s0 + $0x40] sm:$0xff]  ;;  %v93_v7 = vld [vmem:[%s10704_s2 + $0x48] sm:$0xff]  ;;  %v7769_v9 = vpack.c.bf16 %v81_v4, %v80_v3 }
  0x12   :  { %7792 = vmatpush3.bf16.msra.mxu1 %v7789_v24  ;;  %7746 = vmatprep.subr.bf16.mxu0 %v7745_v29  ;;  %v92_v6 = vld [vmem:[%s10704_s2 + $0x40] sm:$0xff]  ;;  %v8863_v8 = vld [vmem:[%s10705_s0 + $0x48] sm:$0xff]  ;;  %v82_v11 = vld [vmem:[%s10703_s1 + $0x50] sm:$0xff] }
  0x13   :  { %7794 = vmatprep.subr.bf16.mxu1 %v7793_v30  ;;  %v7817_v10 = vpack.c.bf16 %v93_v7, %v92_v6  ;;  %v83_v12 = vld [vmem:[%s10703_s1 + $0x58] sm:$0xff]  ;;  %v8880_v13 = vld [vmem:[%s10705_s0 + $0x50] sm:$0xff]  ;;  %v5286_v19 = vld [vmem:[%s10703_s1 + $0xc0] sm:$0xff] }
  0x14   :  { %v94_v14 = vld [vmem:[%s10704_s2 + $0x50] sm:$0xff]  ;;  %v95_v15 = vld [vmem:[%s10704_s2 + $0x58] sm:$0xff]  ;;  %v7773_v17 = vpack.c.bf16 %v83_v12, %v82_v11  ;;  %v5287_v20 = vld [vmem:[%s10703_s1 + $0xc8] sm:$0xff] }
  0x15   :  { %7748 = vmatpush3.bf16.msra.mxu0 %v7745_v29  ;;  %v8893_v16 = vld [vmem:[%s10705_s0 + $0x58] sm:$0xff]  ;;  %v7821_v18 = vpack.c.bf16 %v95_v15, %v94_v14  ;;  %v8910_v21 = vld [vmem:[%s10705_s0 + $0x60] sm:$0xff]  ;;  %v5327_v24 = vld [vmem:[%s10704_s2 + $0xc8] sm:$0xff]  ;;  %v8925_v26 = vpack.c.bf16 %v5287_v20, %v5286_v19 }
  0x16   :  { %7796 = vmatpush3.bf16.msra.mxu1 %v7793_v30  ;;  %7750 = vmatprep.subr.bf16.mxu0 %v7749_v35  ;;  %v5326_v23 = vld [vmem:[%s10704_s2 + $0xc0] sm:$0xff]  ;;  %v8923_v25 = vld [vmem:[%s10705_s0 + $0x68] sm:$0xff]  ;;  %v8938_v28 = vld [vmem:[%s10705_s0 + $0x70] sm:$0xff] }
  0x17   :  { %7798 = vmatprep.subr.bf16.mxu1 %v7797_v36  ;;  %v8929_v27 = vpack.c.bf16 %v5327_v24, %v5326_v23  ;;  %v8945_v29 = vld [vmem:[%s10705_s0 + $0x78] sm:$0xff]  ;;  %v8958_v30 = vld [vmem:[%s10705_s0 + $0x80] sm:$0xff]  ;;  %v8965_v31 = vld [vmem:[%s10705_s0 + $0x88] sm:$0xff] }
  0x18   :  { %v8976_v32 = vld [vmem:[%s10705_s0 + $0x90] sm:$0xff]  ;;  %v8983_v33 = vld [vmem:[%s10705_s0 + $0x98] sm:$0xff]  ;;  %v8994_v34 = vld [vmem:[%s10705_s0 + $0xa0] sm:$0xff] }
  0x19   :  { %7752 = vmatpush3.bf16.msra.mxu0 %v7749_v35  ;;  %v9001_v35 = vld [vmem:[%s10705_s0 + $0xa8] sm:$0xff]  ;;  %v9019_v37 = vld [vmem:[%s10705_s0 + $0xb8] sm:$0xff]  ;;  %v9030_v38 = vld [vmem:[%s10705_s0 + $0xc0] sm:$0xff] }
  0x1a   :  { %7800 = vmatpush3.bf16.msra.mxu1 %v7797_v36  ;;  %7754 = vmatprep.subr.bf16.mxu0 %v7753_v41  ;;  %v9012_v36 = vld [vmem:[%s10705_s0 + $0xb0] sm:$0xff]  ;;  %v9037_v39 = vld [vmem:[%s10705_s0 + $0xc8] sm:$0xff]  ;;  %v44_v43 = vld [vmem:[%s10705_s0] sm:$0xff] }
  0x1b   :  { %7802 = vmatprep.subr.bf16.mxu1 %v7801_v42  ;;  %v9048_v40 = vld [vmem:[%s10705_s0 + $0xd0] sm:$0xff]  ;;  %v5289_v46 = vld [vmem:[%s10703_s1 + $0xd8] sm:$0xff]  ;;  %v5290_v52 = vld [vmem:[%s10703_s1 + $0xe0] sm:$0xff] }
  0x1c   :  { %6551 = vmatmul.mubr.msk.f32.vlgmr.msra.gmra.mrb[0].mxu0 %vm138_vm0, %v8762_v45  ;;  %v5288_v44 = vld [vmem:[%s10703_s1 + $0xd0] sm:$0xff]  ;;  %v5291_v54 = vld [vmem:[%s10703_s1 + $0xe8] sm:$0xff]  ;;  %v5330_v55 = vld [vmem:[%s10704_s2 + $0xe0] sm:$0xff] }
  0x1d   :  { %6683 = vmatmul.mubr.msk.f32.vlgmr.msra.gmra.mrb[0].mxu1 %vm138_vm0, %v8762_v45  ;;  %7756 = vmatpush3.bf16.msra.mxu0 %v7753_v41  ;;  %v9055_v41 = vld [vmem:[%s10705_s0 + $0xd8] sm:$0xff]  ;;  %v5328_v47 = vld [vmem:[%s10704_s2 + $0xd0] sm:$0xff]  ;;  %v5294_v3 = vld [vmem:[%s10703_s1 + $0x100] sm:$0xff] }
  0x1e   :  { %7804 = vmatpush3.bf16.msra.mxu1 %v7801_v42  ;;  %6553 = vmatprep.mubr.msk.f32.mxu0 %vm138_vm0, %v8773_v48  ;;  %v9066_v42 = vld [vmem:[%s10705_s0 + $0xe0] sm:$0xff]  ;;  %v5292_v59 = vld [vmem:[%s10703_s1 + $0xf0] sm:$0xff]  ;;  %v5293_v60 = vld [vmem:[%s10703_s1 + $0xf8] sm:$0xff] }
  0x1f   :  { %6685 = vmatprep.mubr.msk.f32.mxu1 %vm138_vm0, %v8773_v48  ;;  %7758 = vmatprep.subr.bf16.mxu0 %v7757_v49  ;;  %v5332_v62 = vld [vmem:[%s10704_s2 + $0xf0] sm:$0xff]  ;;  %v5333_v63 = vld [vmem:[%s10704_s2 + $0xf8] sm:$0xff]  ;;  %v5295_v4 = vld [vmem:[%s10703_s1 + $0x108] sm:$0xff] }
  0x20   :  { %6554 = vmatmul.mubr.msk.f32.gmra.mrb[2].mxu0 %vm138_vm0, %v8788_v53  ;;  %7806 = vmatprep.subr.bf16.mxu1 %v7805_v50  ;;  %v5334_v6 = vld [vmem:[%s10704_s2 + $0x100] sm:$0xff]  ;;  %v5335_v7 = vld [vmem:[%s10704_s2 + $0x108] sm:$0xff]  ;;  %v5296_v11 = vld [vmem:[%s10703_s1 + $0x110] sm:$0xff] }
  0x21   :  { %6686 = vmatmul.mubr.msk.f32.gmra.mrb[2].mxu1 %vm138_vm0, %v8788_v53  ;;  %6556 = vmatprep.mubr.msk.f32.mxu0 %vm138_vm0, %v8801_v56  ;;  %v5297_v12 = vld [vmem:[%s10703_s1 + $0x118] sm:$0xff]  ;;  %v5336_v14 = vld [vmem:[%s10704_s2 + $0x110] sm:$0xff]  ;;  %v5394_v19 = vld [vmem:[%s10703_s1 + $0x120] sm:$0xff] }
  0x22   :  { %6688 = vmatprep.mubr.msk.f32.mxu1 %vm138_vm0, %v8801_v56  ;;  %7760 = vmatpush3.bf16.msra.mxu0 %v7757_v49  ;;  %v5329_v49 = vld [vmem:[%s10704_s2 + $0xd8] sm:$0xff]  ;;  %v5395_v20 = vld [vmem:[%s10703_s1 + $0x128] sm:$0xff]  ;;  %v5434_v23 = vld [vmem:[%s10704_s2 + $0x120] sm:$0xff] }
  0x23   :  { %7808 = vmatpush3.bf16.msra.mxu1 %v7805_v50  ;;  %7762 = vmatprep.subr.bf16.mxu0 %v7761_v57  ;;  %v7829_v50 = vpack.c.bf16 %v5289_v46, %v5288_v44  ;;  %v7853_v51 = vpack.c.bf16 %v5329_v49, %v5328_v47  ;;  %v5337_v15 = vld [vmem:[%s10704_s2 + $0x118] sm:$0xff]  ;;  %v5435_v24 = vld [vmem:[%s10704_s2 + $0x128] sm:$0xff]  ;;  %v5436_v46 = vld [vmem:[%s10704_s2 + $0x130] sm:$0xff] }
  0x24   :  { %6557 = vmatmul.mubr.msk.f32.gmra.mrb[4].mxu0 %vm138_vm0, %v8820_v61  ;;  %7810 = vmatprep.subr.bf16.mxu1 %v7809_v58  ;;  %v5397_v44 = vld [vmem:[%s10703_s1 + $0x138] sm:$0xff] }
  0x25   :  { %6689 = vmatmul.mubr.msk.f32.gmra.mrb[4].mxu1 %vm138_vm0, %v8820_v61  ;;  %6559 = vmatprep.mubr.msk.f32.mxu0 %vm138_vm0, %v8833_v0  ;;  %v5437_v47 = vld [vmem:[%s10704_s2 + $0x138] sm:$0xff] }
  0x26   :  { %6691 = vmatprep.mubr.msk.f32.mxu1 %vm138_vm0, %v8833_v0  ;;  %7764 = vmatpush3.bf16.msra.mxu0 %v7761_v57  ;;  %v5331_v57 = vld [vmem:[%s10704_s2 + $0xe8] sm:$0xff] }
  0x27   :  { %7812 = vmatpush3.bf16.msra.mxu1 %v7809_v58  ;;  %7766 = vmatprep.subr.bf16.mxu0 %v7765_v1  ;;  %v7857_v58 = vpack.c.bf16 %v5331_v57, %v5330_v55 }
  0x28   :  { %6560 = vmatmul.mubr.msk.f32.gmra.mrb[6].mxu0 %vm138_vm0, %v8850_v5  ;;  %7814 = vmatprep.subr.bf16.mxu1 %v7813_v2 }
  0x29   :  { %6692 = vmatmul.mubr.msk.f32.gmra.mrb[6].mxu1 %vm138_vm0, %v8850_v5  ;;  %6562 = vmatprep.mubr.msk.f32.mxu0 %vm138_vm0, %v8863_v8 }
  0x2a   :  { %6694 = vmatprep.mubr.msk.f32.mxu1 %vm138_vm0, %v8863_v8  ;;  %7768 = vmatpush3.bf16.msra.mxu0 %v7765_v1  ;;  %v7837_v1 = vpack.c.bf16 %v5293_v60, %v5292_v59  ;;  %v5440_v59 = vld [vmem:[%s10704_s2 + $0x150] sm:$0xff]  ;;  %v5441_v60 = vld [vmem:[%s10704_s2 + $0x158] sm:$0xff] }
  0x2b   :  { %7816 = vmatpush3.bf16.msra.mxu1 %v7813_v2  ;;  %7770 = vmatprep.subr.bf16.mxu0 %v7769_v9  ;;  %v7861_v2 = vpack.c.bf16 %v5333_v63, %v5332_v62  ;;  %v7909_v63 = vpack.c.bf16 %v5441_v60, %v5440_v59  ;;  %v5511_v59 = vld [vmem:[%s10703_s1 + $0x1c8] sm:$0xff] }
  0x2c   :  { %6563 = vmatmul.mubr.msk.f32.gmra.mrb[8].mxu0 %vm138_vm0, %v8880_v13  ;;  %7818 = vmatprep.subr.bf16.mxu1 %v7817_v10  ;;  %v5551_v60 = vld [vmem:[%s10704_s2 + $0x1c8] sm:$0xff] }
  0x2d   :  { %6695 = vmatmul.mubr.msk.f32.gmra.mrb[8].mxu1 %vm138_vm0, %v8880_v13  ;;  %6565 = vmatprep.mubr.msk.f32.mxu0 %vm138_vm0, %v8893_v16 }
  0x2e   :  { %6697 = vmatprep.mubr.msk.f32.mxu1 %vm138_vm0, %v8893_v16  ;;  %7772 = vmatpush3.bf16.msra.mxu0 %v7769_v9  ;;  %v7841_v9 = vpack.c.bf16 %v5295_v4, %v5294_v3  ;;  %v5442_v3 = vld [vmem:[%s10704_s2 + $0x160] sm:$0xff]  ;;  %v5443_v4 = vld [vmem:[%s10704_s2 + $0x168] sm:$0xff] }
  0x2f   :  { %7820 = vmatpush3.bf16.msra.mxu1 %v7817_v10  ;;  %7774 = vmatprep.subr.bf16.mxu0 %v7773_v17  ;;  %v7865_v10 = vpack.c.bf16 %v5335_v7, %v5334_v6  ;;  %v7913_v7 = vpack.c.bf16 %v5443_v4, %v5442_v3  ;;  %v5583_v4 = vld [vmem:[%s10706_s4 + $0x58] sm:$0xff] }
  0x30   :  { %6566 = vmatmul.mubr.msk.f32.gmra.mrb[10].mxu0 %vm138_vm0, %v8910_v21  ;;  %7822 = vmatprep.subr.bf16.mxu1 %v7821_v18 }
  0x31   :  { %6698 = vmatmul.mubr.msk.f32.gmra.mrb[10].mxu1 %vm138_vm0, %v8910_v21  ;;  %6568 = vmatprep.mubr.msk.f32.mxu0 %vm138_vm0, %v8923_v25 }
  0x32   :  { %6700 = vmatprep.mubr.msk.f32.mxu1 %vm138_vm0, %v8923_v25  ;;  %7776 = vmatpush3.bf16.msra.mxu0 %v7773_v17  ;;  %v7845_v17 = vpack.c.bf16 %v5297_v12, %v5296_v11  ;;  %v5444_v11 = vld [vmem:[%s10704_s2 + $0x170] sm:$0xff]  ;;  %v5445_v12 = vld [vmem:[%s10704_s2 + $0x178] sm:$0xff] }
  0x33   :  { %7824 = vmatpush3.bf16.msra.mxu1 %v7821_v18  ;;  %7826 = vmatprep.subr.bf16.mxu0 %v8925_v26  ;;  %v7869_v18 = vpack.c.bf16 %v5337_v15, %v5336_v14  ;;  %v7917_v15 = vpack.c.bf16 %v5445_v12, %v5444_v11  ;;  %v5478_v11 = vld [vmem:[%s10705_s0 + $0x40] sm:$0xff] }
  0x34   :  { %6569 = vmatmul.mubr.msk.f32.gmra.mrb[12].mxu0 %vm138_vm0, %v8938_v28  ;;  %7850 = vmatprep.subr.bf16.mxu1 %v8929_v27 }
  0x35   :  { %6701 = vmatmul.mubr.msk.f32.gmra.mrb[12].mxu1 %vm138_vm0, %v8938_v28  ;;  %6571 = vmatprep.mubr.msk.f32.mxu0 %vm138_vm0, %v8945_v29 }
  0x36   :  { %6703 = vmatprep.mubr.msk.f32.mxu1 %vm138_vm0, %v8945_v29 }
  0x38   :  { %6572 = vmatmul.mubr.msk.f32.gmra.mrb[14].mxu0 %vm138_vm0, %v8958_v30 }
  0x39   :  { %6704 = vmatmul.mubr.msk.f32.gmra.mrb[14].mxu1 %vm138_vm0, %v8958_v30  ;;  %6574 = vmatprep.mubr.msk.f32.mxu0 %vm138_vm0, %v8965_v31 }
  0x3a   :  { %6706 = vmatprep.mubr.msk.f32.mxu1 %vm138_vm0, %v8965_v31 }
  0x3c   :  { %6575 = vmatmul.mubr.msk.f32.gmra.mrb[16].mxu0 %vm138_vm0, %v8976_v32 }
  0x3d   :  { %6707 = vmatmul.mubr.msk.f32.gmra.mrb[16].mxu1 %vm138_vm0, %v8976_v32  ;;  %6577 = vmatprep.mubr.msk.f32.mxu0 %vm138_vm0, %v8983_v33 }
  0x3e   :  { %6709 = vmatprep.mubr.msk.f32.mxu1 %vm138_vm0, %v8983_v33 }
  0x40   :  { %6578 = vmatmul.mubr.msk.f32.gmra.mrb[18].mxu0 %vm138_vm0, %v8994_v34 }
  0x41   :  { %6710 = vmatmul.mubr.msk.f32.gmra.mrb[18].mxu1 %vm138_vm0, %v8994_v34  ;;  %6580 = vmatprep.mubr.msk.f32.mxu0 %vm138_vm0, %v9001_v35 }
  0x42   :  { %6712 = vmatprep.mubr.msk.f32.mxu1 %vm138_vm0, %v9001_v35 }
  0x44   :  { %6581 = vmatmul.mubr.msk.f32.gmra.mrb[20].mxu0 %vm138_vm0, %v9012_v36 }
  0x45   :  { %6713 = vmatmul.mubr.msk.f32.gmra.mrb[20].mxu1 %vm138_vm0, %v9012_v36  ;;  %6583 = vmatprep.mubr.msk.f32.mxu0 %vm138_vm0, %v9019_v37 }
  0x46   :  { %6715 = vmatprep.mubr.msk.f32.mxu1 %vm138_vm0, %v9019_v37 }
  0x48   :  { %6584 = vmatmul.mubr.msk.f32.gmra.mrb[22].mxu0 %vm138_vm0, %v9030_v38 }
  0x49   :  { %6716 = vmatmul.mubr.msk.f32.gmra.mrb[22].mxu1 %vm138_vm0, %v9030_v38  ;;  %6586 = vmatprep.mubr.msk.f32.mxu0 %vm138_vm0, %v9037_v39 }
  0x4a   :  { %6718 = vmatprep.mubr.msk.f32.mxu1 %vm138_vm0, %v9037_v39 }
  0x4c   :  { %6587 = vmatmul.mubr.msk.f32.gmra.mrb[24].mxu0 %vm138_vm0, %v9048_v40 }
  0x4d   :  { %6719 = vmatmul.mubr.msk.f32.gmra.mrb[24].mxu1 %vm138_vm0, %v9048_v40  ;;  %6589 = vmatprep.mubr.msk.f32.mxu0 %vm138_vm0, %v9055_v41 }
  0x4e   :  { %6721 = vmatprep.mubr.msk.f32.mxu1 %vm138_vm0, %v9055_v41 }
  0x50   :  { %6590 = vmatmul.mubr.msk.f32.gmra.mrb[26].mxu0 %vm138_vm0, %v9066_v42 }
  0x51   :  { %6722 = vmatmul.mubr.msk.f32.gmra.mrb[26].mxu1 %vm138_vm0, %v9066_v42  ;;  %6616 = vmatprep.mubr.msk.f32.mxu0 %vm138_vm0, %v44_v43 }
  0x52   :  { %6748 = vmatprep.mubr.msk.f32.mxu1 %vm138_vm0, %v44_v43  ;;  %v5396_v43 = vld [vmem:[%s10703_s1 + $0x130] sm:$0xff] }
  0x53   :  { %v7877_v49 = vpack.c.bf16 %v5397_v44, %v5396_v43  ;;  %v5505_v43 = vld [vmem:[%s10703_s1 + $0x198] sm:$0xff]  ;;  %v5544_v44 = vld [vmem:[%s10704_s2 + $0x190] sm:$0xff] }
  0x54   :  { %6617 = vmatmul.mubr.msk.f32.vlgmr.msra.gmra.mrb[0].mxu0 %vm138_vm0, %v8711_v22 }
  0x55   :  { %6749 = vmatmul.mubr.msk.f32.vlgmr.msra.gmra.mrb[0].mxu1 %vm138_vm0, %v8711_v22  ;;  %7828 = vmatpush3.bf16.msra.mxu0 %v8925_v26  ;;  %v7833_v22 = vpack.c.bf16 %v5291_v54, %v5290_v52  ;;  %v7873_v26 = vpack.c.bf16 %v5395_v20, %v5394_v19  ;;  %v5399_v52 = vld [vmem:[%s10703_s1 + $0x148] sm:$0xff]  ;;  %v5542_v19 = vld [vmem:[%s10704_s2 + $0x180] sm:$0xff] }
  0x56   :  { %7852 = vmatpush3.bf16.msra.mxu1 %v8929_v27  ;;  %6619 = vmatprep.mubr.msk.f32.mxu0 %vm138_vm0, %v8762_v45  ;;  %v7897_v27 = vpack.c.bf16 %v5435_v24, %v5434_v23  ;;  %v5439_v54 = vld [vmem:[%s10704_s2 + $0x148] sm:$0xff] }
  0x57   :  { %6751 = vmatprep.mubr.msk.f32.mxu1 %vm138_vm0, %v8762_v45  ;;  %7830 = vmatprep.subr.bf16.mxu0 %v7829_v50  ;;  %v5543_v20 = vld [vmem:[%s10704_s2 + $0x188] sm:$0xff] }
  0x58   :  { %6620 = vmatmul.mubr.msk.f32.gmra.mrb[2].mxu0 %vm138_vm0, %v8773_v48  ;;  %7854 = vmatprep.subr.bf16.mxu1 %v7853_v51  ;;  %v7945_v24 = vpack.c.bf16 %v5543_v20, %v5542_v19  ;;  %v5482_v19 = vld [vmem:[%s10705_s0 + $0x60] sm:$0xff]  ;;  %v5483_v20 = vld [vmem:[%s10705_s0 + $0x68] sm:$0xff] }
  0x59   :  { %6752 = vmatmul.mubr.msk.f32.gmra.mrb[2].mxu1 %vm138_vm0, %v8773_v48  ;;  %6622 = vmatprep.mubr.msk.f32.mxu0 %vm138_vm0, %v8788_v53 }
  0x5a   :  { %6754 = vmatprep.mubr.msk.f32.mxu1 %vm138_vm0, %v8788_v53  ;;  %7832 = vmatpush3.bf16.msra.mxu0 %v7829_v50  ;;  %v7901_v50 = vpack.c.bf16 %v5437_v47, %v5436_v46  ;;  %v5545_v46 = vld [vmem:[%s10704_s2 + $0x198] sm:$0xff] }
  0x5b   :  { %7856 = vmatpush3.bf16.msra.mxu1 %v7853_v51  ;;  %7834 = vmatprep.subr.bf16.mxu0 %v7833_v22  ;;  %v5398_v51 = vld [vmem:[%s10703_s1 + $0x140] sm:$0xff] }
  0x5c   :  { %6623 = vmatmul.mubr.msk.f32.gmra.mrb[4].mxu0 %vm138_vm0, %v8801_v56  ;;  %7858 = vmatprep.subr.bf16.mxu1 %v7857_v58  ;;  %v7881_v55 = vpack.c.bf16 %v5399_v52, %v5398_v51  ;;  %v5507_v51 = vld [vmem:[%s10703_s1 + $0x1a8] sm:$0xff] }
  0x5d   :  { %6755 = vmatmul.mubr.msk.f32.gmra.mrb[4].mxu1 %vm138_vm0, %v8801_v56  ;;  %6625 = vmatprep.mubr.msk.f32.mxu0 %vm138_vm0, %v8820_v61  ;;  %v5547_v52 = vld [vmem:[%s10704_s2 + $0x1a8] sm:$0xff] }
  0x5e   :  { %6757 = vmatprep.mubr.msk.f32.mxu1 %vm138_vm0, %v8820_v61  ;;  %7836 = vmatpush3.bf16.msra.mxu0 %v7833_v22  ;;  %v5400_v22 = vld [vmem:[%s10703_s1 + $0x150] sm:$0xff] }
  0x5f   :  { %7860 = vmatpush3.bf16.msra.mxu1 %v7857_v58  ;;  %7838 = vmatprep.subr.bf16.mxu0 %v7837_v1  ;;  %v5401_v58 = vld [vmem:[%s10703_s1 + $0x158] sm:$0xff] }
  0x60   :  { %6626 = vmatmul.mubr.msk.f32.gmra.mrb[6].mxu0 %vm138_vm0, %v8833_v0  ;;  %7862 = vmatprep.subr.bf16.mxu1 %v7861_v2  ;;  %v7885_v62 = vpack.c.bf16 %v5401_v58, %v5400_v22  ;;  %v5510_v58 = vld [vmem:[%s10703_s1 + $0x1c0] sm:$0xff] }
  0x61   :  { %6758 = vmatmul.mubr.msk.f32.gmra.mrb[6].mxu1 %vm138_vm0, %v8833_v0  ;;  %6628 = vmatprep.mubr.msk.f32.mxu0 %vm138_vm0, %v8850_v5 }
  0x62   :  { %6760 = vmatprep.mubr.msk.f32.mxu1 %vm138_vm0, %v8850_v5  ;;  %7840 = vmatpush3.bf16.msra.mxu0 %v7837_v1  ;;  %v5402_v1 = vld [vmem:[%s10703_s1 + $0x160] sm:$0xff] }
  0x63   :  { %7864 = vmatpush3.bf16.msra.mxu1 %v7861_v2  ;;  %7842 = vmatprep.subr.bf16.mxu0 %v7841_v9  ;;  %v5403_v2 = vld [vmem:[%s10703_s1 + $0x168] sm:$0xff] }
  0x64   :  { %6629 = vmatmul.mubr.msk.f32.gmra.mrb[8].mxu0 %vm138_vm0, %v8863_v8  ;;  %7866 = vmatprep.subr.bf16.mxu1 %v7865_v10  ;;  %v7889_v6 = vpack.c.bf16 %v5403_v2, %v5402_v1  ;;  %v5513_v1 = vld [vmem:[%s10703_s1 + $0x1d8] sm:$0xff] }
  0x65   :  { %6761 = vmatmul.mubr.msk.f32.gmra.mrb[8].mxu1 %vm138_vm0, %v8863_v8  ;;  %6631 = vmatprep.mubr.msk.f32.mxu0 %vm138_vm0, %v8880_v13  ;;  %v5553_v2 = vld [vmem:[%s10704_s2 + $0x1d8] sm:$0xff] }
  0x66   :  { %6763 = vmatprep.mubr.msk.f32.mxu1 %vm138_vm0, %v8880_v13  ;;  %7844 = vmatpush3.bf16.msra.mxu0 %v7841_v9  ;;  %v5404_v9 = vld [vmem:[%s10703_s1 + $0x170] sm:$0xff] }
  0x67   :  { %7868 = vmatpush3.bf16.msra.mxu1 %v7865_v10  ;;  %7846 = vmatprep.subr.bf16.mxu0 %v7845_v17  ;;  %v5405_v10 = vld [vmem:[%s10703_s1 + $0x178] sm:$0xff] }
  0x68   :  { %6632 = vmatmul.mubr.msk.f32.gmra.mrb[10].mxu0 %vm138_vm0, %v8893_v16  ;;  %7870 = vmatprep.subr.bf16.mxu1 %v7869_v18  ;;  %v7893_v14 = vpack.c.bf16 %v5405_v10, %v5404_v9  ;;  %v5621_v10 = vld [vmem:[%s10707_s5 + $0x80] sm:$0xff] }
  0x69   :  { %6764 = vmatmul.mubr.msk.f32.gmra.mrb[10].mxu1 %vm138_vm0, %v8893_v16  ;;  %6634 = vmatprep.mubr.msk.f32.mxu0 %vm138_vm0, %v8910_v21 }
  0x6a   :  { %6766 = vmatprep.mubr.msk.f32.mxu1 %vm138_vm0, %v8910_v21  ;;  %7848 = vmatpush3.bf16.msra.mxu0 %v7845_v17  ;;  %v5502_v17 = vld [vmem:[%s10703_s1 + $0x180] sm:$0xff] }
  0x6b   :  { %7872 = vmatpush3.bf16.msra.mxu1 %v7869_v18  ;;  %7874 = vmatprep.subr.bf16.mxu0 %v7873_v26  ;;  %v5503_v18 = vld [vmem:[%s10703_s1 + $0x188] sm:$0xff] }
  0x6c   :  { %6635 = vmatmul.mubr.msk.f32.gmra.mrb[12].mxu0 %vm138_vm0, %v8923_v25  ;;  %7898 = vmatprep.subr.bf16.mxu1 %v7897_v27  ;;  %v7921_v23 = vpack.c.bf16 %v5503_v18, %v5502_v17  ;;  %v5480_v17 = vld [vmem:[%s10705_s0 + $0x50] sm:$0xff]  ;;  %v5481_v18 = vld [vmem:[%s10705_s0 + $0x58] sm:$0xff] }
  0x6d   :  { %6767 = vmatmul.mubr.msk.f32.gmra.mrb[12].mxu1 %vm138_vm0, %v8923_v25  ;;  %6637 = vmatprep.mubr.msk.f32.mxu0 %vm138_vm0, %v8938_v28 }
  0x6e   :  { %6769 = vmatprep.mubr.msk.f32.mxu1 %vm138_vm0, %v8938_v28 }
  0x70   :  { %6638 = vmatmul.mubr.msk.f32.gmra.mrb[14].mxu0 %vm138_vm0, %v8945_v29 }
  0x71   :  { %6770 = vmatmul.mubr.msk.f32.gmra.mrb[14].mxu1 %vm138_vm0, %v8945_v29  ;;  %6640 = vmatprep.mubr.msk.f32.mxu0 %vm138_vm0, %v8958_v30 }
  0x72   :  { %6772 = vmatprep.mubr.msk.f32.mxu1 %vm138_vm0, %v8958_v30 }
  0x74   :  { %6641 = vmatmul.mubr.msk.f32.gmra.mrb[16].mxu0 %vm138_vm0, %v8965_v31 }
  0x75   :  { %6773 = vmatmul.mubr.msk.f32.gmra.mrb[16].mxu1 %vm138_vm0, %v8965_v31  ;;  %6643 = vmatprep.mubr.msk.f32.mxu0 %vm138_vm0, %v8976_v32 }
  0x76   :  { %6775 = vmatprep.mubr.msk.f32.mxu1 %vm138_vm0, %v8976_v32 }
  0x78   :  { %6644 = vmatmul.mubr.msk.f32.gmra.mrb[18].mxu0 %vm138_vm0, %v8983_v33 }
  0x79   :  { %6776 = vmatmul.mubr.msk.f32.gmra.mrb[18].mxu1 %vm138_vm0, %v8983_v33  ;;  %6646 = vmatprep.mubr.msk.f32.mxu0 %vm138_vm0, %v8994_v34 }
  0x7a   :  { %6778 = vmatprep.mubr.msk.f32.mxu1 %vm138_vm0, %v8994_v34 }
  0x7c   :  { %6647 = vmatmul.mubr.msk.f32.gmra.mrb[20].mxu0 %vm138_vm0, %v9001_v35 }
  0x7d   :  { %6779 = vmatmul.mubr.msk.f32.gmra.mrb[20].mxu1 %vm138_vm0, %v9001_v35  ;;  %6649 = vmatprep.mubr.msk.f32.mxu0 %vm138_vm0, %v9012_v36 }
  0x7e   :  { %6781 = vmatprep.mubr.msk.f32.mxu1 %vm138_vm0, %v9012_v36 }
  0x80   :  { %6650 = vmatmul.mubr.msk.f32.gmra.mrb[22].mxu0 %vm138_vm0, %v9019_v37 }
  0x81   :  { %6782 = vmatmul.mubr.msk.f32.gmra.mrb[22].mxu1 %vm138_vm0, %v9019_v37  ;;  %6652 = vmatprep.mubr.msk.f32.mxu0 %vm138_vm0, %v9030_v38 }
  0x82   :  { %6784 = vmatprep.mubr.msk.f32.mxu1 %vm138_vm0, %v9030_v38 }
  0x84   :  { %6653 = vmatmul.mubr.msk.f32.gmra.mrb[24].mxu0 %vm138_vm0, %v9037_v39 }
  0x85   :  { %6785 = vmatmul.mubr.msk.f32.gmra.mrb[24].mxu1 %vm138_vm0, %v9037_v39  ;;  %6655 = vmatprep.mubr.msk.f32.mxu0 %vm138_vm0, %v9048_v40 }
  0x86   :  { %6787 = vmatprep.mubr.msk.f32.mxu1 %vm138_vm0, %v9048_v40 }
  0x88   :  { %6656 = vmatmul.mubr.msk.f32.gmra.mrb[26].mxu0 %vm138_vm0, %v9055_v41 }
  0x89   :  { %6788 = vmatmul.mubr.msk.f32.gmra.mrb[26].mxu1 %vm138_vm0, %v9055_v41  ;;  %6814 = vmatprep.mubr.msk.f32.mxu0 %vm138_vm0, %v8762_v45 }
  0x8a   :  { %6880 = vmatprep.mubr.msk.f32.mxu1 %vm138_vm0, %v8762_v45  ;;  %v5438_v45 = vld [vmem:[%s10704_s2 + $0x140] sm:$0xff] }
  0x8b   :  { %v7905_v57 = vpack.c.bf16 %v5439_v54, %v5438_v45  ;;  %v5508_v54 = vld [vmem:[%s10703_s1 + $0x1b0] sm:$0xff] }
  0x8c   :  { %6815 = vmatmul.mubr.msk.f32.vlgmr.msra.gmra.mrb[0].mxu0 %vm138_vm0, %v8773_v48 }
  0x8d   :  { %6881 = vmatmul.mubr.msk.f32.vlgmr.msra.gmra.mrb[0].mxu1 %vm138_vm0, %v8773_v48  ;;  %7876 = vmatpush3.bf16.msra.mxu0 %v7873_v26  ;;  %v9442_v26 = vld [vmem:[%s10705_s0 + $0xe8] sm:$0xff] }
  0x8e   :  { %7900 = vmatpush3.bf16.msra.mxu1 %v7897_v27  ;;  %6817 = vmatprep.mubr.msk.f32.mxu0 %vm138_vm0, %v8788_v53  ;;  %v5504_v27 = vld [vmem:[%s10703_s1 + $0x190] sm:$0xff] }
  0x8f   :  { %6883 = vmatprep.mubr.msk.f32.mxu1 %vm138_vm0, %v8788_v53  ;;  %7878 = vmatprep.subr.bf16.mxu0 %v7877_v49  ;;  %v7925_v47 = vpack.c.bf16 %v5505_v43, %v5504_v27  ;;  %v5486_v27 = vld [vmem:[%s10705_s0 + $0x80] sm:$0xff]  ;;  %v5487_v43 = vld [vmem:[%s10705_s0 + $0x88] sm:$0xff] }
  0x90   :  { %6818 = vmatmul.mubr.msk.f32.gmra.mrb[2].mxu0 %vm138_vm0, %v8801_v56  ;;  %7902 = vmatprep.subr.bf16.mxu1 %v7901_v50 }
  0x91   :  { %6884 = vmatmul.mubr.msk.f32.gmra.mrb[2].mxu1 %vm138_vm0, %v8801_v56  ;;  %6820 = vmatprep.mubr.msk.f32.mxu0 %vm138_vm0, %v8820_v61 }
  0x92   :  { %6886 = vmatprep.mubr.msk.f32.mxu1 %vm138_vm0, %v8820_v61  ;;  %7880 = vmatpush3.bf16.msra.mxu0 %v7877_v49  ;;  %v7949_v49 = vpack.c.bf16 %v5545_v46, %v5544_v44  ;;  %v5488_v44 = vld [vmem:[%s10705_s0 + $0x90] sm:$0xff]  ;;  %v5489_v46 = vld [vmem:[%s10705_s0 + $0x98] sm:$0xff] }
  0x93   :  { %7904 = vmatpush3.bf16.msra.mxu1 %v7901_v50  ;;  %7882 = vmatprep.subr.bf16.mxu0 %v7881_v55  ;;  %v5506_v50 = vld [vmem:[%s10703_s1 + $0x1a0] sm:$0xff] }
  0x94   :  { %6821 = vmatmul.mubr.msk.f32.gmra.mrb[4].mxu0 %vm138_vm0, %v8833_v0  ;;  %7906 = vmatprep.subr.bf16.mxu1 %v7905_v57  ;;  %v7929_v45 = vpack.c.bf16 %v5507_v51, %v5506_v50  ;;  %v5492_v50 = vld [vmem:[%s10705_s0 + $0xb0] sm:$0xff]  ;;  %v5493_v51 = vld [vmem:[%s10705_s0 + $0xb8] sm:$0xff] }
  0x95   :  { %6887 = vmatmul.mubr.msk.f32.gmra.mrb[4].mxu1 %vm138_vm0, %v8833_v0  ;;  %6823 = vmatprep.mubr.msk.f32.mxu0 %vm138_vm0, %v8850_v5 }
  0x96   :  { %6889 = vmatprep.mubr.msk.f32.mxu1 %vm138_vm0, %v8850_v5  ;;  %7884 = vmatpush3.bf16.msra.mxu0 %v7881_v55  ;;  %v5509_v55 = vld [vmem:[%s10703_s1 + $0x1b8] sm:$0xff] }
  0x97   :  { %7908 = vmatpush3.bf16.msra.mxu1 %v7905_v57  ;;  %7886 = vmatprep.subr.bf16.mxu0 %v7885_v62  ;;  %v5549_v57 = vld [vmem:[%s10704_s2 + $0x1b8] sm:$0xff]  ;;  %v7933_v22 = vpack.c.bf16 %v5509_v55, %v5508_v54  ;;  %v5623_v55 = vld [vmem:[%s10707_s5 + $0x90] sm:$0xff] }
  0x98   :  { %6824 = vmatmul.mubr.msk.f32.gmra.mrb[6].mxu0 %vm138_vm0, %v8863_v8  ;;  %7910 = vmatprep.subr.bf16.mxu1 %v7909_v63 }
  0x99   :  { %6890 = vmatmul.mubr.msk.f32.gmra.mrb[6].mxu1 %vm138_vm0, %v8863_v8  ;;  %6826 = vmatprep.mubr.msk.f32.mxu0 %vm138_vm0, %v8880_v13 }
  0x9a   :  { %6892 = vmatprep.mubr.msk.f32.mxu1 %vm138_vm0, %v8880_v13  ;;  %7888 = vmatpush3.bf16.msra.mxu0 %v7885_v62  ;;  %v7937_v62 = vpack.c.bf16 %v5511_v59, %v5510_v58  ;;  %v5625_v59 = vld [vmem:[%s10707_s5 + $0xa0] sm:$0xff] }
  0x9b   :  { %7912 = vmatpush3.bf16.msra.mxu1 %v7909_v63  ;;  %7890 = vmatprep.subr.bf16.mxu0 %v7889_v6  ;;  %v5512_v63 = vld [vmem:[%s10703_s1 + $0x1d0] sm:$0xff] }
  0x9c   :  { %6827 = vmatmul.mubr.msk.f32.gmra.mrb[8].mxu0 %vm138_vm0, %v8893_v16  ;;  %7914 = vmatprep.subr.bf16.mxu1 %v7913_v7  ;;  %v7941_v3 = vpack.c.bf16 %v5513_v1, %v5512_v63  ;;  %v3033_v63 = vld [vmem:[%s10706_s4 + $0x8] sm:$0xff]  ;;  %v3043_v1 = vld [vmem:[%s10707_s5] sm:$0xff] }
  0x9d   :  { %6893 = vmatmul.mubr.msk.f32.gmra.mrb[8].mxu1 %vm138_vm0, %v8893_v16  ;;  %6829 = vmatprep.mubr.msk.f32.mxu0 %vm138_vm0, %v8910_v21 }
  0x9e   :  { %6895 = vmatprep.mubr.msk.f32.mxu1 %vm138_vm0, %v8910_v21  ;;  %7892 = vmatpush3.bf16.msra.mxu0 %v7889_v6  ;;  %v5584_v6 = vld [vmem:[%s10706_s4 + $0x60] sm:$0xff] }
  0x9f   :  { %7916 = vmatpush3.bf16.msra.mxu1 %v7913_v7  ;;  %7894 = vmatprep.subr.bf16.mxu0 %v7893_v14  ;;  %v5617_v7 = vld [vmem:[%s10707_s5 + $0x60] sm:$0xff]  ;;  %v7969_v9 = vpack.c.bf16 %v5584_v6, %v5583_v4 }
  0xa0   :  { %6830 = vmatmul.mubr.msk.f32.gmra.mrb[10].mxu0 %vm138_vm0, %v8923_v25  ;;  %7918 = vmatprep.subr.bf16.mxu1 %v7917_v15  ;;  %v9848_v6 = vld [vmem:[%s10708_s3] ss:$0 sm:$0xff] }
  0xa1   :  { %6896 = vmatmul.mubr.msk.f32.gmra.mrb[10].mxu1 %vm138_vm0, %v8923_v25  ;;  %6832 = vmatprep.mubr.msk.f32.mxu0 %vm138_vm0, %v8938_v28 }
  0xa2   :  { %6898 = vmatprep.mubr.msk.f32.mxu1 %vm138_vm0, %v8938_v28  ;;  %7896 = vmatpush3.bf16.msra.mxu0 %v7893_v14 }
  0xa3   :  { %7920 = vmatpush3.bf16.msra.mxu1 %v7917_v15  ;;  %7922 = vmatprep.subr.bf16.mxu0 %v7921_v23  ;;  %v5479_v15 = vld [vmem:[%s10705_s0 + $0x48] sm:$0xff] }
  0xa4   :  { %6833 = vmatmul.mubr.msk.f32.gmra.mrb[12].mxu0 %vm138_vm0, %v8945_v29  ;;  %7946 = vmatprep.subr.bf16.mxu1 %v7945_v24 }
  0xa5   :  { %6899 = vmatmul.mubr.msk.f32.gmra.mrb[12].mxu1 %vm138_vm0, %v8945_v29  ;;  %6835 = vmatprep.mubr.msk.f32.mxu0 %vm138_vm0, %v8958_v30 }
  0xa6   :  { %6901 = vmatprep.mubr.msk.f32.mxu1 %vm138_vm0, %v8958_v30 }
  0xa8   :  { %6836 = vmatmul.mubr.msk.f32.gmra.mrb[14].mxu0 %vm138_vm0, %v8965_v31 }
  0xa9   :  { %6902 = vmatmul.mubr.msk.f32.gmra.mrb[14].mxu1 %vm138_vm0, %v8965_v31  ;;  %6838 = vmatprep.mubr.msk.f32.mxu0 %vm138_vm0, %v8976_v32 }
  0xaa   :  { %6904 = vmatprep.mubr.msk.f32.mxu1 %vm138_vm0, %v8976_v32 }
  0xac   :  { %6839 = vmatmul.mubr.msk.f32.gmra.mrb[16].mxu0 %vm138_vm0, %v8983_v33 }
  0xad   :  { %6905 = vmatmul.mubr.msk.f32.gmra.mrb[16].mxu1 %vm138_vm0, %v8983_v33  ;;  %6841 = vmatprep.mubr.msk.f32.mxu0 %vm138_vm0, %v8994_v34 }
  0xae   :  { %6907 = vmatprep.mubr.msk.f32.mxu1 %vm138_vm0, %v8994_v34 }
  0xb0   :  { %6842 = vmatmul.mubr.msk.f32.gmra.mrb[18].mxu0 %vm138_vm0, %v9001_v35 }
  0xb1   :  { %6908 = vmatmul.mubr.msk.f32.gmra.mrb[18].mxu1 %vm138_vm0, %v9001_v35  ;;  %6844 = vmatprep.mubr.msk.f32.mxu0 %vm138_vm0, %v9012_v36 }
  0xb2   :  { %6910 = vmatprep.mubr.msk.f32.mxu1 %vm138_vm0, %v9012_v36 }
  0xb4   :  { %6845 = vmatmul.mubr.msk.f32.gmra.mrb[20].mxu0 %vm138_vm0, %v9019_v37 }
  0xb5   :  { %6911 = vmatmul.mubr.msk.f32.gmra.mrb[20].mxu1 %vm138_vm0, %v9019_v37  ;;  %6847 = vmatprep.mubr.msk.f32.mxu0 %vm138_vm0, %v9030_v38 }
  0xb6   :  { %6913 = vmatprep.mubr.msk.f32.mxu1 %vm138_vm0, %v9030_v38 }
  0xb8   :  { %6848 = vmatmul.mubr.msk.f32.gmra.mrb[22].mxu0 %vm138_vm0, %v9037_v39 }
  0xb9   :  { %6914 = vmatmul.mubr.msk.f32.gmra.mrb[22].mxu1 %vm138_vm0, %v9037_v39  ;;  %6850 = vmatprep.mubr.msk.f32.mxu0 %vm138_vm0, %v9048_v40 }
  0xba   :  { %6916 = vmatprep.mubr.msk.f32.mxu1 %vm138_vm0, %v9048_v40 }
  0xbc   :  { %6851 = vmatmul.mubr.msk.f32.gmra.mrb[24].mxu0 %vm138_vm0, %v9055_v41 }
  0xbd   :  { %6917 = vmatmul.mubr.msk.f32.gmra.mrb[24].mxu1 %vm138_vm0, %v9055_v41  ;;  %6853 = vmatprep.mubr.msk.f32.mxu0 %vm138_vm0, %v9066_v42 }
  0xbe   :  { %6919 = vmatprep.mubr.msk.f32.mxu1 %vm138_vm0, %v9066_v42 }
  0xc0   :  { %6854 = vmatmul.mubr.msk.f32.gmra.mrb[26].mxu0 %vm138_vm0, %v9442_v26 }
  0xc1   :  { %6920 = vmatmul.mubr.msk.f32.gmra.mrb[26].mxu1 %vm138_vm0, %v9442_v26  ;;  %6946 = vmatprep.mubr.msk.f32.mxu0 %vm138_vm0, %v8773_v48 }
  0xc2   :  { %7012 = vmatprep.mubr.msk.f32.mxu1 %vm138_vm0, %v8773_v48  ;;  %v5546_v48 = vld [vmem:[%s10704_s2 + $0x1a0] sm:$0xff] }
  0xc4   :  { %6947 = vmatmul.mubr.msk.f32.vlgmr.msra.gmra.mrb[0].mxu0 %vm138_vm0, %v8788_v53 }
  0xc5   :  { %7013 = vmatmul.mubr.msk.f32.vlgmr.msra.gmra.mrb[0].mxu1 %vm138_vm0, %v8788_v53  ;;  %7924 = vmatpush3.bf16.msra.mxu0 %v7921_v23  ;;  %v7953_v53 = vpack.c.bf16 %v5547_v52, %v5546_v48  ;;  %v5484_v23 = vld [vmem:[%s10705_s0 + $0x70] sm:$0xff]  ;;  %v5494_v48 = vld [vmem:[%s10705_s0 + $0xc0] sm:$0xff]  ;;  %v5495_v52 = vld [vmem:[%s10705_s0 + $0xc8] sm:$0xff] }
  0xc6   :  { %7948 = vmatpush3.bf16.msra.mxu1 %v7945_v24  ;;  %6949 = vmatprep.mubr.msk.f32.mxu0 %vm138_vm0, %v8801_v56  ;;  %v5485_v24 = vld [vmem:[%s10705_s0 + $0x78] sm:$0xff] }
  0xc7   :  { %7015 = vmatprep.mubr.msk.f32.mxu1 %vm138_vm0, %v8801_v56  ;;  %7926 = vmatprep.subr.bf16.mxu0 %v7925_v47  ;;  %v5548_v56 = vld [vmem:[%s10704_s2 + $0x1b0] sm:$0xff] }
  0xc8   :  { %6950 = vmatmul.mubr.msk.f32.gmra.mrb[2].mxu0 %vm138_vm0, %v8820_v61  ;;  %7950 = vmatprep.subr.bf16.mxu1 %v7949_v49 }
  0xc9   :  { %7016 = vmatmul.mubr.msk.f32.gmra.mrb[2].mxu1 %vm138_vm0, %v8820_v61  ;;  %6952 = vmatprep.mubr.msk.f32.mxu0 %vm138_vm0, %v8833_v0  ;;  %v7957_v61 = vpack.c.bf16 %v5549_v57, %v5548_v56  ;;  %v5591_v57 = vld [vmem:[%s10706_s4 + $0x98] sm:$0xff] }
  0xca   :  { %7018 = vmatprep.mubr.msk.f32.mxu1 %vm138_vm0, %v8833_v0  ;;  %7928 = vmatpush3.bf16.msra.mxu0 %v7925_v47  ;;  %v5550_v0 = vld [vmem:[%s10704_s2 + $0x1c0] sm:$0xff] }
  0xcb   :  { %7952 = vmatpush3.bf16.msra.mxu1 %v7949_v49  ;;  %7930 = vmatprep.subr.bf16.mxu0 %v7929_v45  ;;  %v5490_v47 = vld [vmem:[%s10705_s0 + $0xa0] sm:$0xff]  ;;  %v5491_v49 = vld [vmem:[%s10705_s0 + $0xa8] sm:$0xff] }
  0xcc   :  { %6953 = vmatmul.mubr.msk.f32.gmra.mrb[4].mxu0 %vm138_vm0, %v8850_v5  ;;  %7954 = vmatprep.subr.bf16.mxu1 %v7953_v53 }
  0xcd   :  { %7019 = vmatmul.mubr.msk.f32.gmra.mrb[4].mxu1 %vm138_vm0, %v8850_v5  ;;  %6955 = vmatprep.mubr.msk.f32.mxu0 %vm138_vm0, %v8863_v8  ;;  %v7961_v5 = vpack.c.bf16 %v5551_v60, %v5550_v0  ;;  %v5593_v60 = vld [vmem:[%s10706_s4 + $0xa8] sm:$0xf] }
  0xce   :  { %7021 = vmatprep.mubr.msk.f32.mxu1 %vm138_vm0, %v8863_v8  ;;  %7932 = vmatpush3.bf16.msra.mxu0 %v7929_v45  ;;  %v5552_v8 = vld [vmem:[%s10704_s2 + $0x1d0] sm:$0xff] }
  0xcf   :  { %7956 = vmatpush3.bf16.msra.mxu1 %v7953_v53  ;;  %7934 = vmatprep.subr.bf16.mxu0 %v7933_v22  ;;  %v5496_v45 = vld [vmem:[%s10705_s0 + $0xd0] sm:$0xff]  ;;  %v5501_v53 = vld [vmem:[%s10705_s0 + $0xf8] sm:$0xff] }
  0xd0   :  { %6956 = vmatmul.mubr.msk.f32.gmra.mrb[6].mxu0 %vm138_vm0, %v8880_v13  ;;  %7958 = vmatprep.subr.bf16.mxu1 %v7957_v61 }
  0xd1   :  { %7022 = vmatmul.mubr.msk.f32.gmra.mrb[6].mxu1 %vm138_vm0, %v8880_v13  ;;  %6958 = vmatprep.mubr.msk.f32.mxu0 %vm138_vm0, %v8893_v16  ;;  %v7965_v13 = vpack.c.bf16 %v5553_v2, %v5552_v8  ;;  %v3044_v2 = vld [vmem:[%s10707_s5 + $0x8] sm:$0xff] }
  0xd2   :  { %7024 = vmatprep.mubr.msk.f32.mxu1 %vm138_vm0, %v8893_v16  ;;  %7936 = vmatpush3.bf16.msra.mxu0 %v7933_v22  ;;  %v5616_v16 = vld [vmem:[%s10707_s5 + $0x58] sm:$0xff]  ;;  %v5592_v22 = vld [vmem:[%s10706_s4 + $0xa0] sm:$0xff] }
  0xd3   :  { %7960 = vmatpush3.bf16.msra.mxu1 %v7957_v61  ;;  %7938 = vmatprep.subr.bf16.mxu0 %v7937_v62  ;;  %v5624_v61 = vld [vmem:[%s10707_s5 + $0x98] sm:$0xff]  ;;  %v7985_v58 = vpack.c.bf16 %v5592_v22, %v5591_v57 }
  0xd4   :  { %6959 = vmatmul.mubr.msk.f32.gmra.mrb[8].mxu0 %vm138_vm0, %v8910_v21  ;;  %7962 = vmatprep.subr.bf16.mxu1 %v7961_v5  ;;  %v8025_v0 = vpack.c.bf16 %v5625_v59, %v5624_v61 }
  0xd5   :  { %7025 = vmatmul.mubr.msk.f32.gmra.mrb[8].mxu1 %vm138_vm0, %v8910_v21  ;;  %6961 = vmatprep.mubr.msk.f32.mxu0 %vm138_vm0, %v8923_v25  ;;  %v8009_v21 = vpack.c.bf16 %v5617_v7, %v5616_v16 }
  0xd6   :  { %7027 = vmatprep.mubr.msk.f32.mxu1 %vm138_vm0, %v8923_v25  ;;  %7940 = vmatpush3.bf16.msra.mxu0 %v7937_v62  ;;  %v9631_v25 = vld [vmem:[%s10705_s0 + $0xf0] sm:$0xff]  ;;  %v5626_v62 = vld [vmem:[%s10707_s5 + $0xa8] sm:$0xf] }
  0xd7   :  { %7964 = vmatpush3.bf16.msra.mxu1 %v7961_v5  ;;  %7942 = vmatprep.subr.bf16.mxu0 %v7941_v3  ;;  %v3032_v5 = vld [vmem:[%s10706_s4] sm:$0xff] }
  0xd8   :  { %6962 = vmatmul.mubr.msk.f32.gmra.mrb[10].mxu0 %vm138_vm0, %v8938_v28  ;;  %7966 = vmatprep.subr.bf16.mxu1 %v7965_v13  ;;  %v7989_v8 = vpack.c.bf16 %v3033_v63, %v3032_v5  ;;  %v3049_v63 = vld [vmem:[%s10707_s5 + $0x30] sm:$0xff] }
  0xd9   :  { %7028 = vmatmul.mubr.msk.f32.gmra.mrb[10].mxu1 %vm138_vm0, %v8938_v28  ;;  %6964 = vmatprep.mubr.msk.f32.mxu0 %vm138_vm0, %v8945_v29  ;;  %v5474_v28 = vld [vmem:[%s10705_s0 + $0x20] sm:$0xff] }
  0xda   :  { %7030 = vmatprep.mubr.msk.f32.mxu1 %vm138_vm0, %v8945_v29  ;;  %7944 = vmatpush3.bf16.msra.mxu0 %v7941_v3  ;;  %v5585_v29 = vld [vmem:[%s10706_s4 + $0x68] sm:$0xff]  ;;  %v8029_v3 = vpack.c.bf16 %v3044_v2, %v3043_v1  ;;  %v3050_v1 = vld [vmem:[%s10707_s5 + $0x38] sm:$0xff] }
  0xdb   :  { %7968 = vmatpush3.bf16.msra.mxu1 %v7965_v13  ;;  %7970 = vmatprep.subr.bf16.mxu0 %v7969_v9 }
  0xdc   :  { %6965 = vmatmul.mubr.msk.f32.gmra.mrb[12].mxu0 %vm138_vm0, %v8958_v30  ;;  %8010 = vmatprep.subr.bf16.mxu1 %v8009_v21 }
  0xdd   :  { %7031 = vmatmul.mubr.msk.f32.gmra.mrb[12].mxu1 %vm138_vm0, %v8958_v30  ;;  %6967 = vmatprep.mubr.msk.f32.mxu0 %vm138_vm0, %v8965_v31  ;;  %v5586_v30 = vld [vmem:[%s10706_s4 + $0x70] sm:$0xff] }
  0xde   :  { %7033 = vmatprep.mubr.msk.f32.mxu1 %vm138_vm0, %v8965_v31  ;;  %v5475_v31 = vld [vmem:[%s10705_s0 + $0x28] sm:$0xff] }
  0xe0   :  { %6968 = vmatmul.mubr.msk.f32.gmra.mrb[14].mxu0 %vm138_vm0, %v8976_v32 }
  0xe1   :  { %7034 = vmatmul.mubr.msk.f32.gmra.mrb[14].mxu1 %vm138_vm0, %v8976_v32  ;;  %6970 = vmatprep.mubr.msk.f32.mxu0 %vm138_vm0, %v8983_v33  ;;  %v5618_v32 = vld [vmem:[%s10707_s5 + $0x68] sm:$0xff] }
  0xe2   :  { %7036 = vmatprep.mubr.msk.f32.mxu1 %vm138_vm0, %v8983_v33  ;;  %v5619_v33 = vld [vmem:[%s10707_s5 + $0x70] sm:$0xff] }
  0xe4   :  { %6971 = vmatmul.mubr.msk.f32.gmra.mrb[16].mxu0 %vm138_vm0, %v8994_v34 }
  0xe5   :  { %7037 = vmatmul.mubr.msk.f32.gmra.mrb[16].mxu1 %vm138_vm0, %v8994_v34  ;;  %6973 = vmatprep.mubr.msk.f32.mxu0 %vm138_vm0, %v9001_v35  ;;  %v5476_v34 = vld [vmem:[%s10705_s0 + $0x30] sm:$0xff] }
  0xe6   :  { %7039 = vmatprep.mubr.msk.f32.mxu1 %vm138_vm0, %v9001_v35  ;;  %v7973_v35 = vpack.c.bf16 %v5586_v30, %v5585_v29 }
  0xe8   :  { %6974 = vmatmul.mubr.msk.f32.gmra.mrb[18].mxu0 %vm138_vm0, %v9012_v36 }
  0xe9   :  { %7040 = vmatmul.mubr.msk.f32.gmra.mrb[18].mxu1 %vm138_vm0, %v9012_v36  ;;  %6976 = vmatprep.mubr.msk.f32.mxu0 %vm138_vm0, %v9019_v37  ;;  %v8013_v36 = vpack.c.bf16 %v5619_v33, %v5618_v32 }
  0xea   :  { %7042 = vmatprep.mubr.msk.f32.mxu1 %vm138_vm0, %v9019_v37  ;;  %v5587_v37 = vld [vmem:[%s10706_s4 + $0x78] sm:$0xff] }
  0xec   :  { %6977 = vmatmul.mubr.msk.f32.gmra.mrb[20].mxu0 %vm138_vm0, %v9030_v38 }
  0xed   :  { %7043 = vmatmul.mubr.msk.f32.gmra.mrb[20].mxu1 %vm138_vm0, %v9030_v38  ;;  %6979 = vmatprep.mubr.msk.f32.mxu0 %vm138_vm0, %v9037_v39  ;;  %v5588_v38 = vld [vmem:[%s10706_s4 + $0x80] sm:$0xff] }
  0xee   :  { %7045 = vmatprep.mubr.msk.f32.mxu1 %vm138_vm0, %v9037_v39  ;;  %v5477_v39 = vld [vmem:[%s10705_s0 + $0x38] sm:$0xff]  ;;  %v7977_v12 = vpack.c.bf16 %v5588_v38, %v5587_v37 }
  0xf0   :  { %6980 = vmatmul.mubr.msk.f32.gmra.mrb[22].mxu0 %vm138_vm0, %v9048_v40 }
  0xf1   :  { %7046 = vmatmul.mubr.msk.f32.gmra.mrb[22].mxu1 %vm138_vm0, %v9048_v40  ;;  %6982 = vmatprep.mubr.msk.f32.mxu0 %vm138_vm0, %v9055_v41  ;;  %v5620_v40 = vld [vmem:[%s10707_s5 + $0x78] sm:$0xff] }
  0xf2   :  { %7048 = vmatprep.mubr.msk.f32.mxu1 %vm138_vm0, %v9055_v41  ;;  %v8017_v14 = vpack.c.bf16 %v5621_v10, %v5620_v40 }
  0xf4   :  { %6983 = vmatmul.mubr.msk.f32.gmra.mrb[24].mxu0 %vm138_vm0, %v9066_v42 }
  0xf5   :  { %7049 = vmatmul.mubr.msk.f32.gmra.mrb[24].mxu1 %vm138_vm0, %v9066_v42  ;;  %6985 = vmatprep.mubr.msk.f32.mxu0 %vm138_vm0, %v9442_v26 }
  0xf6   :  { %7051 = vmatprep.mubr.msk.f32.mxu1 %vm138_vm0, %v9442_v26 }
  0xf8   :  { %6986 = vmatmul.mubr.msk.f32.gmra.mrb[26].mxu0 %vm138_vm0, %v9631_v25 }
  0xf9   :  { %7052 = vmatmul.mubr.msk.f32.gmra.mrb[26].mxu1 %vm138_vm0, %v9631_v25  ;;  %7078 = vmatprep.mubr.msk.f32.mxu0 %vm138_vm0, %v5474_v28 }
  0xfa   :  { %7144 = vmatprep.mubr.msk.f32.mxu1 %vm138_vm0, %v5474_v28 }
  0xfc   :  { %7079 = vmatmul.mubr.msk.f32.vlgmr.msra.gmra.mrb[0].mxu0 %vm138_vm0, %v5475_v31 }
  0xfd   :  { %7145 = vmatmul.mubr.msk.f32.vlgmr.msra.gmra.mrb[0].mxu1 %vm138_vm0, %v5475_v31  ;;  %7081 = vmatprep.mubr.msk.f32.mxu0 %vm138_vm0, %v5476_v34 }
  0xfe   :  { %7147 = vmatprep.mubr.msk.f32.mxu1 %vm138_vm0, %v5476_v34  ;;  %7972 = vmatpush3.bf16.msra.mxu0 %v7969_v9 }
  0xff   :  { %8012 = vmatpush3.bf16.msra.mxu1 %v8009_v21  ;;  %7974 = vmatprep.subr.bf16.mxu0 %v7973_v35 }
 0x100   :  { %7082 = vmatmul.mubr.msk.f32.gmra.mrb[2].mxu0 %vm138_vm0, %v5477_v39  ;;  %8014 = vmatprep.subr.bf16.mxu1 %v8013_v36 }
 0x101   :  { %7148 = vmatmul.mubr.msk.f32.gmra.mrb[2].mxu1 %vm138_vm0, %v5477_v39  ;;  %7084 = vmatprep.mubr.msk.f32.mxu0 %vm138_vm0, %v5478_v11 }
 0x102   :  { %7150 = vmatprep.mubr.msk.f32.mxu1 %vm138_vm0, %v5478_v11  ;;  %7976 = vmatpush3.bf16.msra.mxu0 %v7973_v35 }
 0x103   :  { %8016 = vmatpush3.bf16.msra.mxu1 %v8013_v36  ;;  %7978 = vmatprep.subr.bf16.mxu0 %v7977_v12 }
 0x104   :  { %7085 = vmatmul.mubr.msk.f32.gmra.mrb[4].mxu0 %vm138_vm0, %v5479_v15  ;;  %8018 = vmatprep.subr.bf16.mxu1 %v8017_v14 }
 0x105   :  { %7151 = vmatmul.mubr.msk.f32.gmra.mrb[4].mxu1 %vm138_vm0, %v5479_v15  ;;  %7087 = vmatprep.mubr.msk.f32.mxu0 %vm138_vm0, %v5480_v17  ;;  %v3034_v15 = vld [vmem:[%s10706_s4 + $0x10] sm:$0xff] }
 0x106   :  { %7153 = vmatprep.mubr.msk.f32.mxu1 %vm138_vm0, %v5480_v17  ;;  %7980 = vmatpush3.bf16.msra.mxu0 %v7977_v12 }
 0x107   :  { %8020 = vmatpush3.bf16.msra.mxu1 %v8017_v14 }
 0x108   :  { %7088 = vmatmul.mubr.msk.f32.gmra.mrb[6].mxu0 %vm138_vm0, %v5481_v18 }
 0x109   :  { %7154 = vmatmul.mubr.msk.f32.gmra.mrb[6].mxu1 %vm138_vm0, %v5481_v18  ;;  %7090 = vmatprep.mubr.msk.f32.mxu0 %vm138_vm0, %v5482_v19 }
 0x10a   :  { %7156 = vmatprep.mubr.msk.f32.mxu1 %vm138_vm0, %v5482_v19  ;;  %v3035_v19 = vld [vmem:[%s10706_s4 + $0x18] sm:$0xff] }
 0x10c   :  { %7091 = vmatmul.mubr.msk.f32.gmra.mrb[8].mxu0 %vm138_vm0, %v5483_v20 }
 0x10d   :  { %7157 = vmatmul.mubr.msk.f32.gmra.mrb[8].mxu1 %vm138_vm0, %v5483_v20  ;;  %7093 = vmatprep.mubr.msk.f32.mxu0 %vm138_vm0, %v5484_v23  ;;  %v3045_v20 = vld [vmem:[%s10707_s5 + $0x10] sm:$0xff] }
 0x10e   :  { %7159 = vmatprep.mubr.msk.f32.mxu1 %vm138_vm0, %v5484_v23  ;;  %v3046_v23 = vld [vmem:[%s10707_s5 + $0x18] sm:$0xff] }
 0x110   :  { %7094 = vmatmul.mubr.msk.f32.gmra.mrb[10].mxu0 %vm138_vm0, %v5485_v24 }
 0x111   :  { %7160 = vmatmul.mubr.msk.f32.gmra.mrb[10].mxu1 %vm138_vm0, %v5485_v24  ;;  %7096 = vmatprep.mubr.msk.f32.mxu0 %vm138_vm0, %v5486_v27 }
 0x112   :  { %7162 = vmatprep.mubr.msk.f32.mxu1 %vm138_vm0, %v5486_v27 }
 0x114   :  { %7097 = vmatmul.mubr.msk.f32.gmra.mrb[12].mxu0 %vm138_vm0, %v5487_v43 }
 0x115   :  { %7163 = vmatmul.mubr.msk.f32.gmra.mrb[12].mxu1 %vm138_vm0, %v5487_v43  ;;  %7099 = vmatprep.mubr.msk.f32.mxu0 %vm138_vm0, %v5488_v44 }
 0x116   :  { %7165 = vmatprep.mubr.msk.f32.mxu1 %vm138_vm0, %v5488_v44 }
 0x118   :  { %7100 = vmatmul.mubr.msk.f32.gmra.mrb[14].mxu0 %vm138_vm0, %v5489_v46 }
 0x119   :  { %7166 = vmatmul.mubr.msk.f32.gmra.mrb[14].mxu1 %vm138_vm0, %v5489_v46  ;;  %7102 = vmatprep.mubr.msk.f32.mxu0 %vm138_vm0, %v5490_v47 }
 0x11a   :  { %7168 = vmatprep.mubr.msk.f32.mxu1 %vm138_vm0, %v5490_v47 }
 0x11c   :  { %7103 = vmatmul.mubr.msk.f32.gmra.mrb[16].mxu0 %vm138_vm0, %v5491_v49 }
 0x11d   :  { %7169 = vmatmul.mubr.msk.f32.gmra.mrb[16].mxu1 %vm138_vm0, %v5491_v49  ;;  %7105 = vmatprep.mubr.msk.f32.mxu0 %vm138_vm0, %v5492_v50 }
 0x11e   :  { %7171 = vmatprep.mubr.msk.f32.mxu1 %vm138_vm0, %v5492_v50  ;;  %v7993_v50 = vpack.c.bf16 %v3035_v19, %v3034_v15 }
 0x120   :  { %7106 = vmatmul.mubr.msk.f32.gmra.mrb[18].mxu0 %vm138_vm0, %v5493_v51 }
 0x121   :  { %7172 = vmatmul.mubr.msk.f32.gmra.mrb[18].mxu1 %vm138_vm0, %v5493_v51  ;;  %7108 = vmatprep.mubr.msk.f32.mxu0 %vm138_vm0, %v5494_v48  ;;  %v8033_v51 = vpack.c.bf16 %v3046_v23, %v3045_v20 }
 0x122   :  { %7174 = vmatprep.mubr.msk.f32.mxu1 %vm138_vm0, %v5494_v48  ;;  %v3036_v48 = vld [vmem:[%s10706_s4 + $0x20] sm:$0xff] }
 0x124   :  { %7109 = vmatmul.mubr.msk.f32.gmra.mrb[20].mxu0 %vm138_vm0, %v5495_v52 }
 0x125   :  { %7175 = vmatmul.mubr.msk.f32.gmra.mrb[20].mxu1 %vm138_vm0, %v5495_v52  ;;  %7111 = vmatprep.mubr.msk.f32.mxu0 %vm138_vm0, %v5496_v45  ;;  %v3037_v52 = vld [vmem:[%s10706_s4 + $0x28] sm:$0xff] }
 0x126   :  { %7177 = vmatprep.mubr.msk.f32.mxu1 %vm138_vm0, %v5496_v45  ;;  %v7997_v22 = vpack.c.bf16 %v3037_v52, %v3036_v48  ;;  %v5671_v48 = vld [vmem:[%s10707_s5 + $0xb0] sm:$0xff]  ;;  %v5672_v52 = vld [vmem:[%s10707_s5 + $0xb8] sm:$0xff] }
 0x128   :  { %7112 = vmatmul.mubr.msk.f32.gmra.mrb[22].mxu0 %vm138_vm0, %v9055_v41 }
 0x129   :  { %7178 = vmatmul.mubr.msk.f32.gmra.mrb[22].mxu1 %vm138_vm0, %v9055_v41  ;;  %7114 = vmatprep.mubr.msk.f32.mxu0 %vm138_vm0, %v9066_v42  ;;  %v5589_v41 = vld [vmem:[%s10706_s4 + $0x88] sm:$0xff] }
 0x12a   :  { %7180 = vmatprep.mubr.msk.f32.mxu1 %vm138_vm0, %v9066_v42  ;;  %v5590_v42 = vld [vmem:[%s10706_s4 + $0x90] sm:$0xff] }
 0x12b   :  { %v7981_v54 = vpack.c.bf16 %v5590_v42, %v5589_v41  ;;  %v3047_v41 = vld [vmem:[%s10707_s5 + $0x20] sm:$0xff]  ;;  %v3048_v42 = vld [vmem:[%s10707_s5 + $0x28] sm:$0xff] }
 0x12c   :  { %7115 = vmatmul.mubr.msk.f32.gmra.mrb[24].mxu0 %vm138_vm0, %v9442_v26  ;;  %v8037_v59 = vpack.c.bf16 %v3048_v42, %v3047_v41 }
 0x12d   :  { %7181 = vmatmul.mubr.msk.f32.gmra.mrb[24].mxu1 %vm138_vm0, %v9442_v26  ;;  %7117 = vmatprep.mubr.msk.f32.mxu0 %vm138_vm0, %v9631_v25  ;;  %v5622_v26 = vld [vmem:[%s10707_s5 + $0x88] sm:$0xff] }
 0x12e   :  { %7183 = vmatprep.mubr.msk.f32.mxu1 %vm138_vm0, %v9631_v25  ;;  %v8021_v56 = vpack.c.bf16 %v5623_v55, %v5622_v26  ;;  %7982 = vmatprep.subr.bf16.mxu0 %v7981_v54 }
 0x12f   :  { %7984 = vmatpush3.bf16.msra.mxu0 %v7981_v54 }
 0x130   :  { %7118 = vmatmul.mubr.msk.f32.gmra.mrb[26].mxu0 %vm138_vm0, %v5501_v53  ;;  %8022 = vmatprep.subr.bf16.mxu1 %v8021_v56 }
 0x131   :  { %7184 = vmatmul.mubr.msk.f32.gmra.mrb[26].mxu1 %vm138_vm0, %v5501_v53  ;;  %7986 = vmatprep.subr.bf16.mxu0 %v7985_v58 }
 0x132   :  { %8024 = vmatpush3.bf16.msra.mxu1 %v8021_v56 }
 0x133   :  { %8026 = vmatprep.subr.bf16.mxu1 %v8025_v0  ;;  %7988 = vmatpush3.bf16.msra.mxu0 %v7985_v58 }
 0x134   :  { %7206 = vmatprep.subr.msk.mxu0 %vm3097_vm1, %v5593_v60 }
 0x136   :  { %8028 = vmatpush3.bf16.msra.mxu1 %v8025_v0  ;;  %v3038_v0 = vld [vmem:[%s10706_s4 + $0x30] sm:$0xff] }
 0x137   :  { %7280 = vmatprep.subr.msk.mxu1 %vm3097_vm1, %v5626_v62  ;;  %7207 = vmatpush3.msk.msra.mxu0 %vm3097_vm1, %v5593_v60  ;;  %v3039_v60 = vld [vmem:[%s10706_s4 + $0x38] sm:$0xff] }
 0x138   :  { %7990 = vmatprep.subr.bf16.mxu0 %v7989_v8 }
 0x13a   :  { %7281 = vmatpush3.msk.msra.mxu1 %vm3097_vm1, %v5626_v62 }
 0x13b   :  { %8030 = vmatprep.subr.bf16.mxu1 %v8029_v3 }
 0x1cf   :  { %v7080_v13 = vpop.f32.mrb[0].mxu0 }
 0x1d0   :  { %v7146_v4 = vpop.f32.mrb[0].mxu1  ;;  %v2542_v16 = vpop.f32.mrb[1].mxu0 }
 0x1d1   :  { %v2956_v7 = vmax.f32 %v7080_v13, %v7146_v4  ;;  %v2788_v9 = vpop.f32.mrb[1].mxu1 }
 0x1d2   :  { %v2955_v21 = vmax.f32 %v2542_v16, %v2788_v9  ;;  %v8001_v16 = vpack.c.bf16 %v3039_v60, %v3038_v0 }
 0x1d3   :  { %v2991_v25 = vadd.f32 %v9848_v6, %v2956_v7  ;;  %v7083_v28 = vpop.f32.mrb[2].mxu0 }
 0x1d4   :  { %v2990_v29 = vadd.f32 %v9848_v6, %v2955_v21  ;;  %v7149_v30 = vpop.f32.mrb[2].mxu1  ;;  %v2552_v31 = vpop.f32.mrb[3].mxu0  ;;  %v8041_v21 = vpack.c.bf16 %v3050_v1, %v3049_v63 }
 0x1d5   :  { %v2958_v32 = vmax.f32 %v7083_v28, %v7149_v30  ;;  %v2798_v33 = vpop.f32.mrb[3].mxu1  ;;  %v3041_v28 = vld [vmem:[%s10706_s4 + $0x48] sm:$0xff] }
 0x1d6   :  { %v9852_v34 = vmax.f32 %v2990_v29, %v2991_v25  ;;  %v2957_v35 = vmax.f32 %v2552_v31, %v2798_v33  ;;  %v3040_v25 = vld [vmem:[%s10706_s4 + $0x40] sm:$0xff] }
 0x1d7   :  { %v2993_v36 = vadd.f32 %v9848_v6, %v2958_v32  ;;  %v7086_v37 = vpop.f32.mrb[4].mxu0  ;;  %v3051_v31 = vld [vmem:[%s10707_s5 + $0x40] sm:$0xff]  ;;  %v3052_v32 = vld [vmem:[%s10707_s5 + $0x48] sm:$0xff] }
 0x1d8   :  { %v2992_v38 = vadd.f32 %v9848_v6, %v2957_v35  ;;  %v7152_v39 = vpop.f32.mrb[4].mxu1  ;;  %v2562_v40 = vpop.f32.mrb[5].mxu0 }
 0x1d9   :  { %v2960_v10 = vmax.f32 %v7086_v37, %v7152_v39  ;;  %v2808_v11 = vpop.f32.mrb[5].mxu1  ;;  %v8005_v39 = vpack.c.bf16 %v3041_v28, %v3040_v25 }
 0x1da   :  { %v9856_v12 = vmax.f32 %v2992_v38, %v2993_v36  ;;  %v2959_v14 = vmax.f32 %v2562_v40, %v2808_v11  ;;  %v8045_v11 = vpack.c.bf16 %v3052_v32, %v3051_v31 }
 0x1db   :  { %v2995_v17 = vadd.f32 %v9848_v6, %v2960_v10  ;;  %v7089_v18 = vpop.f32.mrb[6].mxu0 }
 0x1dc   :  { %v2994_v24 = vadd.f32 %v9848_v6, %v2959_v14  ;;  %v7155_v27 = vpop.f32.mrb[6].mxu1  ;;  %7208 = vmatprep.mubr.msk.f32.mxu0 %vm3066_vm2, %v9856_v12  ;;  %7282 = vmatprep.mubr.msk.f32.mxu1 %vm3066_vm2, %v9856_v12  ;;  %v2572_v43 = vpop.f32.mrb[7].mxu0 }
 0x1dd   :  { %v2962_v44 = vmax.f32 %v7089_v18, %v7155_v27  ;;  %v2818_v46 = vpop.f32.mrb[7].mxu1 }
 0x1de   :  { %v9876_v47 = vmax.f32 %v2994_v24, %v2995_v17  ;;  %v2961_v49 = vmax.f32 %v2572_v43, %v2818_v46  ;;  %v3042_v43 = vld [vmem:[%s10706_s4 + $0x50] sm:$0xf]  ;;  %v5650_v46 = vld [vmem:[%s10706_s4 + $0xb8] sm:$0xff] }
 0x1df   :  { %v2997_v45 = vadd.f32 %v9848_v6, %v2962_v44  ;;  %v7092_v53 = vpop.f32.mrb[8].mxu0  ;;  %v5649_v44 = vld [vmem:[%s10706_s4 + $0xb0] sm:$0xff] }
 0x1e0   :  { %v2996_v26 = vadd.f32 %v9848_v6, %v2961_v49  ;;  %v7158_v54 = vpop.f32.mrb[8].mxu1  ;;  %7209 = vmatmul.mubr.msk.f32.vlgmr.msra.gmra.mrb[28].mxu0 %vm3066_vm2, %v9876_v47  ;;  %7283 = vmatmul.mubr.msk.f32.vlgmr.msra.gmra.mrb[28].mxu1 %vm3066_vm2, %v9876_v47  ;;  %v2582_v55 = vpop.f32.mrb[9].mxu0 }
 0x1e1   :  { %v2964_v56 = vmax.f32 %v7092_v53, %v7158_v54  ;;  %v2828_v57 = vpop.f32.mrb[9].mxu1  ;;  %7992 = vmatpush3.bf16.msra.mxu0 %v7989_v8  ;;  %8032 = vmatpush3.bf16.msra.mxu1 %v8029_v3  ;;  %v9970_v54 = vpack.c.bf16 %v5650_v46, %v5649_v44 }
 0x1e2   :  { %v9896_v61 = vmax.f32 %v2996_v26, %v2997_v45  ;;  %v2963_v58 = vmax.f32 %v2582_v55, %v2828_v57  ;;  %7994 = vmatprep.subr.bf16.mxu0 %v7993_v50  ;;  %8034 = vmatprep.subr.bf16.mxu1 %v8033_v51  ;;  %v9976_v57 = vpack.c.bf16 %v5672_v52, %v5671_v48 }
 0x1e3   :  { %v2999_v62 = vadd.f32 %v9848_v6, %v2964_v56  ;;  %v7095_v5 = vpop.f32.mrb[10].mxu0 }
 0x1e4   :  { %v2998_v8 = vadd.f32 %v9848_v6, %v2963_v58  ;;  %v7161_v2 = vpop.f32.mrb[10].mxu1  ;;  %7211 = vmatprep.mubr.msk.f32.mxu0 %vm3066_vm2, %v9896_v61  ;;  %7285 = vmatprep.mubr.msk.f32.mxu1 %vm3066_vm2, %v9896_v61  ;;  %v2592_v3 = vpop.f32.mrb[11].mxu0 }
 0x1e5   :  { %v2966_v13 = vmax.f32 %v7095_v5, %v7161_v2  ;;  %v2838_v4 = vpop.f32.mrb[11].mxu1  ;;  %7996 = vmatpush3.bf16.msra.mxu0 %v7993_v50  ;;  %8036 = vmatpush3.bf16.msra.mxu1 %v8033_v51  ;;  %v3053_v51 = vld [vmem:[%s10707_s5 + $0x50] sm:$0xf] }
 0x1e6   :  { %v9916_v7 = vmax.f32 %v2998_v8, %v2999_v62  ;;  %v2965_v9 = vmax.f32 %v2592_v3, %v2838_v4  ;;  %7998 = vmatprep.subr.bf16.mxu0 %v7997_v22  ;;  %8038 = vmatprep.subr.bf16.mxu1 %v8037_v59 }
 0x1e7   :  { %v3001_v29 = vadd.f32 %v9848_v6, %v2966_v13  ;;  %v7098_v30 = vpop.f32.mrb[12].mxu0 }
 0x1e8   :  { %v3000_v33 = vadd.f32 %v9848_v6, %v2965_v9  ;;  %v7164_v35 = vpop.f32.mrb[12].mxu1  ;;  %7212 = vmatmul.mubr.msk.f32.gmra.mrb[30].mxu0 %vm3066_vm2, %v9916_v7  ;;  %7286 = vmatmul.mubr.msk.f32.gmra.mrb[30].mxu1 %vm3066_vm2, %v9916_v7  ;;  %v2602_v36 = vpop.f32.mrb[13].mxu0 }
 0x1e9   :  { %v2968_v37 = vmax.f32 %v7098_v30, %v7164_v35  ;;  %v2848_v38 = vpop.f32.mrb[13].mxu1  ;;  %8000 = vmatpush3.bf16.msra.mxu0 %v7997_v22  ;;  %8040 = vmatpush3.bf16.msra.mxu1 %v8037_v59 }
 0x1ea   :  { %v9936_v40 = vmax.f32 %v3000_v33, %v3001_v29  ;;  %v2967_v10 = vmax.f32 %v2602_v36, %v2848_v38  ;;  %8002 = vmatprep.subr.bf16.mxu0 %v8001_v16  ;;  %8042 = vmatprep.subr.bf16.mxu1 %v8041_v21 }
 0x1eb   :  { %v3003_v14 = vadd.f32 %v9848_v6, %v2968_v37  ;;  %v7101_v15 = vpop.f32.mrb[14].mxu0 }
 0x1ec   :  { %v3002_v17 = vadd.f32 %v9848_v6, %v2967_v10  ;;  %v7167_v18 = vpop.f32.mrb[14].mxu1  ;;  %7214 = vmatprep.mubr.msk.f32.mxu0 %vm3066_vm2, %v9936_v40  ;;  %7288 = vmatprep.mubr.msk.f32.mxu1 %vm3066_vm2, %v9936_v40  ;;  %v2612_v19 = vpop.f32.mrb[15].mxu0  ;;  %v5651_v10 = vld [vmem:[%s10706_s4 + $0xc0] sm:$0xff] }
 0x1ed   :  { %v2970_v20 = vmax.f32 %v7101_v15, %v7167_v18  ;;  %v2858_v23 = vpop.f32.mrb[15].mxu1  ;;  %8004 = vmatpush3.bf16.msra.mxu0 %v8001_v16  ;;  %8044 = vmatpush3.bf16.msra.mxu1 %v8041_v21  ;;  %v5673_v18 = vld [vmem:[%s10707_s5 + $0xc0] sm:$0xff] }
 0x1ee   :  { %v9944_v24 = vmax.f32 %v3002_v17, %v3003_v14  ;;  %v2969_v27 = vmax.f32 %v2612_v19, %v2858_v23  ;;  %8006 = vmatprep.subr.bf16.mxu0 %v8005_v39  ;;  %8046 = vmatprep.subr.bf16.mxu1 %v8045_v11  ;;  %v5652_v17 = vld [vmem:[%s10706_s4 + $0xc8] sm:$0xff] }
 0x1ef   :  { %v3005_v49 = vadd.f32 %v9848_v6, %v2970_v20  ;;  %v7104_v50 = vpop.f32.mrb[16].mxu0  ;;  %v5674_v19 = vld [vmem:[%s10707_s5 + $0xc8] sm:$0xff] }
 0x1f0   :  { %v3004_v45 = vadd.f32 %v9848_v6, %v2969_v27  ;;  %v7170_v53 = vpop.f32.mrb[16].mxu1  ;;  %7215 = vmatmul.mubr.msk.f32.gmra.mrb[32].mxu0 %vm3066_vm2, %v9944_v24  ;;  %7289 = vmatmul.mubr.msk.f32.gmra.mrb[32].mxu1 %vm3066_vm2, %v9944_v24  ;;  %v2622_v41 = vpop.f32.mrb[17].mxu0 }
 0x1f1   :  { %v2972_v42 = vmax.f32 %v7104_v50, %v7170_v53  ;;  %v2868_v26 = vpop.f32.mrb[17].mxu1  ;;  %8008 = vmatpush3.bf16.msra.mxu0 %v8005_v39  ;;  %8048 = vmatpush3.bf16.msra.mxu1 %v8045_v11  ;;  %v8073_v50 = vpack.c.bf16 %v5674_v19, %v5673_v18  ;;  %v5675_v53 = vld [vmem:[%s10707_s5 + $0xd0] sm:$0xff] }
 0x1f2   :  { %v9972_v55 = vmax.f32 %v3004_v45, %v3005_v49  ;;  %v2971_v56 = vmax.f32 %v2622_v41, %v2868_v26  ;;  %7243 = vmatprep.subr.msk.mxu0 %vm3097_vm1, %v3042_v43  ;;  %7317 = vmatprep.subr.msk.mxu1 %vm3097_vm1, %v3053_v51  ;;  %v8053_v49 = vpack.c.bf16 %v5652_v17, %v5651_v10  ;;  %v5654_v45 = vld [vmem:[%s10706_s4 + $0xd8] sm:$0xff]  ;;  %v5720_v17 = vld [vmem:[%s10707_s5 + $0x130] sm:$0xff] }
 0x1f3   :  { %v3007_v22 = vadd.f32 %v9848_v6, %v2972_v42  ;;  %v7107_v58 = vpop.f32.mrb[18].mxu0  ;;  %v5676_v41 = vld [vmem:[%s10707_s5 + $0xd8] sm:$0xff] }
 0x1f4   :  { %v3006_v59 = vadd.f32 %v9848_v6, %v2971_v56  ;;  %v7173_v0 = vpop.f32.mrb[18].mxu1  ;;  %7217 = vmatprep.mubr.msk.f32.mxu0 %vm3066_vm2, %v9972_v55  ;;  %7291 = vmatprep.mubr.msk.f32.mxu1 %vm3066_vm2, %v9972_v55  ;;  %v2632_v60 = vpop.f32.mrb[19].mxu0 }
 0x1f5   :  { %v2974_v62 = vmax.f32 %v7107_v58, %v7173_v0  ;;  %v2878_v5 = vpop.f32.mrb[19].mxu1  ;;  %7244 = vmatpush3.msk.msra.mxu0 %vm3097_vm1, %v3042_v43  ;;  %7318 = vmatpush3.msk.msra.mxu1 %vm3097_vm1, %v3053_v51  ;;  %v5653_v51 = vld [vmem:[%s10706_s4 + $0xd0] sm:$0xff]  ;;  %v5656_v0 = vld [vmem:[%s10706_s4 + $0xe8] sm:$0xff] }
 0x1f6   :  { %v9986_v63 = vmax.f32 %v3006_v59, %v3007_v22  ;;  %v2973_v1 = vmax.f32 %v2632_v60, %v2878_v5  ;;  %8050 = vmatprep.subr.bf16.mxu0 %v9970_v54  ;;  %8070 = vmatprep.subr.bf16.mxu1 %v9976_v57  ;;  %v8057_v58 = vpack.c.bf16 %v5654_v45, %v5653_v51  ;;  %v5677_v60 = vld [vmem:[%s10707_s5 + $0xe0] sm:$0xff]  ;;  %v5702_v51 = vld [vmem:[%s10706_s4 + $0x150] sm:$0xff] }
 0x1f7   :  { %v3009_v8 = vadd.f32 %v9848_v6, %v2974_v62  ;;  %v7110_v2 = vpop.f32.mrb[20].mxu0  ;;  %v8077_v59 = vpack.c.bf16 %v5676_v41, %v5675_v53  ;;  %v5678_v62 = vld [vmem:[%s10707_s5 + $0xe8] sm:$0xff]  ;;  %v5703_v53 = vld [vmem:[%s10706_s4 + $0x158] sm:$0xf] }
 0x1f8   :  { %v3008_v3 = vadd.f32 %v9848_v6, %v2973_v1  ;;  %v7176_v13 = vpop.f32.mrb[20].mxu1  ;;  %7218 = vmatmul.mubr.msk.f32.gmra.mrb[34].mxu0 %vm3066_vm2, %v9986_v63  ;;  %7292 = vmatmul.mubr.msk.f32.gmra.mrb[34].mxu1 %vm3066_vm2, %v9986_v63  ;;  %v2642_v4 = vpop.f32.mrb[21].mxu0  ;;  %v8081_v1 = vpack.c.bf16 %v5678_v62, %v5677_v60  ;;  %v5725_v41 = vld [vmem:[%s10707_s5 + $0x158] sm:$0xf] }
 0x1f9   :  { %v2976_v16 = vmax.f32 %v7110_v2, %v7176_v13  ;;  %v2888_v9 = vpop.f32.mrb[21].mxu1  ;;  %v5658_v2 = vld [vmem:[%s10706_s4 + $0xf8] sm:$0xff] }
 0x1fa   :  { %v9996_v21 = vmax.f32 %v3008_v3, %v3009_v8  ;;  %v2975_v25 = vmax.f32 %v2642_v4, %v2888_v9  ;;  %v5657_v8 = vld [vmem:[%s10706_s4 + $0xf0] sm:$0xff]  ;;  %v5680_v13 = vld [vmem:[%s10707_s5 + $0xf8] sm:$0xff]  ;;  %v5659_v9 = vld [vmem:[%s10706_s4 + $0x100] sm:$0xf] }
 0x1fb   :  { %v3011_v28 = vadd.f32 %v9848_v6, %v2976_v16  ;;  %v7113_v29 = vpop.f32.mrb[22].mxu0  ;;  %v5679_v3 = vld [vmem:[%s10707_s5 + $0xf0] sm:$0xff]  ;;  %v8065_v4 = vpack.c.bf16 %v5658_v2, %v5657_v8  ;;  %v5763_v8 = vld [vmem:[%s10707_s5 + $0x180] sm:$0xff]  ;;  %v5764_v2 = vld [vmem:[%s10707_s5 + $0x188] sm:$0xff] }
 0x1fc   :  { %v3010_v30 = vadd.f32 %v9848_v6, %v2975_v25  ;;  %v7179_v31 = vpop.f32.mrb[22].mxu1  ;;  %7220 = vmatprep.mubr.msk.f32.mxu0 %vm3066_vm2, %v9996_v21  ;;  %7294 = vmatprep.mubr.msk.f32.mxu1 %vm3066_vm2, %v9996_v21  ;;  %v2652_v32 = vpop.f32.mrb[23].mxu0  ;;  %v8085_v16 = vpack.c.bf16 %v5680_v13, %v5679_v3  ;;  %v5681_v25 = vld [vmem:[%s10707_s5 + $0x100] sm:$0xf]  ;;  %v8157_v13 = vpack.c.bf16 %v5764_v2, %v5763_v8 }
 0x1fd   :  { %v2978_v33 = vmax.f32 %v7113_v29, %v7179_v31  ;;  %v2898_v35 = vpop.f32.mrb[23].mxu1  ;;  %v5694_v29 = vld [vmem:[%s10706_s4 + $0x110] sm:$0xff] }
 0x1fe   :  { %v10004_v36 = vmax.f32 %v3010_v30, %v3011_v28  ;;  %v2977_v37 = vmax.f32 %v2652_v32, %v2898_v35  ;;  %v5693_v28 = vld [vmem:[%s10706_s4 + $0x108] sm:$0xff]  ;;  %v5716_v31 = vld [vmem:[%s10707_s5 + $0x110] sm:$0xff]  ;;  %v5695_v35 = vld [vmem:[%s10706_s4 + $0x118] sm:$0xff] }
 0x1ff   :  { %v3013_v38 = vadd.f32 %v9848_v6, %v2978_v33  ;;  %v7116_v39 = vpop.f32.mrb[24].mxu0  ;;  %v5715_v30 = vld [vmem:[%s10707_s5 + $0x108] sm:$0xff]  ;;  %v8089_v32 = vpack.c.bf16 %v5694_v29, %v5693_v28 }
 0x200   :  { %v3012_v11 = vadd.f32 %v9848_v6, %v2977_v37  ;;  %v7182_v14 = vpop.f32.mrb[24].mxu1  ;;  %7221 = vmatmul.mubr.msk.f32.gmra.mrb[36].mxu0 %vm3066_vm2, %v10004_v36  ;;  %7295 = vmatmul.mubr.msk.f32.gmra.mrb[36].mxu1 %vm3066_vm2, %v10004_v36  ;;  %v2662_v15 = vpop.f32.mrb[25].mxu0  ;;  %v8109_v33 = vpack.c.bf16 %v5716_v31, %v5715_v30  ;;  %v5696_v37 = vld [vmem:[%s10706_s4 + $0x120] sm:$0xff]  ;;  %v5746_v31 = vld [vmem:[%s10706_s4 + $0x1a8] sm:$0xff] }
 0x201   :  { %v2980_v20 = vmax.f32 %v7116_v39, %v7182_v14  ;;  %v2908_v23 = vpop.f32.mrb[25].mxu1  ;;  %7245 = vmatprep.mubr.msk.f32.mxu0 %vm3066_vm2, %v9852_v34  ;;  %7319 = vmatprep.mubr.msk.f32.mxu1 %vm3066_vm2, %v9852_v34  ;;  %v8093_v39 = vpack.c.bf16 %v5696_v37, %v5695_v35  ;;  %v5698_v14 = vld [vmem:[%s10706_s4 + $0x130] sm:$0xff]  ;;  %v5745_v30 = vld [vmem:[%s10706_s4 + $0x1a0] sm:$0xff] }
 0x202   :  { %v10028_v27 = vmax.f32 %v3012_v11, %v3013_v38  ;;  %v2979_v43 = vmax.f32 %v2662_v15, %v2908_v23  ;;  %v5717_v38 = vld [vmem:[%s10707_s5 + $0x118] sm:$0xff]  ;;  %v5697_v11 = vld [vmem:[%s10706_s4 + $0x128] sm:$0xff]  ;;  %v5700_v23 = vld [vmem:[%s10706_s4 + $0x140] sm:$0xff]  ;;  %v8145_v35 = vpack.c.bf16 %v5746_v31, %v5745_v30 }
 0x203   :  { %v3015_v44 = vadd.f32 %v9848_v6, %v2980_v20  ;;  %v7119_v46 = vpop.f32.mrb[26].mxu0  ;;  %v5719_v15 = vld [vmem:[%s10707_s5 + $0x128] sm:$0xff]  ;;  %v8097_v18 = vpack.c.bf16 %v5698_v14, %v5697_v11  ;;  %v5699_v20 = vld [vmem:[%s10706_s4 + $0x138] sm:$0xff]  ;;  %v5782_v11 = vld [vmem:[%s10709_s7 + $0x50] sm:$0xff] }
 0x204   :  { %v3014_v48 = vadd.f32 %v9848_v6, %v2979_v43  ;;  %v7185_v52 = vpop.f32.mrb[26].mxu1  ;;  %7246 = vmatmul.mubr.msk.f32.vlgmr.msra.gmra.mrb[28].mxu0 %vm3066_vm2, %v9856_v12  ;;  %7320 = vmatmul.mubr.msk.f32.vlgmr.msra.gmra.mrb[28].mxu1 %vm3066_vm2, %v9856_v12  ;;  %v2672_v34 = vpop.f32.mrb[27].mxu0  ;;  %v8117_v19 = vpack.c.bf16 %v5720_v17, %v5719_v15  ;;  %v5721_v43 = vld [vmem:[%s10707_s5 + $0x138] sm:$0xff]  ;;  %v4468_v17 = vld [vmem:[%s10709_s7 + $0x10] sm:$0xff] }
 0x205   :  { %v2982_v42 = vmax.f32 %v7119_v46, %v7185_v52  ;;  %8052 = vmatpush3.bf16.msra.mxu0 %v9970_v54  ;;  %8072 = vmatpush3.bf16.msra.mxu1 %v9976_v57  ;;  %v2918_v26 = vpop.f32.mrb[27].mxu1  ;;  %v5655_v54 = vld [vmem:[%s10706_s4 + $0xe0] sm:$0xff]  ;;  %v8101_v46 = vpack.c.bf16 %v5700_v23, %v5699_v20  ;;  %v5724_v52 = vld [vmem:[%s10707_s5 + $0x150] sm:$0xff]  ;;  %v5785_v20 = vld [vmem:[%s10709_s7 + $0x68] sm:$0xff]  ;;  %v8587_v23 = vmov 0.0|0.0  }
 0x206   :  { %v10050_v12 = vmax.f32 %v3014_v48, %v3015_v44  ;;  %v2981_v56 = vmax.f32 %v2672_v34, %v2918_v26  ;;  %7248 = vmatprep.mubr.msk.f32.mxu0 %vm3066_vm2, %v9876_v47  ;;  %7322 = vmatprep.mubr.msk.f32.mxu1 %vm3066_vm2, %v9876_v47  ;;  %v8061_v5 = vpack.c.bf16 %v5656_v0, %v5655_v54  ;;  %v5722_v44 = vld [vmem:[%s10707_s5 + $0x140] sm:$0xff]  ;;  %v5723_v48 = vld [vmem:[%s10707_s5 + $0x148] sm:$0xff]  ;;  %v5740_v54 = vld [vmem:[%s10706_s4 + $0x178] sm:$0xff] }
 0x207   :  { %v3017_v22 = vadd.f32 %v9848_v6, %v2982_v42  ;;  %8054 = vmatprep.subr.bf16.mxu0 %v8053_v49  ;;  %8074 = vmatprep.subr.bf16.mxu1 %v8073_v50  ;;  %v8125_v45 = vpack.c.bf16 %v5724_v52, %v5723_v48  ;;  %v5737_v42 = vld [vmem:[%s10706_s4 + $0x160] sm:$0xff]  ;;  %v5738_v26 = vld [vmem:[%s10706_s4 + $0x168] sm:$0xff]  ;;  %v5762_v0 = vld [vmem:[%s10707_s5 + $0x178] sm:$0xff] }
 0x208   :  { %v3016_v57 = vadd.f32 %v9848_v6, %v2981_v56  ;;  %7249 = vmatmul.mubr.msk.f32.gmra.mrb[30].mxu0 %vm3066_vm2, %v9896_v61  ;;  %7323 = vmatmul.mubr.msk.f32.gmra.mrb[30].mxu1 %vm3066_vm2, %v9896_v61  ;;  %v5759_v56 = vld [vmem:[%s10707_s5 + $0x160] sm:$0xff]  ;;  %v4475_v48 = vld [vmem:[%s10709_s7 + $0x48] sm:$0xff] }
 0x209   :  { %8056 = vmatpush3.bf16.msra.mxu0 %v8053_v49  ;;  %8076 = vmatpush3.bf16.msra.mxu1 %v8073_v50  ;;  %v8121_v49 = vpack.c.bf16 %v5722_v44, %v5721_v43  ;;  %v5701_v50 = vld [vmem:[%s10706_s4 + $0x148] sm:$0xff]  ;;  %v4470_v44 = vld [vmem:[%s10709_s7 + $0x20] sm:$0xff] }
 0x20a   :  { %v10074_v6 = vmax.f32 %v3016_v57, %v3017_v22  ;;  %7251 = vmatprep.mubr.msk.f32.mxu0 %vm3066_vm2, %v9916_v7  ;;  %7325 = vmatprep.mubr.msk.f32.mxu1 %vm3066_vm2, %v9916_v7  ;;  %v8105_v34 = vpack.c.bf16 %v5702_v51, %v5701_v50  ;;  %v5760_v22 = vld [vmem:[%s10707_s5 + $0x168] sm:$0xff]  ;;  %v5761_v57 = vld [vmem:[%s10707_s5 + $0x170] sm:$0xff]  ;;  %v4474_v51 = vld [vmem:[%s10709_s7 + $0x40] sm:$0xff] }
 0x20b   :  { %8058 = vmatprep.subr.bf16.mxu0 %v8057_v58  ;;  %8078 = vmatprep.subr.bf16.mxu1 %v8077_v59  ;;  %v8153_v62 = vpack.c.bf16 %v5762_v0, %v5761_v57  ;;  %v8197_v52 = vpack.c.bf16 %v4475_v48, %v4474_v51  ;;  %v5806_v57 = vld [vmem:[%s10709_s7 + $0xf8] sm:$0xff] }
 0x20c   :  { %7252 = vmatmul.mubr.msk.f32.gmra.mrb[32].mxu0 %vm3066_vm2, %v9936_v40  ;;  %7326 = vmatmul.mubr.msk.f32.gmra.mrb[32].mxu1 %vm3066_vm2, %v9936_v40 }
 0x20d   :  { %8060 = vmatpush3.bf16.msra.mxu0 %v8057_v58  ;;  %8080 = vmatpush3.bf16.msra.mxu1 %v8077_v59  ;;  %v8129_v58 = vpack.c.bf16 %v5738_v26, %v5737_v42  ;;  %v5739_v59 = vld [vmem:[%s10706_s4 + $0x170] sm:$0xff] }
 0x20e   :  { %7254 = vmatprep.mubr.msk.f32.mxu0 %vm3066_vm2, %v9944_v24  ;;  %7328 = vmatprep.mubr.msk.f32.mxu1 %vm3066_vm2, %v9944_v24  ;;  %v8133_v60 = vpack.c.bf16 %v5740_v54, %v5739_v59  ;;  %v5805_v54 = vld [vmem:[%s10709_s7 + $0xf0] sm:$0xff] }
 0x20f   :  { %8062 = vmatprep.subr.bf16.mxu0 %v8061_v5  ;;  %8082 = vmatprep.subr.bf16.mxu1 %v8081_v1 }
 0x210   :  { %7255 = vmatmul.mubr.msk.f32.gmra.mrb[34].mxu0 %vm3066_vm2, %v9972_v55  ;;  %7329 = vmatmul.mubr.msk.f32.gmra.mrb[34].mxu1 %vm3066_vm2, %v9972_v55 }
 0x211   :  { %8064 = vmatpush3.bf16.msra.mxu0 %v8061_v5  ;;  %8084 = vmatpush3.bf16.msra.mxu1 %v8081_v1  ;;  %v5741_v5 = vld [vmem:[%s10706_s4 + $0x180] sm:$0xff]  ;;  %v5742_v1 = vld [vmem:[%s10706_s4 + $0x188] sm:$0xff] }
 0x212   :  { %7257 = vmatprep.mubr.msk.f32.mxu0 %vm3066_vm2, %v9986_v63  ;;  %7331 = vmatprep.mubr.msk.f32.mxu1 %vm3066_vm2, %v9986_v63  ;;  %v8137_v3 = vpack.c.bf16 %v5742_v1, %v5741_v5 }
 0x213   :  { %8066 = vmatprep.subr.bf16.mxu0 %v8065_v4  ;;  %8086 = vmatprep.subr.bf16.mxu1 %v8085_v16 }
 0x214   :  { %7258 = vmatmul.mubr.msk.f32.gmra.mrb[36].mxu0 %vm3066_vm2, %v9996_v21  ;;  %7332 = vmatmul.mubr.msk.f32.gmra.mrb[36].mxu1 %vm3066_vm2, %v9996_v21 }
 0x215   :  { %8068 = vmatpush3.bf16.msra.mxu0 %v8065_v4  ;;  %8088 = vmatpush3.bf16.msra.mxu1 %v8085_v16  ;;  %v5743_v4 = vld [vmem:[%s10706_s4 + $0x190] sm:$0xff]  ;;  %v5744_v16 = vld [vmem:[%s10706_s4 + $0x198] sm:$0xff] }
 0x216   :  { %7356 = vmatprep.mubr.msk.f32.mxu0 %vm3066_vm2, %v9876_v47  ;;  %7393 = vmatprep.mubr.msk.f32.mxu1 %vm3066_vm2, %v9876_v47  ;;  %v5718_v47 = vld [vmem:[%s10707_s5 + $0x120] sm:$0xff]  ;;  %v8141_v28 = vpack.c.bf16 %v5744_v16, %v5743_v4 }
 0x217   :  { %7354 = vmatprep.subr.msk.mxu0 %vm3097_vm1, %v5659_v9  ;;  %7391 = vmatprep.subr.msk.mxu1 %vm3097_vm1, %v5681_v25  ;;  %v8113_v10 = vpack.c.bf16 %v5718_v47, %v5717_v38  ;;  %v5747_v38 = vld [vmem:[%s10706_s4 + $0x1b0] sm:$0xf] }
 0x218   :  { %v5769_v47 = vld [vmem:[%s10707_s5 + $0x1b0] sm:$0xf] }
 0x219   :  { %7355 = vmatpush3.msk.msra.mxu0 %vm3097_vm1, %v5659_v9  ;;  %7392 = vmatpush3.msk.msra.mxu1 %vm3097_vm1, %v5681_v25  ;;  %v5765_v9 = vld [vmem:[%s10707_s5 + $0x190] sm:$0xff]  ;;  %v5766_v25 = vld [vmem:[%s10707_s5 + $0x198] sm:$0xff] }
 0x21a   :  { %7357 = vmatmul.mubr.msk.f32.vlgmr.msra.gmra.mrb[28].mxu0 %vm3066_vm2, %v9896_v61  ;;  %7394 = vmatmul.mubr.msk.f32.vlgmr.msra.gmra.mrb[28].mxu1 %vm3066_vm2, %v9896_v61  ;;  %v8161_v29 = vpack.c.bf16 %v5766_v25, %v5765_v9  ;;  %v5795_v9 = vld [vmem:[%s10709_s7 + $0xa8] sm:$0xff]  ;;  %v5807_v25 = vld [vmem:[%s10709_s7 + $0x100] sm:$0xff] }
 0x21b   :  { %8090 = vmatprep.subr.bf16.mxu0 %v8089_v32  ;;  %8110 = vmatprep.subr.bf16.mxu1 %v8109_v33 }
 0x21c   :  { %7359 = vmatprep.mubr.msk.f32.mxu0 %vm3066_vm2, %v9916_v7  ;;  %7396 = vmatprep.mubr.msk.f32.mxu1 %vm3066_vm2, %v9916_v7 }
 0x21d   :  { %8092 = vmatpush3.bf16.msra.mxu0 %v8089_v32  ;;  %8112 = vmatpush3.bf16.msra.mxu1 %v8109_v33  ;;  %v5767_v32 = vld [vmem:[%s10707_s5 + $0x1a0] sm:$0xff]  ;;  %v5768_v33 = vld [vmem:[%s10707_s5 + $0x1a8] sm:$0xff] }
 0x21e   :  { %7360 = vmatmul.mubr.msk.f32.gmra.mrb[30].mxu0 %vm3066_vm2, %v9936_v40  ;;  %7397 = vmatmul.mubr.msk.f32.gmra.mrb[30].mxu1 %vm3066_vm2, %v9936_v40  ;;  %v8165_v37 = vpack.c.bf16 %v5768_v33, %v5767_v32 }
 0x21f   :  { %8094 = vmatprep.subr.bf16.mxu0 %v8093_v39  ;;  %8114 = vmatprep.subr.bf16.mxu1 %v8113_v10 }
 0x220   :  { %7362 = vmatprep.mubr.msk.f32.mxu0 %vm3066_vm2, %v9944_v24  ;;  %7399 = vmatprep.mubr.msk.f32.mxu1 %vm3066_vm2, %v9944_v24 }
 0x221   :  { %8096 = vmatpush3.bf16.msra.mxu0 %v8093_v39  ;;  %8116 = vmatpush3.bf16.msra.mxu1 %v8113_v10  ;;  %v4466_v39 = vld [vmem:[%s10709_s7] sm:$0xff]  ;;  %v4467_v10 = vld [vmem:[%s10709_s7 + $0x8] sm:$0xff] }
 0x222   :  { %7363 = vmatmul.mubr.msk.f32.gmra.mrb[32].mxu0 %vm3066_vm2, %v9972_v55  ;;  %7400 = vmatmul.mubr.msk.f32.gmra.mrb[32].mxu1 %vm3066_vm2, %v9972_v55  ;;  %v8185_v14 = vpack.c.bf16 %v4467_v10, %v4466_v39  ;;  %v5796_v39 = vld [vmem:[%s10709_s7 + $0xb0] sm:$0xff] }
 0x223   :  { %8098 = vmatprep.subr.bf16.mxu0 %v8097_v18  ;;  %8118 = vmatprep.subr.bf16.mxu1 %v8117_v19 }
 0x224   :  { %7365 = vmatprep.mubr.msk.f32.mxu0 %vm3066_vm2, %v9986_v63  ;;  %7402 = vmatprep.mubr.msk.f32.mxu1 %vm3066_vm2, %v9986_v63 }
 0x225   :  { %8100 = vmatpush3.bf16.msra.mxu0 %v8097_v18  ;;  %8120 = vmatpush3.bf16.msra.mxu1 %v8117_v19  ;;  %v4469_v18 = vld [vmem:[%s10709_s7 + $0x18] sm:$0xff]  ;;  %v5784_v19 = vld [vmem:[%s10709_s7 + $0x60] sm:$0xff] }
 0x226   :  { %7366 = vmatmul.mubr.msk.f32.gmra.mrb[34].mxu0 %vm3066_vm2, %v9996_v21  ;;  %7403 = vmatmul.mubr.msk.f32.gmra.mrb[34].mxu1 %vm3066_vm2, %v9996_v21  ;;  %v8173_v43 = vpack.c.bf16 %v5785_v20, %v5784_v19 }
 0x227   :  { %8102 = vmatprep.subr.bf16.mxu0 %v8101_v46  ;;  %8122 = vmatprep.subr.bf16.mxu1 %v8121_v49 }
 0x228   :  { %7368 = vmatprep.mubr.msk.f32.mxu0 %vm3066_vm2, %v10004_v36  ;;  %7405 = vmatprep.mubr.msk.f32.mxu1 %vm3066_vm2, %v10004_v36 }
 0x229   :  { %8104 = vmatpush3.bf16.msra.mxu0 %v8101_v46  ;;  %8124 = vmatpush3.bf16.msra.mxu1 %v8121_v49  ;;  %v5789_v49 = vld [vmem:[%s10709_s7 + $0x88] sm:$0xff] }
 0x22a   :  { %7369 = vmatmul.mubr.msk.f32.gmra.mrb[36].mxu0 %vm3066_vm2, %v10028_v27  ;;  %7406 = vmatmul.mubr.msk.f32.gmra.mrb[36].mxu1 %vm3066_vm2, %v10028_v27 }
 0x22b   :  { %8106 = vmatprep.subr.bf16.mxu0 %v8105_v34  ;;  %8126 = vmatprep.subr.bf16.mxu1 %v8125_v45 }
 0x22c   :  { %7430 = vmatprep.mubr.msk.f32.mxu0 %vm3066_vm2, %v9896_v61  ;;  %7467 = vmatprep.mubr.msk.f32.mxu1 %vm3066_vm2, %v9896_v61  ;;  %v8149_v61 = vpack.c.bf16 %v5760_v22, %v5759_v56  ;;  %v10461_v56 = vld [vmem:[%s10710_s6] ss:$0 sm:$0xff] }
 0x22d   :  { %8108 = vmatpush3.bf16.msra.mxu0 %v8105_v34  ;;  %8128 = vmatpush3.bf16.msra.mxu1 %v8125_v45  ;;  %v5790_v34 = vld [vmem:[%s10709_s7 + $0x90] sm:$0xff]  ;;  %v5791_v45 = vld [vmem:[%s10709_s7 + $0x98] sm:$0xff] }
 0x22e   :  { %7428 = vmatprep.subr.msk.mxu0 %vm3097_vm1, %v5703_v53  ;;  %7465 = vmatprep.subr.msk.mxu1 %vm3097_vm1, %v5725_v41 }
 0x231   :  { %7429 = vmatpush3.msk.msra.mxu0 %vm3097_vm1, %v5703_v53  ;;  %7466 = vmatpush3.msk.msra.mxu1 %vm3097_vm1, %v5725_v41  ;;  %v8182_v53 = vpack.c.bf16 %v5791_v45, %v5790_v34  ;;  %v8589_v41 = vmov 0.0  }
 0x232   :  { %7431 = vmatmul.mubr.msk.f32.vlgmr.msra.gmra.mrb[28].mxu0 %vm3066_vm2, %v9916_v7  ;;  %7468 = vmatmul.mubr.msk.f32.vlgmr.msra.gmra.mrb[28].mxu1 %vm3066_vm2, %v9916_v7 }
 0x233   :  { %8130 = vmatprep.subr.bf16.mxu0 %v8129_v58  ;;  %8150 = vmatprep.subr.bf16.mxu1 %v8149_v61 }
 0x234   :  { %7433 = vmatprep.mubr.msk.f32.mxu0 %vm3066_vm2, %v9936_v40  ;;  %7470 = vmatprep.mubr.msk.f32.mxu1 %vm3066_vm2, %v9936_v40 }
 0x235   :  { %8132 = vmatpush3.bf16.msra.mxu0 %v8129_v58  ;;  %8152 = vmatpush3.bf16.msra.mxu1 %v8149_v61 }
 0x236   :  { %7434 = vmatmul.mubr.msk.f32.gmra.mrb[30].mxu0 %vm3066_vm2, %v9944_v24  ;;  %7471 = vmatmul.mubr.msk.f32.gmra.mrb[30].mxu1 %vm3066_vm2, %v9944_v24 }
 0x237   :  { %8134 = vmatprep.subr.bf16.mxu0 %v8133_v60  ;;  %8154 = vmatprep.subr.bf16.mxu1 %v8153_v62 }
 0x238   :  { %7436 = vmatprep.mubr.msk.f32.mxu0 %vm3066_vm2, %v9972_v55  ;;  %7473 = vmatprep.mubr.msk.f32.mxu1 %vm3066_vm2, %v9972_v55 }
 0x239   :  { %8136 = vmatpush3.bf16.msra.mxu0 %v8133_v60  ;;  %8156 = vmatpush3.bf16.msra.mxu1 %v8153_v62 }
 0x23a   :  { %7437 = vmatmul.mubr.msk.f32.gmra.mrb[32].mxu0 %vm3066_vm2, %v9986_v63  ;;  %7474 = vmatmul.mubr.msk.f32.gmra.mrb[32].mxu1 %vm3066_vm2, %v9986_v63 }
 0x23b   :  { %8138 = vmatprep.subr.bf16.mxu0 %v8137_v3  ;;  %8158 = vmatprep.subr.bf16.mxu1 %v8157_v13 }
 0x23c   :  { %7439 = vmatprep.mubr.msk.f32.mxu0 %vm3066_vm2, %v9996_v21  ;;  %7476 = vmatprep.mubr.msk.f32.mxu1 %vm3066_vm2, %v9996_v21 }
 0x23d   :  { %8140 = vmatpush3.bf16.msra.mxu0 %v8137_v3  ;;  %8160 = vmatpush3.bf16.msra.mxu1 %v8157_v13  ;;  %v8215_v3 = vpack.c.bf16 %v5806_v57, %v5805_v54  ;;  %v5794_v13 = vld [vmem:[%s10709_s7 + $0xa0] sm:$0xff] }
 0x23e   :  { %7440 = vmatmul.mubr.msk.f32.gmra.mrb[34].mxu0 %vm3066_vm2, %v10004_v36  ;;  %7477 = vmatmul.mubr.msk.f32.gmra.mrb[34].mxu1 %vm3066_vm2, %v10004_v36 }
 0x23f   :  { %8142 = vmatprep.subr.bf16.mxu0 %v8141_v28  ;;  %8162 = vmatprep.subr.bf16.mxu1 %v8161_v29 }
 0x240   :  { %7442 = vmatprep.mubr.msk.f32.mxu0 %vm3066_vm2, %v10028_v27  ;;  %7479 = vmatprep.mubr.msk.f32.mxu1 %vm3066_vm2, %v10028_v27 }
 0x241   :  { %8144 = vmatpush3.bf16.msra.mxu0 %v8141_v28  ;;  %8164 = vmatpush3.bf16.msra.mxu1 %v8161_v29  ;;  %v5808_v28 = vld [vmem:[%s10709_s7 + $0x108] sm:$0xff] }
 0x242   :  { %7443 = vmatmul.mubr.msk.f32.gmra.mrb[36].mxu0 %vm3066_vm2, %v10050_v12  ;;  %7480 = vmatmul.mubr.msk.f32.gmra.mrb[36].mxu1 %vm3066_vm2, %v10050_v12 }
 0x243   :  { %8146 = vmatprep.subr.bf16.mxu0 %v8145_v35  ;;  %8166 = vmatprep.subr.bf16.mxu1 %v8165_v37 }
 0x244   :  { %7504 = vmatprep.mubr.msk.f32.mxu0 %vm3066_vm2, %v9916_v7  ;;  %7541 = vmatprep.mubr.msk.f32.mxu1 %vm3066_vm2, %v9916_v7  ;;  %v5783_v7 = vld [vmem:[%s10709_s7 + $0x58] sm:$0xff] }
 0x245   :  { %8148 = vmatpush3.bf16.msra.mxu0 %v8145_v35  ;;  %8168 = vmatpush3.bf16.msra.mxu1 %v8165_v37  ;;  %v8170_v15 = vpack.c.bf16 %v5783_v7, %v5782_v11  ;;  %v5797_v7 = vld [vmem:[%s10709_s7 + $0xb8] sm:$0xff] }
 0x246   :  { %7502 = vmatprep.subr.msk.mxu0 %vm3097_vm1, %v5747_v38  ;;  %7539 = vmatprep.subr.msk.mxu1 %vm3097_vm1, %v5769_v47 }
 0x249   :  { %7503 = vmatpush3.msk.msra.mxu0 %vm3097_vm1, %v5747_v38  ;;  %7540 = vmatpush3.msk.msra.mxu1 %vm3097_vm1, %v5769_v47  ;;  %v8200_v38 = vpack.c.bf16 %v5795_v9, %v5794_v13  ;;  %v8218_v47 = vpack.c.bf16 %v5808_v28, %v5807_v25  ;;  %v5818_v13 = vld [vmem:[%s10709_s7 + $0x150] sm:$0xff]  ;;  %v5820_v9 = vld [vmem:[%s10709_s7 + $0x160] sm:$0xff]  ;;  %v5821_v25 = vld [vmem:[%s10709_s7 + $0x168] sm:$0xff] }
 0x24a   :  { %7505 = vmatmul.mubr.msk.f32.vlgmr.msra.gmra.mrb[28].mxu0 %vm3066_vm2, %v9936_v40  ;;  %7542 = vmatmul.mubr.msk.f32.vlgmr.msra.gmra.mrb[28].mxu1 %vm3066_vm2, %v9936_v40  ;;  %v8188_v40 = vpack.c.bf16 %v4469_v18, %v4468_v17  ;;  %v8236_v28 = vpack.c.bf16 %v5821_v25, %v5820_v9  ;;  %v5005_v9 = vld [vmem:[%s10712_s11 + $0x50] sm:$0xf]  ;;  %v5828_v25 = vld [vmem:[%s10714_s10] ss:$0 sm:$0xff] }
 0x24b   :  { %7507 = vmatprep.mubr.msk.f32.mxu0 %vm3066_vm2, %v9944_v24  ;;  %7544 = vmatprep.mubr.msk.f32.mxu1 %vm3066_vm2, %v9944_v24  ;;  %v4471_v24 = vld [vmem:[%s10709_s7 + $0x28] sm:$0xff] }
 0x24c   :  { %8184 = vmatprep.subr.bf16.mxu1 %v8587_v23  ;;  %8169 = vmatprep.subr.bf16.mxu0 %v8587_v23 }
 0x24d   :  { %8186 = vmatpush3.bf16.msra.mxu1 %v8185_v14  ;;  %8171 = vmatpush3.bf16.msra.mxu0 %v8170_v15  ;;  %v5809_v14 = vld [vmem:[%s10709_s7 + $0x110] sm:$0xff]  ;;  %v5810_v15 = vld [vmem:[%s10709_s7 + $0x118] sm:$0xff] }
 0x24e   :  { %7508 = vmatmul.mubr.msk.f32.gmra.mrb[30].mxu0 %vm3066_vm2, %v9972_v55  ;;  %7545 = vmatmul.mubr.msk.f32.gmra.mrb[30].mxu1 %vm3066_vm2, %v9972_v55  ;;  %v8191_v55 = vpack.c.bf16 %v4471_v24, %v4470_v44  ;;  %v8203_v24 = vpack.c.bf16 %v5797_v7, %v5796_v39  ;;  %v4900_v39 = vld [vmem:[%s10711_s9 + $0x10] sm:$0xff]  ;;  %v4902_v7 = vld [vmem:[%s10711_s9 + $0x20] sm:$0xff] }
 0x24f   :  { %7510 = vmatprep.mubr.msk.f32.mxu0 %vm3066_vm2, %v9986_v63  ;;  %7547 = vmatprep.mubr.msk.f32.mxu1 %vm3066_vm2, %v9986_v63  ;;  %v5786_v63 = vld [vmem:[%s10709_s7 + $0x70] sm:$0xff] }
 0x250   :  { %8187 = vmatprep.subr.bf16.mxu1 %v8587_v23  ;;  %8172 = vmatprep.subr.bf16.mxu0 %v8587_v23 }
 0x251   :  { %8189 = vmatpush3.bf16.msra.mxu1 %v8188_v40  ;;  %8174 = vmatpush3.bf16.msra.mxu0 %v8173_v43 }
 0x252   :  { %7511 = vmatmul.mubr.msk.f32.gmra.mrb[32].mxu0 %vm3066_vm2, %v9996_v21  ;;  %7548 = vmatmul.mubr.msk.f32.gmra.mrb[32].mxu1 %vm3066_vm2, %v9996_v21  ;;  %v5787_v21 = vld [vmem:[%s10709_s7 + $0x78] sm:$0xff] }
 0x253   :  { %7513 = vmatprep.mubr.msk.f32.mxu0 %vm3066_vm2, %v10004_v36  ;;  %7550 = vmatprep.mubr.msk.f32.mxu1 %vm3066_vm2, %v10004_v36  ;;  %v4472_v36 = vld [vmem:[%s10709_s7 + $0x30] sm:$0xff] }
 0x254   :  { %8190 = vmatprep.subr.bf16.mxu1 %v8587_v23  ;;  %8175 = vmatprep.subr.bf16.mxu0 %v8587_v23 }
 0x255   :  { %8192 = vmatpush3.bf16.msra.mxu1 %v8191_v55  ;;  %v8221_v55 = vpack.c.bf16 %v5810_v15, %v5809_v14  ;;  %v4903_v14 = vld [vmem:[%s10711_s9 + $0x28] sm:$0xff] }
 0x256   :  { %7514 = vmatmul.mubr.msk.f32.gmra.mrb[34].mxu0 %vm3066_vm2, %v10028_v27  ;;  %7551 = vmatmul.mubr.msk.f32.gmra.mrb[34].mxu1 %vm3066_vm2, %v10028_v27  ;;  %v8176_v27 = vpack.c.bf16 %v5787_v21, %v5786_v63  ;;  %v5798_v63 = vld [vmem:[%s10709_s7 + $0xc0] sm:$0xff]  ;;  %v8251_v15 = vpack.c.bf16 %v4903_v14, %v4902_v7 }
 0x257   :  { %7516 = vmatprep.mubr.msk.f32.mxu0 %vm3066_vm2, %v10050_v12  ;;  %7553 = vmatprep.mubr.msk.f32.mxu1 %vm3066_vm2, %v10050_v12  ;;  %v4473_v12 = vld [vmem:[%s10709_s7 + $0x38] sm:$0xff] }
 0x258   :  { %8193 = vmatprep.subr.bf16.mxu1 %v8587_v23  ;;  %v8194_v46 = vpack.c.bf16 %v4473_v12, %v4472_v36  ;;  %8177 = vmatpush3.bf16.msra.mxu0 %v8176_v27  ;;  %v5799_v27 = vld [vmem:[%s10709_s7 + $0xc8] sm:$0xff]  ;;  %v5811_v12 = vld [vmem:[%s10709_s7 + $0x120] sm:$0xff] }
 0x259   :  { %8178 = vmatprep.subr.bf16.mxu0 %v8587_v23  ;;  %v8206_v45 = vpack.c.bf16 %v5799_v27, %v5798_v63  ;;  %v4910_v63 = vld [vmem:[%s10711_s9 + $0x60] sm:$0xff]  ;;  %v4912_v27 = vld [vmem:[%s10711_s9 + $0x70] sm:$0xff] }
 0x25a   :  { %7517 = vmatmul.mubr.msk.f32.gmra.mrb[36].mxu0 %vm3066_vm2, %v10074_v6  ;;  %7554 = vmatmul.mubr.msk.f32.gmra.mrb[36].mxu1 %vm3066_vm2, %v10074_v6  ;;  %v5788_v6 = vld [vmem:[%s10709_s7 + $0x80] sm:$0xff] }
 0x25b   :  { %8195 = vmatpush3.bf16.msra.mxu1 %v8194_v46  ;;  %v8179_v50 = vpack.c.bf16 %v5789_v49, %v5788_v6  ;;  %7599 = vmatprep.mubr.msk.f32.mxu1 %vm8588_vm3, %v8589_v41  ;;  %v5812_v46 = vld [vmem:[%s10709_s7 + $0x128] sm:$0xff] }
 0x25c   :  { %8196 = vmatprep.subr.bf16.mxu1 %v8587_v23  ;;  %7576 = vmatprep.mubr.msk.f32.mxu0 %vm8588_vm3, %v8589_v41 }
 0x25d   :  { %8180 = vmatpush3.bf16.msra.mxu0 %v8179_v50 }
 0x25e   :  { %8181 = vmatprep.subr.bf16.mxu0 %v8587_v23 }
 0x25f   :  { %8198 = vmatpush3.bf16.msra.mxu1 %v8197_v52 }
 0x260   :  { %8214 = vmatprep.subr.bf16.mxu1 %v8587_v23 }
 0x261   :  { %8183 = vmatpush3.bf16.msra.mxu0 %v8182_v53  ;;  %v8224_v53 = vpack.c.bf16 %v5812_v46, %v5811_v12  ;;  %v4995_v12 = vld [vmem:[%s10712_s11] sm:$0xff]  ;;  %v4996_v46 = vld [vmem:[%s10712_s11 + $0x8] sm:$0xff] }
 0x262   :  { %8199 = vmatprep.subr.bf16.mxu0 %v8587_v23 }
 0x31d   :  { %v7506_v42 = vpop.f32.mrb[28].mxu0  ;;  %v7543_v26 = vpop.f32.mrb[28].mxu1 }
 0x31e   :  { %v4435_v22 = vmax.f32 %v7506_v42, %v7543_v26  ;;  %v4235_v58 = vpop.f32.mrb[29].mxu0  ;;  %v4375_v61 = vpop.f32.mrb[29].mxu1  ;;  %v5800_v42 = vld [vmem:[%s10709_s7 + $0xd0] sm:$0xff] }
 0x31f   :  { %v4434_v59 = vmax.f32 %v4235_v58, %v4375_v61  ;;  %v5801_v58 = vld [vmem:[%s10709_s7 + $0xd8] sm:$0xff]  ;;  %v5813_v61 = vld [vmem:[%s10709_s7 + $0x130] sm:$0xff] }
 0x320   :  { %v4452_v0 = vadd.f32 %v10461_v56, %v4435_v22 }
 0x321   :  { %v4451_v60 = vadd.f32 %v10461_v56, %v4434_v59  ;;  %v7509_v62 = vpop.f32.mrb[30].mxu0  ;;  %v7546_v5 = vpop.f32.mrb[30].mxu1  ;;  %v5814_v59 = vld [vmem:[%s10709_s7 + $0x138] sm:$0xff] }
 0x322   :  { %v4437_v1 = vmax.f32 %v7509_v62, %v7546_v5  ;;  %v4245_v8 = vpop.f32.mrb[31].mxu0  ;;  %v4385_v2 = vpop.f32.mrb[31].mxu1  ;;  %v5802_v5 = vld [vmem:[%s10709_s7 + $0xe0] sm:$0xff] }
 0x323   :  { %v4461_v4 = vmax.f32 %v4451_v60, %v4452_v0  ;;  %v4436_v16 = vmax.f32 %v4245_v8, %v4385_v2  ;;  %v8209_v0 = vpack.c.bf16 %v5801_v58, %v5800_v42  ;;  %v8227_v60 = vpack.c.bf16 %v5814_v59, %v5813_v61  ;;  %v5816_v8 = vld [vmem:[%s10709_s7 + $0x140] sm:$0xff]  ;;  %v5817_v2 = vld [vmem:[%s10709_s7 + $0x148] sm:$0xff] }
 0x324   :  { %v4454_v29 = vadd.f32 %v10461_v56, %v4437_v1  ;;  %v5803_v1 = vld [vmem:[%s10709_s7 + $0xe8] sm:$0xff] }
 0x325   :  { %v4453_v30 = vadd.f32 %v10461_v56, %v4436_v16  ;;  %v7512_v31 = vpop.f32.mrb[32].mxu0  ;;  %v7549_v32 = vpop.f32.mrb[32].mxu1  ;;  %7600 = vmatmul.mubr.msk.f32.vlgmr.msra.gmra.mrb[38].mxu1 %vm4487_vm4, %v4461_v4  ;;  %v5819_v4 = vld [vmem:[%s10709_s7 + $0x158] sm:$0xff] }
 0x326   :  { %v4439_v33 = vmax.f32 %v7512_v31, %v7549_v32  ;;  %8216 = vmatpush3.bf16.msra.mxu1 %v8215_v3  ;;  %v4255_v35 = vpop.f32.mrb[33].mxu0  ;;  %v4395_v37 = vpop.f32.mrb[33].mxu1  ;;  %7645 = vmatprep.mubr.msk.f32.mxu1 %vm8588_vm3, %v8589_v41  ;;  %v8230_v3 = vpack.c.bf16 %v5817_v2, %v5816_v8  ;;  %v8233_v16 = vpack.c.bf16 %v5819_v4, %v5818_v13  ;;  %v5824_v32 = vld [vmem:[%s10709_s7 + $0x180] sm:$0xff]  ;;  %v5004_v4 = vld [vmem:[%s10712_s11 + $0x48] sm:$0xff] }
 0x327   :  { %v4462_v10 = vmax.f32 %v4453_v30, %v4454_v29  ;;  %v4438_v11 = vmax.f32 %v4255_v35, %v4395_v37  ;;  %8217 = vmatprep.subr.bf16.mxu1 %v8587_v23  ;;  %v5822_v29 = vld [vmem:[%s10709_s7 + $0x170] sm:$0xff]  ;;  %v5823_v30 = vld [vmem:[%s10709_s7 + $0x178] sm:$0xff]  ;;  %v4898_v37 = vld [vmem:[%s10711_s9] sm:$0xff] }
 0x328   :  { %v10502_v17 = vadd.f32 %v10461_v56, %v4439_v33  ;;  %v8239_v31 = vpack.c.bf16 %v5823_v30, %v5822_v29  ;;  %v5825_v33 = vld [vmem:[%s10709_s7 + $0x188] sm:$0xff]  ;;  %v5003_v13 = vld [vmem:[%s10712_s11 + $0x40] sm:$0xff] }
 0x329   :  { %v10505_v18 = vadd.f32 %v10461_v56, %v4438_v11  ;;  %v7515_v19 = vpop.f32.mrb[34].mxu0  ;;  %v7552_v20 = vpop.f32.mrb[34].mxu1  ;;  %7577 = vmatmul.mubr.msk.f32.vlgmr.msra.gmra.mrb[38].mxu0 %vm4487_vm4, %v4462_v10  ;;  %v8242_v35 = vpack.c.bf16 %v5825_v33, %v5824_v32  ;;  %v4901_v10 = vld [vmem:[%s10711_s9 + $0x18] sm:$0xff] }
 0x32a   :  { %v4441_v40 = vmax.f32 %v7515_v19, %v7552_v20  ;;  %8201 = vmatpush3.bf16.msra.mxu0 %v8200_v38  ;;  %8219 = vmatpush3.bf16.msra.mxu1 %v8218_v47  ;;  %v4265_v43 = vpop.f32.mrb[35].mxu0  ;;  %v4405_v44 = vpop.f32.mrb[35].mxu1  ;;  %v4899_v38 = vld [vmem:[%s10711_s9 + $0x8] sm:$0xff]  ;;  %v8248_v11 = vpack.c.bf16 %v4901_v10, %v4900_v39  ;;  %v4906_v20 = vld [vmem:[%s10711_s9 + $0x40] sm:$0xff] }
 0x32b   :  { %v4463_v21 = vmax.f32 %v10505_v18, %v10502_v17  ;;  %v4440_v36 = vmax.f32 %v4265_v43, %v4405_v44  ;;  %8202 = vmatprep.subr.bf16.mxu0 %v8587_v23  ;;  %8220 = vmatprep.subr.bf16.mxu1 %v8587_v23  ;;  %v8245_v47 = vpack.c.bf16 %v4899_v38, %v4898_v37  ;;  %v4904_v17 = vld [vmem:[%s10711_s9 + $0x30] sm:$0xff]  ;;  %v4905_v18 = vld [vmem:[%s10711_s9 + $0x38] sm:$0xff] }
 0x32c   :  { %v4458_v6 = vadd.f32 %v10461_v56, %v4441_v40  ;;  %7622 = vmatprep.mubr.msk.f32.mxu0 %vm8588_vm3, %v8589_v41  ;;  %v8254_v19 = vpack.c.bf16 %v4905_v18, %v4904_v17  ;;  %v4907_v40 = vld [vmem:[%s10711_s9 + $0x48] sm:$0xff]  ;;  %v4908_v44 = vld [vmem:[%s10711_s9 + $0x50] sm:$0xff] }
 0x32d   :  { %v4457_v49 = vadd.f32 %v10461_v56, %v4440_v36  ;;  %v7518_v50 = vpop.f32.mrb[36].mxu0  ;;  %v7555_v51 = vpop.f32.mrb[36].mxu1  ;;  %v8257_v43 = vpack.c.bf16 %v4907_v40, %v4906_v20 }
 0x32e   :  { %v4443_v48 = vmax.f32 %v7518_v50, %v7555_v51  ;;  %8204 = vmatpush3.bf16.msra.mxu0 %v8203_v24  ;;  %8222 = vmatpush3.bf16.msra.mxu1 %v8221_v55  ;;  %v4275_v52 = vpop.f32.mrb[37].mxu0  ;;  %v4415_v34 = vpop.f32.mrb[37].mxu1  ;;  %v4909_v24 = vld [vmem:[%s10711_s9 + $0x58] sm:$0xff] }
 0x32f   :  { %v4464_v26 = vmax.f32 %v4457_v49, %v4458_v6  ;;  %v4442_v22 = vmax.f32 %v4275_v52, %v4415_v34  ;;  %8205 = vmatprep.subr.bf16.mxu0 %v8587_v23  ;;  %8223 = vmatprep.subr.bf16.mxu1 %v8587_v23  ;;  %v8260_v55 = vpack.c.bf16 %v4909_v24, %v4908_v44  ;;  %v4997_v6 = vld [vmem:[%s10712_s11 + $0x10] sm:$0xff]  ;;  %v4998_v50 = vld [vmem:[%s10712_s11 + $0x18] sm:$0xff]  ;;  %v5000_v52 = vld [vmem:[%s10712_s11 + $0x28] sm:$0xff] }
 0x330   :  { %v4460_v54 = vadd.f32 %v10461_v56, %v4443_v48  ;;  %v8266_v49 = vpack.c.bf16 %v4996_v46, %v4995_v12  ;;  %v8269_v51 = vpack.c.bf16 %v4998_v50, %v4997_v6  ;;  %v4999_v48 = vld [vmem:[%s10712_s11 + $0x20] sm:$0xff] }
 0x331   :  { %v4459_v57 = vadd.f32 %v10461_v56, %v4442_v22  ;;  %v8212_v56 = vpack.c.bf16 %v5803_v1, %v5802_v5  ;;  %v8272_v34 = vpack.c.bf16 %v5000_v52, %v4999_v48 }
 0x332   :  { %8207 = vmatpush3.bf16.msra.mxu0 %v8206_v45  ;;  %8225 = vmatpush3.bf16.msra.mxu1 %v8224_v53  ;;  %v5001_v45 = vld [vmem:[%s10712_s11 + $0x30] sm:$0xff]  ;;  %v5002_v53 = vld [vmem:[%s10712_s11 + $0x38] sm:$0xff] }
 0x333   :  { %v4465_v62 = vmax.f32 %v4459_v57, %v4460_v54  ;;  %8208 = vmatprep.subr.bf16.mxu0 %v8587_v23  ;;  %8226 = vmatprep.subr.bf16.mxu1 %v8587_v23  ;;  %v8275_v42 = vpack.c.bf16 %v5002_v53, %v5001_v45 }
 0x336   :  { %8210 = vmatpush3.bf16.msra.mxu0 %v8209_v0  ;;  %8228 = vmatpush3.bf16.msra.mxu1 %v8227_v60 }
 0x337   :  { %8211 = vmatprep.subr.bf16.mxu0 %v8587_v23  ;;  %8244 = vmatprep.subr.bf16.mxu1 %v8587_v23 }
 0x339   :  { %7646 = vmatmul.mubr.msk.f32.vlgmr.msra.gmra.mrb[40].mxu1 %vm4487_vm4, %v4464_v26 }
 0x33a   :  { %8213 = vmatpush3.bf16.msra.mxu0 %v8212_v56  ;;  %7701 = vmatprep.mubr.msk.f32.mxu1 %vm8588_vm3, %v8589_v41  ;;  %v5827_v56 = vld [vmem:[%s10713_s8] ss:$0 sm:$0xff] }
 0x33b   :  { %8229 = vmatprep.subr.bf16.mxu0 %v8587_v23  ;;  %8246 = vmatpush3.bf16.msra.mxu1 %v8245_v47 }
 0x33c   :  { %8247 = vmatprep.subr.bf16.mxu1 %v8587_v23 }
 0x33d   :  { %7623 = vmatmul.mubr.msk.f32.vlgmr.msra.gmra.mrb[40].mxu0 %vm4487_vm4, %v4463_v21  ;;  %v4911_v21 = vld [vmem:[%s10711_s9 + $0x68] sm:$0xff] }
 0x33e   :  { %8231 = vmatpush3.bf16.msra.mxu0 %v8230_v3  ;;  %7668 = vmatprep.mubr.msk.f32.mxu0 %vm8588_vm3, %v8589_v41  ;;  %v8263_v36 = vpack.c.bf16 %v4911_v21, %v4910_v63 }
 0x33f   :  { %8232 = vmatprep.subr.bf16.mxu0 %v8587_v23  ;;  %8249 = vmatpush3.bf16.msra.mxu1 %v8248_v11 }
 0x340   :  { %8250 = vmatprep.subr.bf16.mxu1 %v8587_v23 }
 0x342   :  { %8234 = vmatpush3.bf16.msra.mxu0 %v8233_v16  ;;  %v8278_v16 = vpack.c.bf16 %v5004_v4, %v5003_v13 }
 0x343   :  { %8235 = vmatprep.subr.bf16.mxu0 %v8587_v23  ;;  %8252 = vmatpush3.bf16.msra.mxu1 %v8251_v15 }
 0x344   :  { %8253 = vmatprep.subr.bf16.mxu1 %v8587_v23 }
 0x346   :  { %8237 = vmatpush3.bf16.msra.mxu0 %v8236_v28 }
 0x347   :  { %8238 = vmatprep.subr.bf16.mxu0 %v8587_v23  ;;  %8255 = vmatpush3.bf16.msra.mxu1 %v8254_v19 }
 0x348   :  { %8256 = vmatprep.subr.bf16.mxu1 %v8587_v23 }
 0x34a   :  { %8240 = vmatpush3.bf16.msra.mxu0 %v8239_v31 }
 0x34b   :  { %8241 = vmatprep.subr.bf16.mxu0 %v8587_v23  ;;  %8258 = vmatpush3.bf16.msra.mxu1 %v8257_v43 }
 0x34c   :  { %8259 = vmatprep.subr.bf16.mxu1 %v8587_v23 }
 0x34e   :  { %8243 = vmatpush3.bf16.msra.mxu0 %v8242_v35 }
 0x34f   :  { %8265 = vmatprep.subr.bf16.mxu0 %v8587_v23  ;;  %8261 = vmatpush3.bf16.msra.mxu1 %v8260_v55 }
 0x350   :  { %8262 = vmatprep.subr.bf16.mxu1 %v8587_v23 }
 0x351   :  { %7669 = vmatmul.mubr.msk.f32.vlgmr.msra.gmra.mrb[42].mxu0 %vm4487_vm4, %v4465_v62 }
 0x352   :  { %7726 = vmatprep.mubr.msk.f32.mxu0 %vm8588_vm3, %v8589_v41  ;;  %8267 = vmatpush3.bf16.msra.mxu0 %v8266_v49 }
 0x353   :  { %8264 = vmatpush3.bf16.msra.mxu1 %v8263_v36  ;;  %8268 = vmatprep.subr.bf16.mxu0 %v8587_v23 }
 0x354   :  { %7699 = vmatprep.subr.mxu1 %v8589_v41 }
 0x356   :  { %8270 = vmatpush3.bf16.msra.mxu0 %v8269_v51 }
 0x357   :  { %7700 = vmatpush3.msra.mxu1 %v4912_v27  ;;  %8271 = vmatprep.subr.bf16.mxu0 %v8587_v23 }
 0x35a   :  { %8273 = vmatpush3.bf16.msra.mxu0 %v8272_v34 }
 0x35b   :  { %8274 = vmatprep.subr.bf16.mxu0 %v8587_v23 }
 0x35e   :  { %8276 = vmatpush3.bf16.msra.mxu0 %v8275_v42 }
 0x35f   :  { %8277 = vmatprep.subr.bf16.mxu0 %v8587_v23 }
 0x362   :  { %8279 = vmatpush3.bf16.msra.mxu0 %v8278_v16 }
 0x363   :  { %7724 = vmatprep.subr.mxu0 %v8589_v41  ;;  %v5830_v41 = vld [vmem:[%s10715_s12] ss:$0 sm:$0xff] }
 0x366   :  { %7725 = vmatpush3.msk.msra.mxu0 %vm3097_vm1, %v5005_v9 }
 0x3f8   :  { %v4630_v26 = vpop.f32.mrb[38].mxu1 }
 0x3f9   :  { %v7601_v22 = vpop.f32.mrb[39].mxu1 }
 0x3fc   :  { %v4557_v58 = vpop.f32.mrb[38].mxu0 }
 0x3fd   :  { %v4631_v61 = vadd.f32 %v4630_v26, %v4557_v58  ;;  %v7578_v59 = vpop.f32.mrb[39].mxu0 }
 0x40c   :  { %v4799_v54 = vpop.f32.mrb[40].mxu1 }
 0x40d   :  { %v7647_v57 = vpop.f32.mrb[41].mxu1 }
 0x410   :  { %v4714_v0 = vpop.f32.mrb[40].mxu0 }
 0x411   :  { %v4718_v60 = vadd.f32 %v4714_v0, %v4631_v61  ;;  %v7624_v62 = vpop.f32.mrb[41].mxu0 }
 0x413   :  { %v4803_v5 = vadd.f32 %v4799_v54, %v4718_v60 }
 0x424   :  { %v4884_v1 = vpop.f32.mrb[42].mxu0 }
 0x425   :  { %v4888_v8 = vadd.f32 %v4884_v1, %v4803_v5  ;;  %v7670_v2 = vpop.f32.mrb[43].mxu0 }
 0x427   :  { %v4896_v3 = vadd.f32 %v5827_v56, %v4888_v8 }
 0x429   :  { %v4897_v23 = vmax.f32 %v4896_v3, 0.0 }
 0x42b   :  { %7702 = vmatmul.mubr.msk.f32.vlgmr.msra.gmra.mrb[42].mxu1 %vm4920_vm5, %v4897_v23 }
 0x4fe   :  { %v4990_v28 = vpop.f32.mrb[42].mxu1 }
 0x4ff   :  { %v4991_v29 = vadd.f32 %v5828_v25, %v4990_v28  ;;  %v7703_v30 = vpop.f32.mrb[43].mxu1 }
 0x501   :  { %v4994_v31 = vmax.f32 %v4991_v29, 0.0 }
 0x503   :  { %7727 = vmatmul.mubr.msk.f32.vlgmr.msra.gmra.mrb[44].mxu0 %vm3066_vm2, %v4994_v31 }
 0x5d6   :  { %v5085_v32 = vpop.f32.mrb[44].mxu0 }
 0x5d7   :  { %v5086_v33 = vadd.f32 %v5830_v41, %v5085_v32  ;;  %v7728_v35 = vpop.f32.mrb[45].mxu0 }
 0x5d9   :  { %5089 = vst [vmem:[%s10716_s13] sm:$0xff] %v5086_v33 }

</bundles_post_ra>
